<compile_context>
chip_gen: v5e
topology: v5e:2x2
jax: 0.10.0
libtpu: 0.0.40
codegen_flags: <defaults>
</compile_context>

<pallas_src>
import functools
import math

import jax
import jax.numpy as jnp
from jax import lax
from jax.experimental import pallas as pl
from jax.experimental.pallas import tpu as pltpu

BLK = 128  # one vreg lane width; also 4*hidden_dim for this model


# --------------------------- fused forward kernel ---------------------------
def _fused_forward_kernel(T, B, H, n_lstm, n_relu,
                          x_ref, wl_ref, wh_ref, b_ref, out_ref,
                          gin_a, gin_b):
    """Whole LSTMClassifier forward in a single kernel invocation.

    x_ref  : (T*B, 128) bf16, time-major blocks, features zero-padded to 128 lanes.
    wl_ref : (2*n_lstm, 128, 256) bf16. Per layer: [w_ih, w_hh]. Columns are
             [i|f|g|o | f|0|o|0]; rows >= in_dim/H are zero.
    wh_ref : (n_relu+1, 128, 128) bf16 classifier weights (zero padded); the last block is
             the last hidden Linear folded into the output Linear.
    b_ref  : (num_b, 256) f32: LSTM biases (widened like the weights), then head biases
             (real values in cols [0:128)).
    out_ref: (B, 128) f32 lane-dense logits (wrapper slices the real output_dim).
    gin_a/gin_b: (T*B, 256) f32 ping-pong scratch holding x/h @ w_ih + b for the
             current / next LSTM layer.
    """
    GW = 4 * H                                   # 128 = width of the primary gate group
    gin_refs = (gin_a, gin_b)

    # Static lane mask selecting the candidate-cell gate g (tanh); other gates use sigmoid.
    lane = lax.broadcasted_iota(jnp.int32, (B, GW), 1)
    is_g = jnp.logical_and(lane >= 2 * H, lane < 3 * H)

    # Layer-0 input projection hoisted over ALL timesteps: one big MXU matmul.
    gin_a[...] = (jnp.dot(x_ref[...], wl_ref[0],
                          preferred_element_type=jnp.float32) + b_ref[0:1, :])

    h = jnp.zeros((B, GW), jnp.float32)
    for l in range(n_lstm):
        last = (l == n_lstm - 1)
        gin_cur = gin_refs[l % 2]
        gin_nxt = gin_refs[(l + 1) % 2]
        w_hh = wl_ref[2 * l + 1]                 # (128, 256) bf16, loaded once per layer
        if not last:
            w_ih_nxt = wl_ref[2 * (l + 1)]
            b_nxt = b_ref[l + 1:l + 2, :]
        h = jnp.zeros((B, GW), jnp.float32)      # state carried 128 lanes wide;
        c = jnp.zeros((B, GW), jnp.float32)      # only lanes [0:H) are the real state
        for t in range(T):                       # T small & static -> fully unrolled
            # Only h @ W_hh sits on the serial critical path.
            pre = gin_cur[t * B:(t + 1) * B, :] + jnp.dot(
                h.astype(jnp.bfloat16), w_hh, preferred_element_type=jnp.float32)
            a_pre = pre[:, :GW]                  # [i|f|g|o]   (vreg-aligned slice: free)
            b_pre = pre[:, GW:]                  # [f|0|o|0]
            act_a = jnp.where(is_g, jnp.tanh(a_pre), jax.nn.sigmoid(a_pre))
            act_b = jax.nn.sigmoid(b_pre)
            # Half-width (2H = GW/2) rolls are direction-symmetric and run on the XLU;
            # lanes [0:H) below always carry the correct LSTM values.
            ig = act_a * pltpu.roll(act_a, 2 * H, axis=1)         # [0:H) = i * g
            c = act_b * c + ig                                    # [0:H) = f*c + i*g
            h = pltpu.roll(act_b, 2 * H, axis=1) * jnp.tanh(c)    # [0:H) = o * tanh(c)
            if not last:
                # Overlap the NEXT layer's input projection with this layer's recurrence
                # (fills the MXU while it would otherwise idle between serial steps).
                gin_nxt[t * B:(t + 1) * B, :] = (
                    jnp.dot(h.astype(jnp.bfloat16), w_ih_nxt,
                            preferred_element_type=jnp.float32) + b_nxt)

    # Classifier head on hn = h (junk lanes >= H are killed by zero weight rows).
    feats = h
    for i in range(n_relu):
        feats = (jnp.dot(feats.astype(jnp.bfloat16), wh_ref[i],
                         preferred_element_type=jnp.float32)
                 + b_ref[n_lstm + i:n_lstm + i + 1, :GW])
        feats = jnp.maximum(feats, 0.0)
    out_ref[...] = (jnp.dot(feats.astype(jnp.bfloat16), wh_ref[n_relu],
                            preferred_element_type=jnp.float32)
                    + b_ref[n_lstm + n_relu:n_lstm + n_relu + 1, :GW])


# ------------------------------ wrapper / packing ------------------------------
def _pack_params(params):
    """Pack all weights/biases into 3 slabs with the layout the kernel expects."""
    H = params["lstm"][0][1].shape[0]
    n_lstm = len(params["lstm"])
    n_hidden = len(params["hidden"])
    w_o, b_o = params["out"]
    out_dim = w_o.shape[1]
    assert 4 * H == BLK, "kernel layout assumes 4*hidden_dim == 128 (one vreg of gates)"
    assert out_dim <= BLK

    hi = lax.Precision.HIGHEST
    # Fold the last hidden Linear (no ReLU after it in the module) into the output Linear.
    if n_hidden >= 1:
        w_last, b_last = params["hidden"][-1]
        w_out = jnp.dot(w_last, w_o, precision=hi)
        b_out = jnp.dot(b_last, w_o, precision=hi) + b_o
        relu_layers = params["hidden"][:-1]
    else:
        w_out, b_out = w_o, b_o
        relu_layers = []
    n_relu = len(relu_layers)

    def widen(m):                                # (rows, 4H) -> (rows, 8H): [A | f,0,o,0]
        z = jnp.zeros_like(m[:, :H])
        return jnp.concatenate([m, m[:, H:2 * H], z, m[:, 3 * H:], z], axis=1)

    def pad_rows(m, rows):
        return jnp.pad(m, ((0, rows - m.shape[0]), (0, 0)))

    def pad_blk(m):                              # zero pad to (BLK, BLK)
        r, c = m.shape
        assert r <= BLK and c <= BLK, "layer dims must be <= 128 for this packing"
        return jnp.pad(m, ((0, BLK - r), (0, BLK - c)))

    wl_blocks, b_rows = [], []
    for (w_ih, w_hh, b) in params["lstm"]:
        wl_blocks.append(pad_rows(widen(w_ih), BLK))
        wl_blocks.append(pad_rows(widen(w_hh), BLK))
        b_rows.append(widen(b))
    wh_blocks = []
    for (w, b) in relu_layers + [(w_out, b_out)]:
        wh_blocks.append(pad_blk(w))
        b_rows.append(jnp.pad(b, ((0, 0), (0, 2 * BLK - b.shape[1]))))

    wl_slab = jnp.stack(wl_blocks).astype(jnp.bfloat16)             # (2*n_lstm, 128, 256)
    wh_slab = jnp.stack(wh_blocks).astype(jnp.bfloat16)             # (n_relu+1, 128, 128)
    b_slab = jnp.concatenate(b_rows, axis=0).astype(jnp.float32)    # (num_b, 256)
    b_slab = jnp.pad(b_slab, ((0, (-b_slab.shape[0]) % 8), (0, 0)))
    return wl_slab, wh_slab, b_slab, n_relu, out_dim


def lstm_classifier_forward(x, params):
    """x: (B, T, input_dim) batch-first (matches the PyTorch forward)."""
    B, T, D = x.shape
    H = params["lstm"][0][1].shape[0]
    n_lstm = len(params["lstm"])
    assert D <= BLK

    wl_slab, wh_slab, b_slab, n_relu, out_dim = _pack_params(params)

    B_pad = ((B + 7) // 8) * 8                                      # sublane-dense batch
    x_p = jnp.pad(x.astype(jnp.float32),
                  ((0, B_pad - B), (0, 0), (0, BLK - D)))           # lane-dense features
    x_flat = jnp.transpose(x_p, (1, 0, 2)).reshape(T * B_pad, BLK).astype(jnp.bfloat16)

    out_padded = pl.pallas_call(
        functools.partial(_fused_forward_kernel, T, B_pad, H, n_lstm, n_relu),
        out_shape=jax.ShapeDtypeStruct((B_pad, BLK), jnp.float32),
        in_specs=[pl.BlockSpec(memory_space=pltpu.MemorySpace.VMEM)] * 4,
        out_specs=pl.BlockSpec(memory_space=pltpu.MemorySpace.VMEM),
        scratch_shapes=[pltpu.VMEM((T * B_pad, 2 * BLK), jnp.float32),   # gin ping
                        pltpu.VMEM((T * B_pad, 2 * BLK), jnp.float32)],  # gin pong
    )(x_flat, wl_slab, wh_slab, b_slab)
    return out_padded[:B, :out_dim]


# ---------------------------- params (synthetic) -----------------------------
def init_params(key, input_dim, hidden_dim, num_layers, output_dim, hidden_sizes):
    """Deterministic synthetic parameters (PyTorch-style uniform init)."""
    params = {"lstm": [], "hidden": [], "out": None}
    keys = jax.random.split(key, num_layers * 4 + 2 * (len(hidden_sizes) + 1))
    ki = 0

    def u(k, shape, scale):
        return jax.random.uniform(k, shape, jnp.float32, -scale, scale)

    s = 1.0 / math.sqrt(hidden_dim)
    in_dim = input_dim
    for _ in range(num_layers):
        w_ih = u(keys[ki], (in_dim, 4 * hidden_dim), s); ki += 1
        w_hh = u(keys[ki], (hidden_dim, 4 * hidden_dim), s); ki += 1
        b_ih = u(keys[ki], (1, 4 * hidden_dim), s); ki += 1
        b_hh = u(keys[ki], (1, 4 * hidden_dim), s); ki += 1
        params["lstm"].append((w_ih, w_hh, b_ih + b_hh))
        in_dim = hidden_dim

    lin_in = hidden_dim
    for h_size in hidden_sizes:
        sl = 1.0 / math.sqrt(lin_in)
        w = u(keys[ki], (lin_in, h_size), sl); ki += 1
        b = u(keys[ki], (1, h_size), sl); ki += 1
        params["hidden"].append((w, b))
        lin_in = h_size

    last_in = hidden_dim if not hidden_sizes else hidden_sizes[-1]
    so = 1.0 / math.sqrt(last_in)
    w_o = u(keys[ki], (last_in, output_dim), so); ki += 1
    b_o = u(keys[ki], (1, output_dim), so); ki += 1
    params["out"] = (w_o, b_o)
    return params


# ---------------------------- pure-JAX reference ------------------------------
def reference_forward(x, params):
    hi = lax.Precision.HIGHEST
    seq = jnp.transpose(x, (1, 0, 2))
    hn = None
    for (w_ih, w_hh, b) in params["lstm"]:
        T, B, _ = seq.shape
        H = w_hh.shape[0]
        h = jnp.zeros((B, H), jnp.float32)
        c = jnp.zeros((B, H), jnp.float32)
        outs = []
        for t in range(T):
            gates = (jnp.dot(seq[t], w_ih, precision=hi)
                     + jnp.dot(h, w_hh, precision=hi) + b)
            i_g = jax.nn.sigmoid(gates[:, 0 * H:1 * H])
            f_g = jax.nn.sigmoid(gates[:, 1 * H:2 * H])
            g_g = jnp.tanh(gates[:, 2 * H:3 * H])
            o_g = jax.nn.sigmoid(gates[:, 3 * H:4 * H])
            c = f_g * c + i_g * g_g
            h = o_g * jnp.tanh(c)
            outs.append(h)
        seq = jnp.stack(outs)
        hn = h
    feats = hn
    n_hidden = len(params["hidden"])
    for i, (w, b) in enumerate(params["hidden"]):
        feats = jnp.dot(feats, w, precision=hi) + b
        if i < n_hidden - 1:
            feats = jnp.maximum(feats, 0.0)
    w_o, b_o = params["out"]
    return jnp.dot(feats, w_o, precision=hi) + b_o


# ---------------------------------- main ---------------------------------------
if __name__ == "__main__":
    # Module config (small): input_dim=8, hidden_dim=32, num_layers=2,
    # output_dim=5, hidden_sizes=[48, 24], dropout=0.0 (inactive in eval anyway).
    INPUT_DIM, HIDDEN_DIM, NUM_LAYERS, OUTPUT_DIM = 8, 32, 2, 5
    HIDDEN_SIZES = [48, 24]
    B, T = 2, 8

    key = jax.random.PRNGKey(0)
    k_x, k_p = jax.random.split(key)
    x = jax.random.normal(k_x, (B, T, INPUT_DIM), jnp.float32)
    params = init_params(k_p, INPUT_DIM, HIDDEN_DIM, NUM_LAYERS,
                         OUTPUT_DIM, HIDDEN_SIZES)

    out = lstm_classifier_forward(x, params)
    out = jax.block_until_ready(out)
    assert out.shape == (B, OUTPUT_DIM), out.shape

    ref = jax.block_until_ready(reference_forward(x, params))
    # bf16 MXU operands with f32 accumulation vs. an f32 HIGHEST-precision reference.
    assert jnp.allclose(out, ref, atol=3e-2, rtol=3e-2), (
        f"mismatch: max abs diff {jnp.max(jnp.abs(out - ref))}")

    print("KERNEL_OK")
</pallas_src>

<mosaic_0001>
module attributes {stable_mosaic.version = 11 : i64} {
  func.func @_fused_forward_kernel(%arg0: memref<64x128xbf16, #tpu.memory_space<vmem>>, %arg1: memref<4x128x256xbf16, #tpu.memory_space<vmem>>, %arg2: memref<2x128x128xbf16, #tpu.memory_space<vmem>>, %arg3: memref<8x256xf32, #tpu.memory_space<vmem>>, %arg4: memref<8x128xf32, #tpu.memory_space<vmem>>, %arg5: memref<64x256xf32, #tpu.memory_space<vmem>>, %arg6: memref<64x256xf32, #tpu.memory_space<vmem>>) attributes {dimension_semantics = [], scalar_prefetch = 0 : i64, scratch_operands = 2 : i64, tpu.core_type = #tpu.core_type<tc>} {
    %0 = tpu.iota {dimensions = array<i32: 1>} : vector<8x128xi32>
    %c64_i32 = arith.constant 64 : i32
    %1 = vector.broadcast %c64_i32 : i32 to vector<8x128xi32>
    %2 = arith.cmpi sge, %0, %1 : vector<8x128xi32>
    %c96_i32 = arith.constant 96 : i32
    %3 = vector.broadcast %c96_i32 : i32 to vector<8x128xi32>
    %4 = arith.cmpi slt, %0, %3 : vector<8x128xi32>
    %5 = arith.andi %2, %4 : vector<8x128xi1>
    %c0 = arith.constant 0 : index
    %c0_0 = arith.constant 0 : index
    %6 = vector.load %arg0[%c0, %c0_0] : memref<64x128xbf16, #tpu.memory_space<vmem>>, vector<64x128xbf16>
    %c0_1 = arith.constant 0 : index
    %c0_2 = arith.constant 0 : index
    %c0_3 = arith.constant 0 : index
    %7 = vector.load %arg1[%c0_1, %c0_2, %c0_3] : memref<4x128x256xbf16, #tpu.memory_space<vmem>>, vector<1x128x256xbf16>
    %8 = vector.shape_cast %7 : vector<1x128x256xbf16> to vector<128x256xbf16>
    %cst = arith.constant dense<0.000000e+00> : vector<64x256xf32>
    %9 = tpu.matmul %6, %8, %cst {dimension_numbers = #tpu.dot_dimension_numbers<[1], [0], [0], [1], [0, 0, 1, 1], [], []>} : vector<64x128xbf16>, vector<128x256xbf16>, vector<64x256xf32> -> vector<64x256xf32>
    %c0_4 = arith.constant 0 : index
    %c0_5 = arith.constant 0 : index
    %10 = vector.load %arg3[%c0_4, %c0_5] : memref<8x256xf32, #tpu.memory_space<vmem>>, vector<1x256xf32>
    %11 = vector.broadcast %10 : vector<1x256xf32> to vector<64x256xf32>
    %12 = arith.addf %9, %11 : vector<64x256xf32>
    %c0_6 = arith.constant 0 : index
    %c0_7 = arith.constant 0 : index
    %13 = vector.load %arg5[%c0_6, %c0_7] : memref<64x256xf32, #tpu.memory_space<vmem>>, vector<64x256xf32>
    tpu.vector_store %arg5[%c0_6, %c0_7], %12 {strides = array<i32>} : memref<64x256xf32, #tpu.memory_space<vmem>>, vector<64x256xf32>,
    %c1 = arith.constant 1 : index
    %c0_8 = arith.constant 0 : index
    %c0_9 = arith.constant 0 : index
    %14 = vector.load %arg1[%c1, %c0_8, %c0_9] : memref<4x128x256xbf16, #tpu.memory_space<vmem>>, vector<1x128x256xbf16>
    %15 = vector.shape_cast %14 : vector<1x128x256xbf16> to vector<128x256xbf16>
    %c2 = arith.constant 2 : index
    %c0_10 = arith.constant 0 : index
    %c0_11 = arith.constant 0 : index
    %16 = vector.load %arg1[%c2, %c0_10, %c0_11] : memref<4x128x256xbf16, #tpu.memory_space<vmem>>, vector<1x128x256xbf16>
    %17 = vector.shape_cast %16 : vector<1x128x256xbf16> to vector<128x256xbf16>
    %c1_12 = arith.constant 1 : index
    %c0_13 = arith.constant 0 : index
    %18 = vector.load %arg3[%c1_12, %c0_13] : memref<8x256xf32, #tpu.memory_space<vmem>>, vector<1x256xf32>
    %cst_14 = arith.constant 0.000000e+00 : f32
    %19 = vector.broadcast %cst_14 : f32 to vector<8x128xf32>
    %cst_15 = arith.constant 0.000000e+00 : f32
    %20 = vector.broadcast %cst_15 : f32 to vector<8x128xf32>
    %c0_16 = arith.constant 0 : index
    %c0_17 = arith.constant 0 : index
    %21 = vector.load %arg5[%c0_16, %c0_17] : memref<64x256xf32, #tpu.memory_space<vmem>>, vector<8x256xf32>
    %22 = arith.truncf %19 : vector<8x128xf32> to vector<8x128xbf16>
    %cst_18 = arith.constant dense<0.000000e+00> : vector<8x256xf32>
    %23 = tpu.matmul %22, %15, %cst_18 {dimension_numbers = #tpu.dot_dimension_numbers<[1], [0], [0], [1], [0, 0, 1, 1], [], []>} : vector<8x128xbf16>, vector<128x256xbf16>, vector<8x256xf32> -> vector<8x256xf32>
    %24 = arith.addf %21, %23 : vector<8x256xf32>
    %25 = vector.extract_strided_slice %24 {offsets = [0, 0], sizes = [8, 128], strides = [1, 1]} : vector<8x256xf32> to vector<8x128xf32>
    %26 = vector.extract_strided_slice %24 {offsets = [0, 128], sizes = [8, 128], strides = [1, 1]} : vector<8x256xf32> to vector<8x128xf32>
    %27 = math.tanh %25 : vector<8x128xf32>
    %28 = arith.negf %25 : vector<8x128xf32>
    %29 = math.exp %28 : vector<8x128xf32>
    %cst_19 = arith.constant 1.000000e+00 : f32
    %30 = vector.broadcast %cst_19 : f32 to vector<8x128xf32>
    %31 = arith.addf %30, %29 : vector<8x128xf32>
    %32 = arith.divf %30, %31 : vector<8x128xf32>
    %33 = arith.select %5, %27, %32 : vector<8x128xi1>, vector<8x128xf32>
    %34 = arith.negf %26 : vector<8x128xf32>
    %35 = math.exp %34 : vector<8x128xf32>
    %cst_20 = arith.constant 1.000000e+00 : f32
    %36 = vector.broadcast %cst_20 : f32 to vector<8x128xf32>
    %37 = arith.addf %36, %35 : vector<8x128xf32>
    %38 = arith.divf %36, %37 : vector<8x128xf32>
    %c64_i32_21 = arith.constant 64 : i32
    %39 = tpu.dynamic_rotate %33 by %c64_i32_21 dim 1 : vector<8x128xf32>, i32 -> vector<8x128xf32>
    %40 = arith.mulf %33, %39 : vector<8x128xf32>
    %41 = arith.mulf %38, %20 : vector<8x128xf32>
    %42 = arith.addf %41, %40 : vector<8x128xf32>
    %c64_i32_22 = arith.constant 64 : i32
    %43 = tpu.dynamic_rotate %38 by %c64_i32_22 dim 1 : vector<8x128xf32>, i32 -> vector<8x128xf32>
    %44 = math.tanh %42 : vector<8x128xf32>
    %45 = arith.mulf %43, %44 : vector<8x128xf32>
    %46 = arith.truncf %45 : vector<8x128xf32> to vector<8x128xbf16>
    %cst_23 = arith.constant dense<0.000000e+00> : vector<8x256xf32>
    %47 = tpu.matmul %46, %17, %cst_23 {dimension_numbers = #tpu.dot_dimension_numbers<[1], [0], [0], [1], [0, 0, 1, 1], [], []>} : vector<8x128xbf16>, vector<128x256xbf16>, vector<8x256xf32> -> vector<8x256xf32>
    %48 = vector.broadcast %18 : vector<1x256xf32> to vector<8x256xf32>
    %49 = arith.addf %47, %48 : vector<8x256xf32>
    %c0_24 = arith.constant 0 : index
    %c0_25 = arith.constant 0 : index
    %50 = vector.load %arg6[%c0_24, %c0_25] : memref<64x256xf32, #tpu.memory_space<vmem>>, vector<8x256xf32>
    tpu.vector_store %arg6[%c0_24, %c0_25], %49 {strides = array<i32>} : memref<64x256xf32, #tpu.memory_space<vmem>>, vector<8x256xf32>,
    %c8 = arith.constant 8 : index
    %c0_26 = arith.constant 0 : index
    %51 = vector.load %arg5[%c8, %c0_26] : memref<64x256xf32, #tpu.memory_space<vmem>>, vector<8x256xf32>
    %52 = arith.truncf %45 : vector<8x128xf32> to vector<8x128xbf16>
    %cst_27 = arith.constant dense<0.000000e+00> : vector<8x256xf32>
    %53 = tpu.matmul %52, %15, %cst_27 {dimension_numbers = #tpu.dot_dimension_numbers<[1], [0], [0], [1], [0, 0, 1, 1], [], []>} : vector<8x128xbf16>, vector<128x256xbf16>, vector<8x256xf32> -> vector<8x256xf32>
    %54 = arith.addf %51, %53 : vector<8x256xf32>
    %55 = vector.extract_strided_slice %54 {offsets = [0, 0], sizes = [8, 128], strides = [1, 1]} : vector<8x256xf32> to vector<8x128xf32>
    %56 = vector.extract_strided_slice %54 {offsets = [0, 128], sizes = [8, 128], strides = [1, 1]} : vector<8x256xf32> to vector<8x128xf32>
    %57 = math.tanh %55 : vector<8x128xf32>
    %58 = arith.negf %55 : vector<8x128xf32>
    %59 = math.exp %58 : vector<8x128xf32>
    %cst_28 = arith.constant 1.000000e+00 : f32
    %60 = vector.broadcast %cst_28 : f32 to vector<8x128xf32>
    %61 = arith.addf %60, %59 : vector<8x128xf32>
    %62 = arith.divf %60, %61 : vector<8x128xf32>
    %63 = arith.select %5, %57, %62 : vector<8x128xi1>, vector<8x128xf32>
    %64 = arith.negf %56 : vector<8x128xf32>
    %65 = math.exp %64 : vector<8x128xf32>
    %cst_29 = arith.constant 1.000000e+00 : f32
    %66 = vector.broadcast %cst_29 : f32 to vector<8x128xf32>
    %67 = arith.addf %66, %65 : vector<8x128xf32>
    %68 = arith.divf %66, %67 : vector<8x128xf32>
    %c64_i32_30 = arith.constant 64 : i32
    %69 = tpu.dynamic_rotate %63 by %c64_i32_30 dim 1 : vector<8x128xf32>, i32 -> vector<8x128xf32>
    %70 = arith.mulf %63, %69 : vector<8x128xf32>
    %71 = arith.mulf %68, %42 : vector<8x128xf32>
    %72 = arith.addf %71, %70 : vector<8x128xf32>
    %c64_i32_31 = arith.constant 64 : i32
    %73 = tpu.dynamic_rotate %68 by %c64_i32_31 dim 1 : vector<8x128xf32>, i32 -> vector<8x128xf32>
    %74 = math.tanh %72 : vector<8x128xf32>
    %75 = arith.mulf %73, %74 : vector<8x128xf32>
    %76 = arith.truncf %75 : vector<8x128xf32> to vector<8x128xbf16>
    %cst_32 = arith.constant dense<0.000000e+00> : vector<8x256xf32>
    %77 = tpu.matmul %76, %17, %cst_32 {dimension_numbers = #tpu.dot_dimension_numbers<[1], [0], [0], [1], [0, 0, 1, 1], [], []>} : vector<8x128xbf16>, vector<128x256xbf16>, vector<8x256xf32> -> vector<8x256xf32>
    %78 = vector.broadcast %18 : vector<1x256xf32> to vector<8x256xf32>
    %79 = arith.addf %77, %78 : vector<8x256xf32>
    %c8_33 = arith.constant 8 : index
    %c0_34 = arith.constant 0 : index
    %80 = vector.load %arg6[%c8_33, %c0_34] : memref<64x256xf32, #tpu.memory_space<vmem>>, vector<8x256xf32>
    tpu.vector_store %arg6[%c8_33, %c0_34], %79 {strides = array<i32>} : memref<64x256xf32, #tpu.memory_space<vmem>>, vector<8x256xf32>,
    %c16 = arith.constant 16 : index
    %c0_35 = arith.constant 0 : index
    %81 = vector.load %arg5[%c16, %c0_35] : memref<64x256xf32, #tpu.memory_space<vmem>>, vector<8x256xf32>
    %82 = arith.truncf %75 : vector<8x128xf32> to vector<8x128xbf16>
    %cst_36 = arith.constant dense<0.000000e+00> : vector<8x256xf32>
    %83 = tpu.matmul %82, %15, %cst_36 {dimension_numbers = #tpu.dot_dimension_numbers<[1], [0], [0], [1], [0, 0, 1, 1], [], []>} : vector<8x128xbf16>, vector<128x256xbf16>, vector<8x256xf32> -> vector<8x256xf32>
    %84 = arith.addf %81, %83 : vector<8x256xf32>
    %85 = vector.extract_strided_slice %84 {offsets = [0, 0], sizes = [8, 128], strides = [1, 1]} : vector<8x256xf32> to vector<8x128xf32>
    %86 = vector.extract_strided_slice %84 {offsets = [0, 128], sizes = [8, 128], strides = [1, 1]} : vector<8x256xf32> to vector<8x128xf32>
    %87 = math.tanh %85 : vector<8x128xf32>
    %88 = arith.negf %85 : vector<8x128xf32>
    %89 = math.exp %88 : vector<8x128xf32>
    %cst_37 = arith.constant 1.000000e+00 : f32
    %90 = vector.broadcast %cst_37 : f32 to vector<8x128xf32>
    %91 = arith.addf %90, %89 : vector<8x128xf32>
    %92 = arith.divf %90, %91 : vector<8x128xf32>
    %93 = arith.select %5, %87, %92 : vector<8x128xi1>, vector<8x128xf32>
    %94 = arith.negf %86 : vector<8x128xf32>
    %95 = math.exp %94 : vector<8x128xf32>
    %cst_38 = arith.constant 1.000000e+00 : f32
    %96 = vector.broadcast %cst_38 : f32 to vector<8x128xf32>
    %97 = arith.addf %96, %95 : vector<8x128xf32>
    %98 = arith.divf %96, %97 : vector<8x128xf32>
    %c64_i32_39 = arith.constant 64 : i32
    %99 = tpu.dynamic_rotate %93 by %c64_i32_39 dim 1 : vector<8x128xf32>, i32 -> vector<8x128xf32>
    %100 = arith.mulf %93, %99 : vector<8x128xf32>
    %101 = arith.mulf %98, %72 : vector<8x128xf32>
    %102 = arith.addf %101, %100 : vector<8x128xf32>
    %c64_i32_40 = arith.constant 64 : i32
    %103 = tpu.dynamic_rotate %98 by %c64_i32_40 dim 1 : vector<8x128xf32>, i32 -> vector<8x128xf32>
    %104 = math.tanh %102 : vector<8x128xf32>
    %105 = arith.mulf %103, %104 : vector<8x128xf32>
    %106 = arith.truncf %105 : vector<8x128xf32> to vector<8x128xbf16>
    %cst_41 = arith.constant dense<0.000000e+00> : vector<8x256xf32>
    %107 = tpu.matmul %106, %17, %cst_41 {dimension_numbers = #tpu.dot_dimension_numbers<[1], [0], [0], [1], [0, 0, 1, 1], [], []>} : vector<8x128xbf16>, vector<128x256xbf16>, vector<8x256xf32> -> vector<8x256xf32>
    %108 = vector.broadcast %18 : vector<1x256xf32> to vector<8x256xf32>
    %109 = arith.addf %107, %108 : vector<8x256xf32>
    %c16_42 = arith.constant 16 : index
    %c0_43 = arith.constant 0 : index
    %110 = vector.load %arg6[%c16_42, %c0_43] : memref<64x256xf32, #tpu.memory_space<vmem>>, vector<8x256xf32>
    tpu.vector_store %arg6[%c16_42, %c0_43], %109 {strides = array<i32>} : memref<64x256xf32, #tpu.memory_space<vmem>>, vector<8x256xf32>,
    %c24 = arith.constant 24 : index
    %c0_44 = arith.constant 0 : index
    %111 = vector.load %arg5[%c24, %c0_44] : memref<64x256xf32, #tpu.memory_space<vmem>>, vector<8x256xf32>
    %112 = arith.truncf %105 : vector<8x128xf32> to vector<8x128xbf16>
    %cst_45 = arith.constant dense<0.000000e+00> : vector<8x256xf32>
    %113 = tpu.matmul %112, %15, %cst_45 {dimension_numbers = #tpu.dot_dimension_numbers<[1], [0], [0], [1], [0, 0, 1, 1], [], []>} : vector<8x128xbf16>, vector<128x256xbf16>, vector<8x256xf32> -> vector<8x256xf32>
    %114 = arith.addf %111, %113 : vector<8x256xf32>
    %115 = vector.extract_strided_slice %114 {offsets = [0, 0], sizes = [8, 128], strides = [1, 1]} : vector<8x256xf32> to vector<8x128xf32>
    %116 = vector.extract_strided_slice %114 {offsets = [0, 128], sizes = [8, 128], strides = [1, 1]} : vector<8x256xf32> to vector<8x128xf32>
    %117 = math.tanh %115 : vector<8x128xf32>
    %118 = arith.negf %115 : vector<8x128xf32>
    %119 = math.exp %118 : vector<8x128xf32>
    %cst_46 = arith.constant 1.000000e+00 : f32
    %120 = vector.broadcast %cst_46 : f32 to vector<8x128xf32>
    %121 = arith.addf %120, %119 : vector<8x128xf32>
    %122 = arith.divf %120, %121 : vector<8x128xf32>
    %123 = arith.select %5, %117, %122 : vector<8x128xi1>, vector<8x128xf32>
    %124 = arith.negf %116 : vector<8x128xf32>
    %125 = math.exp %124 : vector<8x128xf32>
    %cst_47 = arith.constant 1.000000e+00 : f32
    %126 = vector.broadcast %cst_47 : f32 to vector<8x128xf32>
    %127 = arith.addf %126, %125 : vector<8x128xf32>
    %128 = arith.divf %126, %127 : vector<8x128xf32>
    %c64_i32_48 = arith.constant 64 : i32
    %129 = tpu.dynamic_rotate %123 by %c64_i32_48 dim 1 : vector<8x128xf32>, i32 -> vector<8x128xf32>
    %130 = arith.mulf %123, %129 : vector<8x128xf32>
    %131 = arith.mulf %128, %102 : vector<8x128xf32>
    %132 = arith.addf %131, %130 : vector<8x128xf32>
    %c64_i32_49 = arith.constant 64 : i32
    %133 = tpu.dynamic_rotate %128 by %c64_i32_49 dim 1 : vector<8x128xf32>, i32 -> vector<8x128xf32>
    %134 = math.tanh %132 : vector<8x128xf32>
    %135 = arith.mulf %133, %134 : vector<8x128xf32>
    %136 = arith.truncf %135 : vector<8x128xf32> to vector<8x128xbf16>
    %cst_50 = arith.constant dense<0.000000e+00> : vector<8x256xf32>
    %137 = tpu.matmul %136, %17, %cst_50 {dimension_numbers = #tpu.dot_dimension_numbers<[1], [0], [0], [1], [0, 0, 1, 1], [], []>} : vector<8x128xbf16>, vector<128x256xbf16>, vector<8x256xf32> -> vector<8x256xf32>
    %138 = vector.broadcast %18 : vector<1x256xf32> to vector<8x256xf32>
    %139 = arith.addf %137, %138 : vector<8x256xf32>
    %c24_51 = arith.constant 24 : index
    %c0_52 = arith.constant 0 : index
    %140 = vector.load %arg6[%c24_51, %c0_52] : memref<64x256xf32, #tpu.memory_space<vmem>>, vector<8x256xf32>
    tpu.vector_store %arg6[%c24_51, %c0_52], %139 {strides = array<i32>} : memref<64x256xf32, #tpu.memory_space<vmem>>, vector<8x256xf32>,
    %c32 = arith.constant 32 : index
    %c0_53 = arith.constant 0 : index
    %141 = vector.load %arg5[%c32, %c0_53] : memref<64x256xf32, #tpu.memory_space<vmem>>, vector<8x256xf32>
    %142 = arith.truncf %135 : vector<8x128xf32> to vector<8x128xbf16>
    %cst_54 = arith.constant dense<0.000000e+00> : vector<8x256xf32>
    %143 = tpu.matmul %142, %15, %cst_54 {dimension_numbers = #tpu.dot_dimension_numbers<[1], [0], [0], [1], [0, 0, 1, 1], [], []>} : vector<8x128xbf16>, vector<128x256xbf16>, vector<8x256xf32> -> vector<8x256xf32>
    %144 = arith.addf %141, %143 : vector<8x256xf32>
    %145 = vector.extract_strided_slice %144 {offsets = [0, 0], sizes = [8, 128], strides = [1, 1]} : vector<8x256xf32> to vector<8x128xf32>
    %146 = vector.extract_strided_slice %144 {offsets = [0, 128], sizes = [8, 128], strides = [1, 1]} : vector<8x256xf32> to vector<8x128xf32>
    %147 = math.tanh %145 : vector<8x128xf32>
    %148 = arith.negf %145 : vector<8x128xf32>
    %149 = math.exp %148 : vector<8x128xf32>
    %cst_55 = arith.constant 1.000000e+00 : f32
    %150 = vector.broadcast %cst_55 : f32 to vector<8x128xf32>
    %151 = arith.addf %150, %149 : vector<8x128xf32>
    %152 = arith.divf %150, %151 : vector<8x128xf32>
    %153 = arith.select %5, %147, %152 : vector<8x128xi1>, vector<8x128xf32>
    %154 = arith.negf %146 : vector<8x128xf32>
    %155 = math.exp %154 : vector<8x128xf32>
    %cst_56 = arith.constant 1.000000e+00 : f32
    %156 = vector.broadcast %cst_56 : f32 to vector<8x128xf32>
    %157 = arith.addf %156, %155 : vector<8x128xf32>
    %158 = arith.divf %156, %157 : vector<8x128xf32>
    %c64_i32_57 = arith.constant 64 : i32
    %159 = tpu.dynamic_rotate %153 by %c64_i32_57 dim 1 : vector<8x128xf32>, i32 -> vector<8x128xf32>
    %160 = arith.mulf %153, %159 : vector<8x128xf32>
    %161 = arith.mulf %158, %132 : vector<8x128xf32>
    %162 = arith.addf %161, %160 : vector<8x128xf32>
    %c64_i32_58 = arith.constant 64 : i32
    %163 = tpu.dynamic_rotate %158 by %c64_i32_58 dim 1 : vector<8x128xf32>, i32 -> vector<8x128xf32>
    %164 = math.tanh %162 : vector<8x128xf32>
    %165 = arith.mulf %163, %164 : vector<8x128xf32>
    %166 = arith.truncf %165 : vector<8x128xf32> to vector<8x128xbf16>
    %cst_59 = arith.constant dense<0.000000e+00> : vector<8x256xf32>
    %167 = tpu.matmul %166, %17, %cst_59 {dimension_numbers = #tpu.dot_dimension_numbers<[1], [0], [0], [1], [0, 0, 1, 1], [], []>} : vector<8x128xbf16>, vector<128x256xbf16>, vector<8x256xf32> -> vector<8x256xf32>
    %168 = vector.broadcast %18 : vector<1x256xf32> to vector<8x256xf32>
    %169 = arith.addf %167, %168 : vector<8x256xf32>
    %c32_60 = arith.constant 32 : index
    %c0_61 = arith.constant 0 : index
    %170 = vector.load %arg6[%c32_60, %c0_61] : memref<64x256xf32, #tpu.memory_space<vmem>>, vector<8x256xf32>
    tpu.vector_store %arg6[%c32_60, %c0_61], %169 {strides = array<i32>} : memref<64x256xf32, #tpu.memory_space<vmem>>, vector<8x256xf32>,
    %c40 = arith.constant 40 : index
    %c0_62 = arith.constant 0 : index
    %171 = vector.load %arg5[%c40, %c0_62] : memref<64x256xf32, #tpu.memory_space<vmem>>, vector<8x256xf32>
    %172 = arith.truncf %165 : vector<8x128xf32> to vector<8x128xbf16>
    %cst_63 = arith.constant dense<0.000000e+00> : vector<8x256xf32>
    %173 = tpu.matmul %172, %15, %cst_63 {dimension_numbers = #tpu.dot_dimension_numbers<[1], [0], [0], [1], [0, 0, 1, 1], [], []>} : vector<8x128xbf16>, vector<128x256xbf16>, vector<8x256xf32> -> vector<8x256xf32>
    %174 = arith.addf %171, %173 : vector<8x256xf32>
    %175 = vector.extract_strided_slice %174 {offsets = [0, 0], sizes = [8, 128], strides = [1, 1]} : vector<8x256xf32> to vector<8x128xf32>
    %176 = vector.extract_strided_slice %174 {offsets = [0, 128], sizes = [8, 128], strides = [1, 1]} : vector<8x256xf32> to vector<8x128xf32>
    %177 = math.tanh %175 : vector<8x128xf32>
    %178 = arith.negf %175 : vector<8x128xf32>
    %179 = math.exp %178 : vector<8x128xf32>
    %cst_64 = arith.constant 1.000000e+00 : f32
    %180 = vector.broadcast %cst_64 : f32 to vector<8x128xf32>
    %181 = arith.addf %180, %179 : vector<8x128xf32>
    %182 = arith.divf %180, %181 : vector<8x128xf32>
    %183 = arith.select %5, %177, %182 : vector<8x128xi1>, vector<8x128xf32>
    %184 = arith.negf %176 : vector<8x128xf32>
    %185 = math.exp %184 : vector<8x128xf32>
    %cst_65 = arith.constant 1.000000e+00 : f32
    %186 = vector.broadcast %cst_65 : f32 to vector<8x128xf32>
    %187 = arith.addf %186, %185 : vector<8x128xf32>
    %188 = arith.divf %186, %187 : vector<8x128xf32>
    %c64_i32_66 = arith.constant 64 : i32
    %189 = tpu.dynamic_rotate %183 by %c64_i32_66 dim 1 : vector<8x128xf32>, i32 -> vector<8x128xf32>
    %190 = arith.mulf %183, %189 : vector<8x128xf32>
    %191 = arith.mulf %188, %162 : vector<8x128xf32>
    %192 = arith.addf %191, %190 : vector<8x128xf32>
    %c64_i32_67 = arith.constant 64 : i32
    %193 = tpu.dynamic_rotate %188 by %c64_i32_67 dim 1 : vector<8x128xf32>, i32 -> vector<8x128xf32>
    %194 = math.tanh %192 : vector<8x128xf32>
    %195 = arith.mulf %193, %194 : vector<8x128xf32>
    %196 = arith.truncf %195 : vector<8x128xf32> to vector<8x128xbf16>
    %cst_68 = arith.constant dense<0.000000e+00> : vector<8x256xf32>
    %197 = tpu.matmul %196, %17, %cst_68 {dimension_numbers = #tpu.dot_dimension_numbers<[1], [0], [0], [1], [0, 0, 1, 1], [], []>} : vector<8x128xbf16>, vector<128x256xbf16>, vector<8x256xf32> -> vector<8x256xf32>
    %198 = vector.broadcast %18 : vector<1x256xf32> to vector<8x256xf32>
    %199 = arith.addf %197, %198 : vector<8x256xf32>
    %c40_69 = arith.constant 40 : index
    %c0_70 = arith.constant 0 : index
    %200 = vector.load %arg6[%c40_69, %c0_70] : memref<64x256xf32, #tpu.memory_space<vmem>>, vector<8x256xf32>
    tpu.vector_store %arg6[%c40_69, %c0_70], %199 {strides = array<i32>} : memref<64x256xf32, #tpu.memory_space<vmem>>, vector<8x256xf32>,
    %c48 = arith.constant 48 : index
    %c0_71 = arith.constant 0 : index
    %201 = vector.load %arg5[%c48, %c0_71] : memref<64x256xf32, #tpu.memory_space<vmem>>, vector<8x256xf32>
    %202 = arith.truncf %195 : vector<8x128xf32> to vector<8x128xbf16>
    %cst_72 = arith.constant dense<0.000000e+00> : vector<8x256xf32>
    %203 = tpu.matmul %202, %15, %cst_72 {dimension_numbers = #tpu.dot_dimension_numbers<[1], [0], [0], [1], [0, 0, 1, 1], [], []>} : vector<8x128xbf16>, vector<128x256xbf16>, vector<8x256xf32> -> vector<8x256xf32>
    %204 = arith.addf %201, %203 : vector<8x256xf32>
    %205 = vector.extract_strided_slice %204 {offsets = [0, 0], sizes = [8, 128], strides = [1, 1]} : vector<8x256xf32> to vector<8x128xf32>
    %206 = vector.extract_strided_slice %204 {offsets = [0, 128], sizes = [8, 128], strides = [1, 1]} : vector<8x256xf32> to vector<8x128xf32>
    %207 = math.tanh %205 : vector<8x128xf32>
    %208 = arith.negf %205 : vector<8x128xf32>
    %209 = math.exp %208 : vector<8x128xf32>
    %cst_73 = arith.constant 1.000000e+00 : f32
    %210 = vector.broadcast %cst_73 : f32 to vector<8x128xf32>
    %211 = arith.addf %210, %209 : vector<8x128xf32>
    %212 = arith.divf %210, %211 : vector<8x128xf32>
    %213 = arith.select %5, %207, %212 : vector<8x128xi1>, vector<8x128xf32>
    %214 = arith.negf %206 : vector<8x128xf32>
    %215 = math.exp %214 : vector<8x128xf32>
    %cst_74 = arith.constant 1.000000e+00 : f32
    %216 = vector.broadcast %cst_74 : f32 to vector<8x128xf32>
    %217 = arith.addf %216, %215 : vector<8x128xf32>
    %218 = arith.divf %216, %217 : vector<8x128xf32>
    %c64_i32_75 = arith.constant 64 : i32
    %219 = tpu.dynamic_rotate %213 by %c64_i32_75 dim 1 : vector<8x128xf32>, i32 -> vector<8x128xf32>
    %220 = arith.mulf %213, %219 : vector<8x128xf32>
    %221 = arith.mulf %218, %192 : vector<8x128xf32>
    %222 = arith.addf %221, %220 : vector<8x128xf32>
    %c64_i32_76 = arith.constant 64 : i32
    %223 = tpu.dynamic_rotate %218 by %c64_i32_76 dim 1 : vector<8x128xf32>, i32 -> vector<8x128xf32>
    %224 = math.tanh %222 : vector<8x128xf32>
    %225 = arith.mulf %223, %224 : vector<8x128xf32>
    %226 = arith.truncf %225 : vector<8x128xf32> to vector<8x128xbf16>
    %cst_77 = arith.constant dense<0.000000e+00> : vector<8x256xf32>
    %227 = tpu.matmul %226, %17, %cst_77 {dimension_numbers = #tpu.dot_dimension_numbers<[1], [0], [0], [1], [0, 0, 1, 1], [], []>} : vector<8x128xbf16>, vector<128x256xbf16>, vector<8x256xf32> -> vector<8x256xf32>
    %228 = vector.broadcast %18 : vector<1x256xf32> to vector<8x256xf32>
    %229 = arith.addf %227, %228 : vector<8x256xf32>
    %c48_78 = arith.constant 48 : index
    %c0_79 = arith.constant 0 : index
    %230 = vector.load %arg6[%c48_78, %c0_79] : memref<64x256xf32, #tpu.memory_space<vmem>>, vector<8x256xf32>
    tpu.vector_store %arg6[%c48_78, %c0_79], %229 {strides = array<i32>} : memref<64x256xf32, #tpu.memory_space<vmem>>, vector<8x256xf32>,
    %c56 = arith.constant 56 : index
    %c0_80 = arith.constant 0 : index
    %231 = vector.load %arg5[%c56, %c0_80] : memref<64x256xf32, #tpu.memory_space<vmem>>, vector<8x256xf32>
    %232 = arith.truncf %225 : vector<8x128xf32> to vector<8x128xbf16>
    %cst_81 = arith.constant dense<0.000000e+00> : vector<8x256xf32>
    %233 = tpu.matmul %232, %15, %cst_81 {dimension_numbers = #tpu.dot_dimension_numbers<[1], [0], [0], [1], [0, 0, 1, 1], [], []>} : vector<8x128xbf16>, vector<128x256xbf16>, vector<8x256xf32> -> vector<8x256xf32>
    %234 = arith.addf %231, %233 : vector<8x256xf32>
    %235 = vector.extract_strided_slice %234 {offsets = [0, 0], sizes = [8, 128], strides = [1, 1]} : vector<8x256xf32> to vector<8x128xf32>
    %236 = vector.extract_strided_slice %234 {offsets = [0, 128], sizes = [8, 128], strides = [1, 1]} : vector<8x256xf32> to vector<8x128xf32>
    %237 = math.tanh %235 : vector<8x128xf32>
    %238 = arith.negf %235 : vector<8x128xf32>
    %239 = math.exp %238 : vector<8x128xf32>
    %cst_82 = arith.constant 1.000000e+00 : f32
    %240 = vector.broadcast %cst_82 : f32 to vector<8x128xf32>
    %241 = arith.addf %240, %239 : vector<8x128xf32>
    %242 = arith.divf %240, %241 : vector<8x128xf32>
    %243 = arith.select %5, %237, %242 : vector<8x128xi1>, vector<8x128xf32>
    %244 = arith.negf %236 : vector<8x128xf32>
    %245 = math.exp %244 : vector<8x128xf32>
    %cst_83 = arith.constant 1.000000e+00 : f32
    %246 = vector.broadcast %cst_83 : f32 to vector<8x128xf32>
    %247 = arith.addf %246, %245 : vector<8x128xf32>
    %248 = arith.divf %246, %247 : vector<8x128xf32>
    %c64_i32_84 = arith.constant 64 : i32
    %249 = tpu.dynamic_rotate %243 by %c64_i32_84 dim 1 : vector<8x128xf32>, i32 -> vector<8x128xf32>
    %250 = arith.mulf %243, %249 : vector<8x128xf32>
    %251 = arith.mulf %248, %222 : vector<8x128xf32>
    %252 = arith.addf %251, %250 : vector<8x128xf32>
    %c64_i32_85 = arith.constant 64 : i32
    %253 = tpu.dynamic_rotate %248 by %c64_i32_85 dim 1 : vector<8x128xf32>, i32 -> vector<8x128xf32>
    %254 = math.tanh %252 : vector<8x128xf32>
    %255 = arith.mulf %253, %254 : vector<8x128xf32>
    %256 = arith.truncf %255 : vector<8x128xf32> to vector<8x128xbf16>
    %cst_86 = arith.constant dense<0.000000e+00> : vector<8x256xf32>
    %257 = tpu.matmul %256, %17, %cst_86 {dimension_numbers = #tpu.dot_dimension_numbers<[1], [0], [0], [1], [0, 0, 1, 1], [], []>} : vector<8x128xbf16>, vector<128x256xbf16>, vector<8x256xf32> -> vector<8x256xf32>
    %258 = vector.broadcast %18 : vector<1x256xf32> to vector<8x256xf32>
    %259 = arith.addf %257, %258 : vector<8x256xf32>
    %c56_87 = arith.constant 56 : index
    %c0_88 = arith.constant 0 : index
    %260 = vector.load %arg6[%c56_87, %c0_88] : memref<64x256xf32, #tpu.memory_space<vmem>>, vector<8x256xf32>
    tpu.vector_store %arg6[%c56_87, %c0_88], %259 {strides = array<i32>} : memref<64x256xf32, #tpu.memory_space<vmem>>, vector<8x256xf32>,
    %c3 = arith.constant 3 : index
    %c0_89 = arith.constant 0 : index
    %c0_90 = arith.constant 0 : index
    %261 = vector.load %arg1[%c3, %c0_89, %c0_90] : memref<4x128x256xbf16, #tpu.memory_space<vmem>>, vector<1x128x256xbf16>
    %262 = vector.shape_cast %261 : vector<1x128x256xbf16> to vector<128x256xbf16>
    %cst_91 = arith.constant 0.000000e+00 : f32
    %263 = vector.broadcast %cst_91 : f32 to vector<8x128xf32>
    %cst_92 = arith.constant 0.000000e+00 : f32
    %264 = vector.broadcast %cst_92 : f32 to vector<8x128xf32>
    %c0_93 = arith.constant 0 : index
    %c0_94 = arith.constant 0 : index
    %265 = vector.load %arg6[%c0_93, %c0_94] : memref<64x256xf32, #tpu.memory_space<vmem>>, vector<8x256xf32>
    %266 = arith.truncf %263 : vector<8x128xf32> to vector<8x128xbf16>
    %cst_95 = arith.constant dense<0.000000e+00> : vector<8x256xf32>
    %267 = tpu.matmul %266, %262, %cst_95 {dimension_numbers = #tpu.dot_dimension_numbers<[1], [0], [0], [1], [0, 0, 1, 1], [], []>} : vector<8x128xbf16>, vector<128x256xbf16>, vector<8x256xf32> -> vector<8x256xf32>
    %268 = arith.addf %265, %267 : vector<8x256xf32>
    %269 = vector.extract_strided_slice %268 {offsets = [0, 0], sizes = [8, 128], strides = [1, 1]} : vector<8x256xf32> to vector<8x128xf32>
    %270 = vector.extract_strided_slice %268 {offsets = [0, 128], sizes = [8, 128], strides = [1, 1]} : vector<8x256xf32> to vector<8x128xf32>
    %271 = math.tanh %269 : vector<8x128xf32>
    %272 = arith.negf %269 : vector<8x128xf32>
    %273 = math.exp %272 : vector<8x128xf32>
    %cst_96 = arith.constant 1.000000e+00 : f32
    %274 = vector.broadcast %cst_96 : f32 to vector<8x128xf32>
    %275 = arith.addf %274, %273 : vector<8x128xf32>
    %276 = arith.divf %274, %275 : vector<8x128xf32>
    %277 = arith.select %5, %271, %276 : vector<8x128xi1>, vector<8x128xf32>
    %278 = arith.negf %270 : vector<8x128xf32>
    %279 = math.exp %278 : vector<8x128xf32>
    %cst_97 = arith.constant 1.000000e+00 : f32
    %280 = vector.broadcast %cst_97 : f32 to vector<8x128xf32>
    %281 = arith.addf %280, %279 : vector<8x128xf32>
    %282 = arith.divf %280, %281 : vector<8x128xf32>
    %c64_i32_98 = arith.constant 64 : i32
    %283 = tpu.dynamic_rotate %277 by %c64_i32_98 dim 1 : vector<8x128xf32>, i32 -> vector<8x128xf32>
    %284 = arith.mulf %277, %283 : vector<8x128xf32>
    %285 = arith.mulf %282, %264 : vector<8x128xf32>
    %286 = arith.addf %285, %284 : vector<8x128xf32>
    %c64_i32_99 = arith.constant 64 : i32
    %287 = tpu.dynamic_rotate %282 by %c64_i32_99 dim 1 : vector<8x128xf32>, i32 -> vector<8x128xf32>
    %288 = math.tanh %286 : vector<8x128xf32>
    %289 = arith.mulf %287, %288 : vector<8x128xf32>
    %c8_100 = arith.constant 8 : index
    %c0_101 = arith.constant 0 : index
    %290 = vector.load %arg6[%c8_100, %c0_101] : memref<64x256xf32, #tpu.memory_space<vmem>>, vector<8x256xf32>
    %291 = arith.truncf %289 : vector<8x128xf32> to vector<8x128xbf16>
    %cst_102 = arith.constant dense<0.000000e+00> : vector<8x256xf32>
    %292 = tpu.matmul %291, %262, %cst_102 {dimension_numbers = #tpu.dot_dimension_numbers<[1], [0], [0], [1], [0, 0, 1, 1], [], []>} : vector<8x128xbf16>, vector<128x256xbf16>, vector<8x256xf32> -> vector<8x256xf32>
    %293 = arith.addf %290, %292 : vector<8x256xf32>
    %294 = vector.extract_strided_slice %293 {offsets = [0, 0], sizes = [8, 128], strides = [1, 1]} : vector<8x256xf32> to vector<8x128xf32>
    %295 = vector.extract_strided_slice %293 {offsets = [0, 128], sizes = [8, 128], strides = [1, 1]} : vector<8x256xf32> to vector<8x128xf32>
    %296 = math.tanh %294 : vector<8x128xf32>
    %297 = arith.negf %294 : vector<8x128xf32>
    %298 = math.exp %297 : vector<8x128xf32>
    %cst_103 = arith.constant 1.000000e+00 : f32
    %299 = vector.broadcast %cst_103 : f32 to vector<8x128xf32>
    %300 = arith.addf %299, %298 : vector<8x128xf32>
    %301 = arith.divf %299, %300 : vector<8x128xf32>
    %302 = arith.select %5, %296, %301 : vector<8x128xi1>, vector<8x128xf32>
    %303 = arith.negf %295 : vector<8x128xf32>
    %304 = math.exp %303 : vector<8x128xf32>
    %cst_104 = arith.constant 1.000000e+00 : f32
    %305 = vector.broadcast %cst_104 : f32 to vector<8x128xf32>
    %306 = arith.addf %305, %304 : vector<8x128xf32>
    %307 = arith.divf %305, %306 : vector<8x128xf32>
    %c64_i32_105 = arith.constant 64 : i32
    %308 = tpu.dynamic_rotate %302 by %c64_i32_105 dim 1 : vector<8x128xf32>, i32 -> vector<8x128xf32>
    %309 = arith.mulf %302, %308 : vector<8x128xf32>
    %310 = arith.mulf %307, %286 : vector<8x128xf32>
    %311 = arith.addf %310, %309 : vector<8x128xf32>
    %c64_i32_106 = arith.constant 64 : i32
    %312 = tpu.dynamic_rotate %307 by %c64_i32_106 dim 1 : vector<8x128xf32>, i32 -> vector<8x128xf32>
    %313 = math.tanh %311 : vector<8x128xf32>
    %314 = arith.mulf %312, %313 : vector<8x128xf32>
    %c16_107 = arith.constant 16 : index
    %c0_108 = arith.constant 0 : index
    %315 = vector.load %arg6[%c16_107, %c0_108] : memref<64x256xf32, #tpu.memory_space<vmem>>, vector<8x256xf32>
    %316 = arith.truncf %314 : vector<8x128xf32> to vector<8x128xbf16>
    %cst_109 = arith.constant dense<0.000000e+00> : vector<8x256xf32>
    %317 = tpu.matmul %316, %262, %cst_109 {dimension_numbers = #tpu.dot_dimension_numbers<[1], [0], [0], [1], [0, 0, 1, 1], [], []>} : vector<8x128xbf16>, vector<128x256xbf16>, vector<8x256xf32> -> vector<8x256xf32>
    %318 = arith.addf %315, %317 : vector<8x256xf32>
    %319 = vector.extract_strided_slice %318 {offsets = [0, 0], sizes = [8, 128], strides = [1, 1]} : vector<8x256xf32> to vector<8x128xf32>
    %320 = vector.extract_strided_slice %318 {offsets = [0, 128], sizes = [8, 128], strides = [1, 1]} : vector<8x256xf32> to vector<8x128xf32>
    %321 = math.tanh %319 : vector<8x128xf32>
    %322 = arith.negf %319 : vector<8x128xf32>
    %323 = math.exp %322 : vector<8x128xf32>
    %cst_110 = arith.constant 1.000000e+00 : f32
    %324 = vector.broadcast %cst_110 : f32 to vector<8x128xf32>
    %325 = arith.addf %324, %323 : vector<8x128xf32>
    %326 = arith.divf %324, %325 : vector<8x128xf32>
    %327 = arith.select %5, %321, %326 : vector<8x128xi1>, vector<8x128xf32>
    %328 = arith.negf %320 : vector<8x128xf32>
    %329 = math.exp %328 : vector<8x128xf32>
    %cst_111 = arith.constant 1.000000e+00 : f32
    %330 = vector.broadcast %cst_111 : f32 to vector<8x128xf32>
    %331 = arith.addf %330, %329 : vector<8x128xf32>
    %332 = arith.divf %330, %331 : vector<8x128xf32>
    %c64_i32_112 = arith.constant 64 : i32
    %333 = tpu.dynamic_rotate %327 by %c64_i32_112 dim 1 : vector<8x128xf32>, i32 -> vector<8x128xf32>
    %334 = arith.mulf %327, %333 : vector<8x128xf32>
    %335 = arith.mulf %332, %311 : vector<8x128xf32>
    %336 = arith.addf %335, %334 : vector<8x128xf32>
    %c64_i32_113 = arith.constant 64 : i32
    %337 = tpu.dynamic_rotate %332 by %c64_i32_113 dim 1 : vector<8x128xf32>, i32 -> vector<8x128xf32>
    %338 = math.tanh %336 : vector<8x128xf32>
    %339 = arith.mulf %337, %338 : vector<8x128xf32>
    %c24_114 = arith.constant 24 : index
    %c0_115 = arith.constant 0 : index
    %340 = vector.load %arg6[%c24_114, %c0_115] : memref<64x256xf32, #tpu.memory_space<vmem>>, vector<8x256xf32>
    %341 = arith.truncf %339 : vector<8x128xf32> to vector<8x128xbf16>
    %cst_116 = arith.constant dense<0.000000e+00> : vector<8x256xf32>
    %342 = tpu.matmul %341, %262, %cst_116 {dimension_numbers = #tpu.dot_dimension_numbers<[1], [0], [0], [1], [0, 0, 1, 1], [], []>} : vector<8x128xbf16>, vector<128x256xbf16>, vector<8x256xf32> -> vector<8x256xf32>
    %343 = arith.addf %340, %342 : vector<8x256xf32>
    %344 = vector.extract_strided_slice %343 {offsets = [0, 0], sizes = [8, 128], strides = [1, 1]} : vector<8x256xf32> to vector<8x128xf32>
    %345 = vector.extract_strided_slice %343 {offsets = [0, 128], sizes = [8, 128], strides = [1, 1]} : vector<8x256xf32> to vector<8x128xf32>
    %346 = math.tanh %344 : vector<8x128xf32>
    %347 = arith.negf %344 : vector<8x128xf32>
    %348 = math.exp %347 : vector<8x128xf32>
    %cst_117 = arith.constant 1.000000e+00 : f32
    %349 = vector.broadcast %cst_117 : f32 to vector<8x128xf32>
    %350 = arith.addf %349, %348 : vector<8x128xf32>
    %351 = arith.divf %349, %350 : vector<8x128xf32>
    %352 = arith.select %5, %346, %351 : vector<8x128xi1>, vector<8x128xf32>
    %353 = arith.negf %345 : vector<8x128xf32>
    %354 = math.exp %353 : vector<8x128xf32>
    %cst_118 = arith.constant 1.000000e+00 : f32
    %355 = vector.broadcast %cst_118 : f32 to vector<8x128xf32>
    %356 = arith.addf %355, %354 : vector<8x128xf32>
    %357 = arith.divf %355, %356 : vector<8x128xf32>
    %c64_i32_119 = arith.constant 64 : i32
    %358 = tpu.dynamic_rotate %352 by %c64_i32_119 dim 1 : vector<8x128xf32>, i32 -> vector<8x128xf32>
    %359 = arith.mulf %352, %358 : vector<8x128xf32>
    %360 = arith.mulf %357, %336 : vector<8x128xf32>
    %361 = arith.addf %360, %359 : vector<8x128xf32>
    %c64_i32_120 = arith.constant 64 : i32
    %362 = tpu.dynamic_rotate %357 by %c64_i32_120 dim 1 : vector<8x128xf32>, i32 -> vector<8x128xf32>
    %363 = math.tanh %361 : vector<8x128xf32>
    %364 = arith.mulf %362, %363 : vector<8x128xf32>
    %c32_121 = arith.constant 32 : index
    %c0_122 = arith.constant 0 : index
    %365 = vector.load %arg6[%c32_121, %c0_122] : memref<64x256xf32, #tpu.memory_space<vmem>>, vector<8x256xf32>
    %366 = arith.truncf %364 : vector<8x128xf32> to vector<8x128xbf16>
    %cst_123 = arith.constant dense<0.000000e+00> : vector<8x256xf32>
    %367 = tpu.matmul %366, %262, %cst_123 {dimension_numbers = #tpu.dot_dimension_numbers<[1], [0], [0], [1], [0, 0, 1, 1], [], []>} : vector<8x128xbf16>, vector<128x256xbf16>, vector<8x256xf32> -> vector<8x256xf32>
    %368 = arith.addf %365, %367 : vector<8x256xf32>
    %369 = vector.extract_strided_slice %368 {offsets = [0, 0], sizes = [8, 128], strides = [1, 1]} : vector<8x256xf32> to vector<8x128xf32>
    %370 = vector.extract_strided_slice %368 {offsets = [0, 128], sizes = [8, 128], strides = [1, 1]} : vector<8x256xf32> to vector<8x128xf32>
    %371 = math.tanh %369 : vector<8x128xf32>
    %372 = arith.negf %369 : vector<8x128xf32>
    %373 = math.exp %372 : vector<8x128xf32>
    %cst_124 = arith.constant 1.000000e+00 : f32
    %374 = vector.broadcast %cst_124 : f32 to vector<8x128xf32>
    %375 = arith.addf %374, %373 : vector<8x128xf32>
    %376 = arith.divf %374, %375 : vector<8x128xf32>
    %377 = arith.select %5, %371, %376 : vector<8x128xi1>, vector<8x128xf32>
    %378 = arith.negf %370 : vector<8x128xf32>
    %379 = math.exp %378 : vector<8x128xf32>
    %cst_125 = arith.constant 1.000000e+00 : f32
    %380 = vector.broadcast %cst_125 : f32 to vector<8x128xf32>
    %381 = arith.addf %380, %379 : vector<8x128xf32>
    %382 = arith.divf %380, %381 : vector<8x128xf32>
    %c64_i32_126 = arith.constant 64 : i32
    %383 = tpu.dynamic_rotate %377 by %c64_i32_126 dim 1 : vector<8x128xf32>, i32 -> vector<8x128xf32>
    %384 = arith.mulf %377, %383 : vector<8x128xf32>
    %385 = arith.mulf %382, %361 : vector<8x128xf32>
    %386 = arith.addf %385, %384 : vector<8x128xf32>
    %c64_i32_127 = arith.constant 64 : i32
    %387 = tpu.dynamic_rotate %382 by %c64_i32_127 dim 1 : vector<8x128xf32>, i32 -> vector<8x128xf32>
    %388 = math.tanh %386 : vector<8x128xf32>
    %389 = arith.mulf %387, %388 : vector<8x128xf32>
    %c40_128 = arith.constant 40 : index
    %c0_129 = arith.constant 0 : index
    %390 = vector.load %arg6[%c40_128, %c0_129] : memref<64x256xf32, #tpu.memory_space<vmem>>, vector<8x256xf32>
    %391 = arith.truncf %389 : vector<8x128xf32> to vector<8x128xbf16>
    %cst_130 = arith.constant dense<0.000000e+00> : vector<8x256xf32>
    %392 = tpu.matmul %391, %262, %cst_130 {dimension_numbers = #tpu.dot_dimension_numbers<[1], [0], [0], [1], [0, 0, 1, 1], [], []>} : vector<8x128xbf16>, vector<128x256xbf16>, vector<8x256xf32> -> vector<8x256xf32>
    %393 = arith.addf %390, %392 : vector<8x256xf32>
    %394 = vector.extract_strided_slice %393 {offsets = [0, 0], sizes = [8, 128], strides = [1, 1]} : vector<8x256xf32> to vector<8x128xf32>
    %395 = vector.extract_strided_slice %393 {offsets = [0, 128], sizes = [8, 128], strides = [1, 1]} : vector<8x256xf32> to vector<8x128xf32>
    %396 = math.tanh %394 : vector<8x128xf32>
    %397 = arith.negf %394 : vector<8x128xf32>
    %398 = math.exp %397 : vector<8x128xf32>
    %cst_131 = arith.constant 1.000000e+00 : f32
    %399 = vector.broadcast %cst_131 : f32 to vector<8x128xf32>
    %400 = arith.addf %399, %398 : vector<8x128xf32>
    %401 = arith.divf %399, %400 : vector<8x128xf32>
    %402 = arith.select %5, %396, %401 : vector<8x128xi1>, vector<8x128xf32>
    %403 = arith.negf %395 : vector<8x128xf32>
    %404 = math.exp %403 : vector<8x128xf32>
    %cst_132 = arith.constant 1.000000e+00 : f32
    %405 = vector.broadcast %cst_132 : f32 to vector<8x128xf32>
    %406 = arith.addf %405, %404 : vector<8x128xf32>
    %407 = arith.divf %405, %406 : vector<8x128xf32>
    %c64_i32_133 = arith.constant 64 : i32
    %408 = tpu.dynamic_rotate %402 by %c64_i32_133 dim 1 : vector<8x128xf32>, i32 -> vector<8x128xf32>
    %409 = arith.mulf %402, %408 : vector<8x128xf32>
    %410 = arith.mulf %407, %386 : vector<8x128xf32>
    %411 = arith.addf %410, %409 : vector<8x128xf32>
    %c64_i32_134 = arith.constant 64 : i32
    %412 = tpu.dynamic_rotate %407 by %c64_i32_134 dim 1 : vector<8x128xf32>, i32 -> vector<8x128xf32>
    %413 = math.tanh %411 : vector<8x128xf32>
    %414 = arith.mulf %412, %413 : vector<8x128xf32>
    %c48_135 = arith.constant 48 : index
    %c0_136 = arith.constant 0 : index
    %415 = vector.load %arg6[%c48_135, %c0_136] : memref<64x256xf32, #tpu.memory_space<vmem>>, vector<8x256xf32>
    %416 = arith.truncf %414 : vector<8x128xf32> to vector<8x128xbf16>
    %cst_137 = arith.constant dense<0.000000e+00> : vector<8x256xf32>
    %417 = tpu.matmul %416, %262, %cst_137 {dimension_numbers = #tpu.dot_dimension_numbers<[1], [0], [0], [1], [0, 0, 1, 1], [], []>} : vector<8x128xbf16>, vector<128x256xbf16>, vector<8x256xf32> -> vector<8x256xf32>
    %418 = arith.addf %415, %417 : vector<8x256xf32>
    %419 = vector.extract_strided_slice %418 {offsets = [0, 0], sizes = [8, 128], strides = [1, 1]} : vector<8x256xf32> to vector<8x128xf32>
    %420 = vector.extract_strided_slice %418 {offsets = [0, 128], sizes = [8, 128], strides = [1, 1]} : vector<8x256xf32> to vector<8x128xf32>
    %421 = math.tanh %419 : vector<8x128xf32>
    %422 = arith.negf %419 : vector<8x128xf32>
    %423 = math.exp %422 : vector<8x128xf32>
    %cst_138 = arith.constant 1.000000e+00 : f32
    %424 = vector.broadcast %cst_138 : f32 to vector<8x128xf32>
    %425 = arith.addf %424, %423 : vector<8x128xf32>
    %426 = arith.divf %424, %425 : vector<8x128xf32>
    %427 = arith.select %5, %421, %426 : vector<8x128xi1>, vector<8x128xf32>
    %428 = arith.negf %420 : vector<8x128xf32>
    %429 = math.exp %428 : vector<8x128xf32>
    %cst_139 = arith.constant 1.000000e+00 : f32
    %430 = vector.broadcast %cst_139 : f32 to vector<8x128xf32>
    %431 = arith.addf %430, %429 : vector<8x128xf32>
    %432 = arith.divf %430, %431 : vector<8x128xf32>
    %c64_i32_140 = arith.constant 64 : i32
    %433 = tpu.dynamic_rotate %427 by %c64_i32_140 dim 1 : vector<8x128xf32>, i32 -> vector<8x128xf32>
    %434 = arith.mulf %427, %433 : vector<8x128xf32>
    %435 = arith.mulf %432, %411 : vector<8x128xf32>
    %436 = arith.addf %435, %434 : vector<8x128xf32>
    %c64_i32_141 = arith.constant 64 : i32
    %437 = tpu.dynamic_rotate %432 by %c64_i32_141 dim 1 : vector<8x128xf32>, i32 -> vector<8x128xf32>
    %438 = math.tanh %436 : vector<8x128xf32>
    %439 = arith.mulf %437, %438 : vector<8x128xf32>
    %c56_142 = arith.constant 56 : index
    %c0_143 = arith.constant 0 : index
    %440 = vector.load %arg6[%c56_142, %c0_143] : memref<64x256xf32, #tpu.memory_space<vmem>>, vector<8x256xf32>
    %441 = arith.truncf %439 : vector<8x128xf32> to vector<8x128xbf16>
    %cst_144 = arith.constant dense<0.000000e+00> : vector<8x256xf32>
    %442 = tpu.matmul %441, %262, %cst_144 {dimension_numbers = #tpu.dot_dimension_numbers<[1], [0], [0], [1], [0, 0, 1, 1], [], []>} : vector<8x128xbf16>, vector<128x256xbf16>, vector<8x256xf32> -> vector<8x256xf32>
    %443 = arith.addf %440, %442 : vector<8x256xf32>
    %444 = vector.extract_strided_slice %443 {offsets = [0, 0], sizes = [8, 128], strides = [1, 1]} : vector<8x256xf32> to vector<8x128xf32>
    %445 = vector.extract_strided_slice %443 {offsets = [0, 128], sizes = [8, 128], strides = [1, 1]} : vector<8x256xf32> to vector<8x128xf32>
    %446 = math.tanh %444 : vector<8x128xf32>
    %447 = arith.negf %444 : vector<8x128xf32>
    %448 = math.exp %447 : vector<8x128xf32>
    %cst_145 = arith.constant 1.000000e+00 : f32
    %449 = vector.broadcast %cst_145 : f32 to vector<8x128xf32>
    %450 = arith.addf %449, %448 : vector<8x128xf32>
    %451 = arith.divf %449, %450 : vector<8x128xf32>
    %452 = arith.select %5, %446, %451 : vector<8x128xi1>, vector<8x128xf32>
    %453 = arith.negf %445 : vector<8x128xf32>
    %454 = math.exp %453 : vector<8x128xf32>
    %cst_146 = arith.constant 1.000000e+00 : f32
    %455 = vector.broadcast %cst_146 : f32 to vector<8x128xf32>
    %456 = arith.addf %455, %454 : vector<8x128xf32>
    %457 = arith.divf %455, %456 : vector<8x128xf32>
    %c64_i32_147 = arith.constant 64 : i32
    %458 = tpu.dynamic_rotate %452 by %c64_i32_147 dim 1 : vector<8x128xf32>, i32 -> vector<8x128xf32>
    %459 = arith.mulf %452, %458 : vector<8x128xf32>
    %460 = arith.mulf %457, %436 : vector<8x128xf32>
    %461 = arith.addf %460, %459 : vector<8x128xf32>
    %c64_i32_148 = arith.constant 64 : i32
    %462 = tpu.dynamic_rotate %457 by %c64_i32_148 dim 1 : vector<8x128xf32>, i32 -> vector<8x128xf32>
    %463 = math.tanh %461 : vector<8x128xf32>
    %464 = arith.mulf %462, %463 : vector<8x128xf32>
    %465 = arith.truncf %464 : vector<8x128xf32> to vector<8x128xbf16>
    %c0_149 = arith.constant 0 : index
    %c0_150 = arith.constant 0 : index
    %c0_151 = arith.constant 0 : index
    %466 = vector.load %arg2[%c0_149, %c0_150, %c0_151] : memref<2x128x128xbf16, #tpu.memory_space<vmem>>, vector<1x128x128xbf16>
    %467 = vector.shape_cast %466 : vector<1x128x128xbf16> to vector<128x128xbf16>
    %cst_152 = arith.constant dense<0.000000e+00> : vector<8x128xf32>
    %468 = tpu.matmul %465, %467, %cst_152 {dimension_numbers = #tpu.dot_dimension_numbers<[1], [0], [0], [1], [0, 0, 1, 1], [], []>} : vector<8x128xbf16>, vector<128x128xbf16>, vector<8x128xf32> -> vector<8x128xf32>
    %c2_153 = arith.constant 2 : index
    %c0_154 = arith.constant 0 : index
    %469 = vector.load %arg3[%c2_153, %c0_154] : memref<8x256xf32, #tpu.memory_space<vmem>>, vector<1x128xf32>
    %470 = vector.broadcast %469 : vector<1x128xf32> to vector<8x128xf32>
    %471 = arith.addf %468, %470 : vector<8x128xf32>
    %cst_155 = arith.constant 0.000000e+00 : f32
    %472 = vector.broadcast %cst_155 : f32 to vector<8x128xf32>
    %473 = arith.maximumf %471, %472 : vector<8x128xf32>
    %474 = arith.truncf %473 : vector<8x128xf32> to vector<8x128xbf16>
    %c1_156 = arith.constant 1 : index
    %c0_157 = arith.constant 0 : index
    %c0_158 = arith.constant 0 : index
    %475 = vector.load %arg2[%c1_156, %c0_157, %c0_158] : memref<2x128x128xbf16, #tpu.memory_space<vmem>>, vector<1x128x128xbf16>
    %476 = vector.shape_cast %475 : vector<1x128x128xbf16> to vector<128x128xbf16>
    %cst_159 = arith.constant dense<0.000000e+00> : vector<8x128xf32>
    %477 = tpu.matmul %474, %476, %cst_159 {dimension_numbers = #tpu.dot_dimension_numbers<[1], [0], [0], [1], [0, 0, 1, 1], [], []>} : vector<8x128xbf16>, vector<128x128xbf16>, vector<8x128xf32> -> vector<8x128xf32>
    %c3_160 = arith.constant 3 : index
    %c0_161 = arith.constant 0 : index
    %478 = vector.load %arg3[%c3_160, %c0_161] : memref<8x256xf32, #tpu.memory_space<vmem>>, vector<1x128xf32>
    %479 = vector.broadcast %478 : vector<1x128xf32> to vector<8x128xf32>
    %480 = arith.addf %477, %479 : vector<8x128xf32>
    %c0_162 = arith.constant 0 : index
    %c0_163 = arith.constant 0 : index
    %481 = vector.load %arg4[%c0_162, %c0_163] : memref<8x128xf32, #tpu.memory_space<vmem>>, vector<8x128xf32>
    tpu.vector_store %arg4[%c0_162, %c0_163], %480 {strides = array<i32>} : memref<8x128xf32, #tpu.memory_space<vmem>>, vector<8x128xf32>,
    return
  }
}

</mosaic_0001>

<bundles_post_ra>
// kernel: tpu_custom_call.1
= control target key start
LH: loop header
LB: loop body
LE: loop exit
PB: predicated region body
PF: predicated region fallthrough
CT: control target
= control target key end

     0   :  { %9 = vsyncpa [#allocation5], 0  ;;  %s3838_s0 = inlined_call_operand.hbm [shape: bf16[64,128], index: 0, kind: input, shape index: {}]   ;;  %s3839_s1 = inlined_call_operand.hbm [shape: bf16[4,128,256], index: 1, kind: input, shape index: {}]   ;;  %s3840_s2 = inlined_call_operand.hbm [shape: bf16[2,128,128], index: 2, kind: input, shape index: {}]   ;;  %s3841_s3 = inlined_call_operand.hbm [shape: f32[8,256], index: 3, kind: input, shape index: {}]   ;;  %s3842_s4 = inlined_call_operand.hbm [shape: f32[8,128], index: 4, kind: output, shape index: {}]  }
   0x1   :  { %10 = vsyncpa [#allocation8], 0 }
   0x2   :  { %11 = vsyncpa [#allocation11], 0  ;;  %s30_s17 = sshll.u32 %s3839_s1, 4  ;;  %s31_s17 = int_to_ptr.hbm [resolvable:$true] %s30_s17 }
   0x3   :  { %12 = vsyncpa [#allocation6], 0  ;;  %s3056_s18 = smov [#allocation7]   ;;  %s17_s22 = sshll.u32 %s3838_s0, 4  ;;  %s18_s22 = int_to_ptr.hbm [resolvable:$true] %s17_s22 }
   0x4   :  { %s32_s19 = sshll.u32 %s3056_s18, 4  ;;  %s3057_s23 = smov 128   ;;  %s33_s19 = int_to_ptr.vmem [resolvable:$true] %s32_s19 }
   0x5   :  { %s3058_s24 = smov 8   ;;  %s3059_s25 = smov [#allocation4]  }
   0x6   :  { %38 = dma.hbm_to_vmem [thread:$0]  %s31_s17, 8192, %s33_s19, [#allocation8], %s3057_s23, %s3057_s23, %s3058_s24  }
   0x7   :  { %s19_s26 = sshll.u32 %s3059_s25, 4  ;;  %s3060_s27 = smov 64   ;;  %s20_s26 = int_to_ptr.vmem [resolvable:$true] %s19_s26 }
   0x8   :  { %s3061_s28 = smov 4   ;;  %s43_s30 = sshll.u32 %s3840_s2, 4  ;;  %s44_s30 = int_to_ptr.hbm [resolvable:$true] %s43_s30 }
   0x9   :  { %25 = dma.hbm_to_vmem [thread:$0]  %s18_s22, 512, %s20_s26, [#allocation5], %s3060_s27, %s3060_s27, %s3061_s28  }
   0xa   :  { %s3062_s5 = smov [#allocation9]   ;;  %s57_s8 = sshll.u32 %s3841_s3, 4  ;;  %s58_s8 = int_to_ptr.hbm [resolvable:$true] %s57_s8 }
   0xb   :  { %s45_s6 = sshll.u32 %s3062_s5, 4  ;;  %s3063_s9 = smov [#allocation10]   ;;  %s46_s6 = int_to_ptr.vmem [resolvable:$true] %s45_s6 }
   0xc   :  { %51 = dma.hbm_to_vmem [thread:$0]  %s44_s30, 2048, %s46_s6, [#allocation8], %s3060_s27, %s3060_s27, %s3061_s28  }
   0xd   :  { %s59_s10 = sshll.u32 %s3063_s9, 4  ;;  %s60_s10 = int_to_ptr.vmem [resolvable:$true] %s59_s10 }
   0xe   :  { %62 = dma.hbm_to_vmem [thread:$0]  %s58_s8, 256, %s60_s10, [#allocation11]  }
   0xf   :  { %3048 = dma.done.wait [#allocation5], 512  }
  0x10   :  { %3049 = vsyncadd [#allocation5], 4294966784 }
  0x11   :  { %3050 = dma.done.wait [#allocation8], 10240  }
  0x12   :  { %3051 = vsyncadd [#allocation8], 4294957056 }
  0x13   :  { %3052 = dma.done.wait [#allocation11], 256  }
  0x14   :  { %3053 = vsyncadd [#allocation11], 4294967040  ;;  %v2348_v0 = vld [vmem:[#allocation7 + $0x70] sm:$0xf]  ;;  %v2661_v1 = vld [vmem:[#allocation7 + $0x74] sm:$0xf0] }
  0x15   :  { %v2412_v2 = vld [vmem:[#allocation7 + $0xf0] sm:$0xf]  ;;  %v2349_v3 = vor.u32 %v2661_v1, %v2348_v0  ;;  %v2677_v4 = vld [vmem:[#allocation7 + $0xf4] sm:$0xf0]  ;;  %v2676_v5 = vld [vmem:[#allocation7 + $0xf4] sm:$0xf] }
  0x16   :  { %v2414_v6 = vld [vmem:[#allocation7 + $0xf8] sm:$0xf0]  ;;  %v3107_v7 = vor.u32 %v2677_v4, %v2412_v2  ;;  %v2340_v9 = vld [vmem:[#allocation7 + $0x60] sm:$0xf]  ;;  %v2659_v10 = vld [vmem:[#allocation7 + $0x64] sm:$0xf0] }
  0x17   :  { %v3109_v8 = vor.u32 %v2676_v5, %v2414_v6  ;;  %v2660_v11 = vld [vmem:[#allocation7 + $0x74] sm:$0xf]  ;;  %219 = vmatpush.bf16.msra.mxu0 %v2349_v3  ;;  %v2341_v12 = vor.u32 %v2659_v10, %v2340_v9  ;;  %v2350_v13 = vld [vmem:[#allocation7 + $0x78] sm:$0xf0]  ;;  %v2404_v14 = vld [vmem:[#allocation7 + $0xe0] sm:$0xf] }
  0x18   :  { %v2675_v15 = vld [vmem:[#allocation7 + $0xe4] sm:$0xf0]  ;;  %411 = vmatpush.bf16.msra.mxu2 %v3107_v7  ;;  %v2353_v16 = vor.u32 %v2660_v11, %v2350_v13  ;;  %v2674_v18 = vld [vmem:[#allocation7 + $0xe4] sm:$0xf]  ;;  %v2406_v19 = vld [vmem:[#allocation7 + $0xe8] sm:$0xf0] }
  0x19   :  { %424 = vmatpush.bf16.msra.mxu3 %v3109_v8  ;;  %v3113_v17 = vor.u32 %v2675_v15, %v2404_v14  ;;  %v2332_v20 = vld [vmem:[#allocation7 + $0x50] sm:$0xf]  ;;  %v3115_v21 = vor.u32 %v2674_v18, %v2406_v19  ;;  %v2657_v22 = vld [vmem:[#allocation7 + $0x54] sm:$0xf0]  ;;  %v2658_v23 = vld [vmem:[#allocation7 + $0x64] sm:$0xf] }
  0x1a   :  { %v2342_v24 = vld [vmem:[#allocation7 + $0x68] sm:$0xf0]  ;;  %248 = vmatpush.bf16.msra.mxu1 %v2353_v16  ;;  %v2396_v26 = vld [vmem:[#allocation7 + $0xd0] sm:$0xf]  ;;  %v2673_v27 = vld [vmem:[#allocation7 + $0xd4] sm:$0xf0]  ;;  %v2333_v29 = vor.u32 %v2657_v22, %v2332_v20 }
  0x1b   :  { %v2345_v25 = vor.u32 %v2658_v23, %v2342_v24  ;;  %v2672_v28 = vld [vmem:[#allocation7 + $0xd4] sm:$0xf]  ;;  %220 = vmatpush.bf16.msra.mxu0 %v2341_v12  ;;  %v2398_v30 = vld [vmem:[#allocation7 + $0xd8] sm:$0xf0]  ;;  %v2324_v31 = vld [vmem:[#allocation7 + $0x40] sm:$0xf]  ;;  %v3119_v33 = vor.u32 %v2673_v27, %v2396_v26 }
  0x1c   :  { %v2655_v32 = vld [vmem:[#allocation7 + $0x44] sm:$0xf0]  ;;  %412 = vmatpush.bf16.msra.mxu2 %v3113_v17  ;;  %v3121_v34 = vor.u32 %v2672_v28, %v2398_v30  ;;  %v2656_v35 = vld [vmem:[#allocation7 + $0x54] sm:$0xf]  ;;  %v2334_v36 = vld [vmem:[#allocation7 + $0x58] sm:$0xf0] }
  0x1d   :  { %425 = vmatpush.bf16.msra.mxu3 %v3115_v21  ;;  %v2388_v37 = vld [vmem:[#allocation7 + $0xc0] sm:$0xf]  ;;  %v2671_v38 = vld [vmem:[#allocation7 + $0xc4] sm:$0xf0]  ;;  %v2670_v39 = vld [vmem:[#allocation7 + $0xc4] sm:$0xf]  ;;  %v2337_v41 = vor.u32 %v2656_v35, %v2334_v36  ;;  %v2325_v42 = vor.u32 %v2655_v32, %v2324_v31 }
  0x1e   :  { %v2390_v40 = vld [vmem:[#allocation7 + $0xc8] sm:$0xf0]  ;;  %249 = vmatpush.bf16.msra.mxu1 %v2345_v25  ;;  %v2654_v43 = vld [vmem:[#allocation7 + $0x44] sm:$0xf]  ;;  %v3125_v45 = vor.u32 %v2671_v38, %v2388_v37  ;;  %v2316_v47 = vld [vmem:[#allocation7 + $0x30] sm:$0xf] }
  0x1f   :  { %221 = vmatpush.bf16.msra.mxu0 %v2333_v29  ;;  %v2326_v44 = vld [vmem:[#allocation7 + $0x48] sm:$0xf0]  ;;  %v3127_v46 = vor.u32 %v2670_v39, %v2390_v40  ;;  %v2653_v48 = vld [vmem:[#allocation7 + $0x34] sm:$0xf0]  ;;  %v2380_v49 = vld [vmem:[#allocation7 + $0xb0] sm:$0xf] }
  0x20   :  { %413 = vmatpush.bf16.msra.mxu2 %v3119_v33  ;;  %v2669_v50 = vld [vmem:[#allocation7 + $0xb4] sm:$0xf0]  ;;  %v2668_v51 = vld [vmem:[#allocation7 + $0xb4] sm:$0xf]  ;;  %v2382_v52 = vld [vmem:[#allocation7 + $0xb8] sm:$0xf0]  ;;  %v2329_v53 = vor.u32 %v2654_v43, %v2326_v44  ;;  %v2317_v54 = vor.u32 %v2653_v48, %v2316_v47 }
  0x21   :  { %426 = vmatpush.bf16.msra.mxu3 %v3121_v34  ;;  %v2652_v55 = vld [vmem:[#allocation7 + $0x34] sm:$0xf]  ;;  %v2318_v56 = vld [vmem:[#allocation7 + $0x38] sm:$0xf0]  ;;  %v3131_v57 = vor.u32 %v2669_v50, %v2380_v49  ;;  %v3133_v58 = vor.u32 %v2668_v51, %v2382_v52  ;;  %v2308_v59 = vld [vmem:[#allocation7 + $0x20] sm:$0xf] }
  0x22   :  { %250 = vmatpush.bf16.msra.mxu1 %v2337_v41  ;;  %v2651_v60 = vld [vmem:[#allocation7 + $0x24] sm:$0xf0]  ;;  %v2372_v61 = vld [vmem:[#allocation7 + $0xa0] sm:$0xf]  ;;  %v2666_v63 = vld [vmem:[#allocation7 + $0xa4] sm:$0xf]  ;;  %v2321_v1 = vor.u32 %v2652_v55, %v2318_v56 }
  0x23   :  { %222 = vmatpush.bf16.msra.mxu0 %v2325_v42  ;;  %v2667_v62 = vld [vmem:[#allocation7 + $0xa4] sm:$0xf0]  ;;  %v2374_v0 = vld [vmem:[#allocation7 + $0xa8] sm:$0xf0]  ;;  %v2309_v2 = vor.u32 %v2651_v60, %v2308_v59  ;;  %v2650_v3 = vld [vmem:[#allocation7 + $0x24] sm:$0xf] }
  0x24   :  { %414 = vmatpush.bf16.msra.mxu2 %v3125_v45  ;;  %v2310_v4 = vld [vmem:[#allocation7 + $0x28] sm:$0xf0]  ;;  %v3137_v5 = vor.u32 %v2667_v62, %v2372_v61  ;;  %v3139_v6 = vor.u32 %v2666_v63, %v2374_v0  ;;  %v2300_v9 = vld [vmem:[#allocation7 + $0x10] sm:$0xf]  ;;  %v2649_v10 = vld [vmem:[#allocation7 + $0x14] sm:$0xf0] }
  0x25   :  { %427 = vmatpush.bf16.msra.mxu3 %v3127_v46  ;;  %v2364_v11 = vld [vmem:[#allocation7 + $0x90] sm:$0xf]  ;;  %v2665_v12 = vld [vmem:[#allocation7 + $0x94] sm:$0xf0]  ;;  %v2664_v13 = vld [vmem:[#allocation7 + $0x94] sm:$0xf]  ;;  %v2313_v15 = vor.u32 %v2650_v3, %v2310_v4  ;;  %v2301_v16 = vor.u32 %v2649_v10, %v2300_v9 }
  0x26   :  { %251 = vmatpush.bf16.msra.mxu1 %v2329_v53  ;;  %v2366_v14 = vld [vmem:[#allocation7 + $0x98] sm:$0xf0]  ;;  %v2648_v18 = vld [vmem:[#allocation7 + $0x14] sm:$0xf]  ;;  %v3143_v20 = vor.u32 %v2665_v12, %v2364_v11  ;;  %v2292_v23 = vld [vmem:[#allocation7] sm:$0xf] }
  0x27   :  { %223 = vmatpush.bf16.msra.mxu0 %v2317_v54  ;;  %v2302_v19 = vld [vmem:[#allocation7 + $0x18] sm:$0xf0]  ;;  %v3145_v22 = vor.u32 %v2664_v13, %v2366_v14  ;;  %v2647_v24 = vld [vmem:[#allocation7 + $0x4] sm:$0xf0]  ;;  %v2356_v25 = vld [vmem:[#allocation7 + $0x80] sm:$0xf] }
  0x28   :  { %415 = vmatpush.bf16.msra.mxu2 %v3131_v57  ;;  %v2663_v26 = vld [vmem:[#allocation7 + $0x84] sm:$0xf0]  ;;  %v2662_v27 = vld [vmem:[#allocation7 + $0x84] sm:$0xf]  ;;  %v2358_v28 = vld [vmem:[#allocation7 + $0x88] sm:$0xf0]  ;;  %v2305_v29 = vor.u32 %v2648_v18, %v2302_v19  ;;  %v2293_v30 = vor.u32 %v2647_v24, %v2292_v23  ;;  %v80_v24 = vlaneseq }
  0x29   :  { %428 = vmatpush.bf16.msra.mxu3 %v3133_v58  ;;  %v2646_v31 = vld [vmem:[#allocation7 + $0x4] sm:$0xf]  ;;  %v2294_v32 = vld [vmem:[#allocation7 + $0x8] sm:$0xf0]  ;;  %v3149_v35 = vor.u32 %v2663_v26, %v2356_v25  ;;  %v3151_v36 = vor.u32 %v2662_v27, %v2358_v28  ;;  %v3843_v39 = vmov 0   ;;  %s3065_s2 = smov [#allocation12]  }
  0x2a   :  { %252 = vmatpush.bf16.msra.mxu1 %v2321_v1  ;;  %v2642_v37 = vld [vmem:[#allocation4] sm:$0xff]  ;;  %v2297_v38 = vor.u32 %v2646_v31, %v2294_v32  ;;  %v2643_v59 = vld [vmem:[#allocation4 + $0x8] sm:$0xff]  ;;  %v2478_v60 = vld [vmem:[#allocation7 + $0x170] sm:$0xf]  ;;  %v81_v31 = vand.u32 127, %v80_v24  ;;  %s2260_s3 = sshll.u32 %s3065_s2, 4  ;;  %s2261_s3 = int_to_ptr.vmem [resolvable:$true] %s2260_s3 }
  0x2b   :  { %224 = vmatpush.bf16.msra.mxu0 %v2309_v2  ;;  %v109_v40 = vld [vmem:[#allocation10] ss:$8 sm:$0x3]  ;;  %v2693_v61 = vld [vmem:[#allocation7 + $0x174] sm:$0xf0]  ;;  %s2262_s13 = sshll.u32 %s3842_s4, 4  ;;  %s2263_s13 = int_to_ptr.hbm [resolvable:$true] %s2262_s13 }
  0x2c   :  { %416 = vmatpush.bf16.msra.mxu2 %v3137_v5  ;;  %v3189_v41 = vperm.slane %v109_v40, 0  ;;  %v3191_v42 = vperm.slane %v109_v40, 1  ;;  %v2692_v62 = vld [vmem:[#allocation7 + $0x174] sm:$0xf]  ;;  %v2480_v63 = vld [vmem:[#allocation7 + $0x178] sm:$0xf0]  ;;  %v3195_v0 = vor.u32 %v2693_v61, %v2478_v60 }
  0x2d   :  { %429 = vmatpush.bf16.msra.mxu3 %v3139_v6  ;;  %v3197_v1 = vor.u32 %v2692_v62, %v2480_v63  ;;  %v2470_v2 = vld [vmem:[#allocation7 + $0x160] sm:$0xf]  ;;  %v2691_v3 = vld [vmem:[#allocation7 + $0x164] sm:$0xf0]  ;;  %v2690_v4 = vld [vmem:[#allocation7 + $0x164] sm:$0xf] }
  0x2e   :  { %253 = vmatpush.bf16.msra.mxu1 %v2313_v15  ;;  %v2472_v10 = vld [vmem:[#allocation7 + $0x168] sm:$0xf0]  ;;  %v3201_v13 = vor.u32 %v2691_v3, %v2470_v2  ;;  %v2462_v15 = vld [vmem:[#allocation7 + $0x150] sm:$0xf]  ;;  %v2688_v19 = vld [vmem:[#allocation7 + $0x154] sm:$0xf] }
  0x2f   :  { %225 = vmatpush.bf16.msra.mxu0 %v2301_v16  ;;  %v3203_v14 = vor.u32 %v2690_v4, %v2472_v10  ;;  %v2689_v16 = vld [vmem:[#allocation7 + $0x154] sm:$0xf0]  ;;  %v2464_v23 = vld [vmem:[#allocation7 + $0x158] sm:$0xf0]  ;;  %v2454_v27 = vld [vmem:[#allocation7 + $0x140] sm:$0xf] }
  0x30   :  { %417 = vmatpush.bf16.msra.mxu2 %v3143_v20  ;;  %v3207_v25 = vor.u32 %v2689_v16, %v2462_v15  ;;  %v3209_v26 = vor.u32 %v2688_v19, %v2464_v23  ;;  %v2687_v28 = vld [vmem:[#allocation7 + $0x144] sm:$0xf0]  ;;  %vm82_vm0 = vcmp.ge.s32.totalorder %v81_v31, 64  ;;  %vm83_vm1 = vcmp.lt.s32.totalorder %v81_v31, 96  ;;  %v2645_v10 = vld [vmem:[#allocation4 + $0x18] sm:$0xff] }
  0x31   :  { %430 = vmatpush.bf16.msra.mxu3 %v3145_v22  ;;  %vm3219_vm3 = vmand %vm82_vm0, %vm83_vm1  ;;  %v2685_v15 = vld [vmem:[#allocation7 + $0x134] sm:$0xf0]  ;;  %v2684_v16 = vld [vmem:[#allocation7 + $0x134] sm:$0xf] }
  0x32   :  { %254 = vmatpush.bf16.msra.mxu1 %v2305_v29  ;;  %v2686_v29 = vld [vmem:[#allocation7 + $0x144] sm:$0xf]  ;;  %v2448_v23 = vld [vmem:[#allocation7 + $0x138] sm:$0xf0] }
  0x33   :  { %226 = vmatpush.bf16.msra.mxu0 %v2293_v30  ;;  %v2456_v30 = vld [vmem:[#allocation7 + $0x148] sm:$0xf0]  ;;  %v3229_v24 = vor.u32 %v2684_v16, %v2448_v23 }
  0x34   :  { %418 = vmatpush.bf16.msra.mxu2 %v3149_v35 }
  0x35   :  { %431 = vmatpush.bf16.msra.mxu3 %v3151_v36 }
  0x36   :  { %227 = vmatmul.bf16.vlgmr.msra.gmra.mxu0 %v2642_v37  ;;  %255 = vmatpush.bf16.msra.mxu1 %v2297_v38  ;;  %v3215_v38 = vor.u32 %v2686_v29, %v2456_v30  ;;  %v2440_v30 = vld [vmem:[#allocation7 + $0x128] sm:$0xf0] }
  0x37   :  { %604 = vmatpush.bf16.msrb.mxu0 %v3107_v7  ;;  %419 = vmatmul.bf16.vlgmr.msra.gmra.mxu2 %v3843_v39 }
  0x38   :  { %432 = vmatmul.bf16.vlgmr.msra.gmra.mxu3 %v3843_v39  ;;  %574 = vmatpush.bf16.msrb.mxu2 %v3195_v0 }
  0x39   :  { %256 = vmatmul.bf16.vlgmr.msra.gmra.mxu1 %v2642_v37  ;;  %587 = vmatpush.bf16.msrb.mxu3 %v3197_v1  ;;  %v3213_v37 = vor.u32 %v2687_v28, %v2454_v27  ;;  %v2683_v27 = vld [vmem:[#allocation7 + $0x124] sm:$0xf0]  ;;  %v2682_v28 = vld [vmem:[#allocation7 + $0x124] sm:$0xf] }
  0x3a   :  { %617 = vmatpush.bf16.msrb.mxu1 %v3109_v8  ;;  %v3235_v31 = vor.u32 %v2682_v28, %v2440_v30 }
  0x3b   :  { %605 = vmatpush.bf16.msrb.mxu0 %v3113_v17 }
  0x3c   :  { %575 = vmatpush.bf16.msrb.mxu2 %v3201_v13 }
  0x3d   :  { %588 = vmatpush.bf16.msrb.mxu3 %v3203_v14 }
  0x3e   :  { %618 = vmatpush.bf16.msrb.mxu1 %v3115_v21 }
  0x3f   :  { %606 = vmatpush.bf16.msrb.mxu0 %v3119_v33 }
  0x40   :  { %576 = vmatpush.bf16.msrb.mxu2 %v3207_v25 }
  0x41   :  { %589 = vmatpush.bf16.msrb.mxu3 %v3209_v26 }
  0x42   :  { %619 = vmatpush.bf16.msrb.mxu1 %v3121_v34 }
  0x43   :  { %607 = vmatpush.bf16.msrb.mxu0 %v3125_v45 }
  0x44   :  { %577 = vmatpush.bf16.msrb.mxu2 %v3213_v37 }
  0x45   :  { %590 = vmatpush.bf16.msrb.mxu3 %v3215_v38 }
  0x46   :  { %620 = vmatpush.bf16.msrb.mxu1 %v3127_v46  ;;  %232 = vmatmul.bf16.gmra.mxu0 %v2643_v59 }
  0x47   :  { %608 = vmatpush.bf16.msrb.mxu0 %v3131_v57 }
  0x49   :  { %261 = vmatmul.bf16.gmra.mxu1 %v2643_v59  ;;  %591 = vmatpush.bf16.msrb.mxu3 %v3229_v24 }
  0x4a   :  { %621 = vmatpush.bf16.msrb.mxu1 %v3133_v58 }
  0x4b   :  { %609 = vmatpush.bf16.msrb.mxu0 %v3137_v5 }
  0x4d   :  { %592 = vmatpush.bf16.msrb.mxu3 %v3235_v31 }
  0x4e   :  { %622 = vmatpush.bf16.msrb.mxu1 %v3139_v6 }
  0x4f   :  { %610 = vmatpush.bf16.msrb.mxu0 %v3143_v20 }
  0x52   :  { %623 = vmatpush.bf16.msrb.mxu1 %v3145_v22 }
  0x53   :  { %611 = vmatpush.bf16.msrb.mxu0 %v3149_v35 }
  0x56   :  { %624 = vmatpush.bf16.msrb.mxu1 %v3151_v36 }
  0x57   :  { %712 = vmatpush.bf16.msra.mxu0 %v3107_v7 }
  0x5a   :  { %725 = vmatpush.bf16.msra.mxu1 %v3109_v8 }
  0x5b   :  { %713 = vmatpush.bf16.msra.mxu0 %v3113_v17 }
  0x5e   :  { %726 = vmatpush.bf16.msra.mxu1 %v3115_v21 }
  0x5f   :  { %714 = vmatpush.bf16.msra.mxu0 %v3119_v33 }
  0x62   :  { %727 = vmatpush.bf16.msra.mxu1 %v3121_v34 }
  0x63   :  { %715 = vmatpush.bf16.msra.mxu0 %v3125_v45 }
  0x66   :  { %728 = vmatpush.bf16.msra.mxu1 %v3127_v46 }
  0x67   :  { %716 = vmatpush.bf16.msra.mxu0 %v3131_v57 }
  0x6a   :  { %729 = vmatpush.bf16.msra.mxu1 %v3133_v58 }
  0x6b   :  { %717 = vmatpush.bf16.msra.mxu0 %v3137_v5 }
  0x6e   :  { %730 = vmatpush.bf16.msra.mxu1 %v3139_v6 }
  0x6f   :  { %718 = vmatpush.bf16.msra.mxu0 %v3143_v20 }
  0x72   :  { %731 = vmatpush.bf16.msra.mxu1 %v3145_v22 }
  0x73   :  { %719 = vmatpush.bf16.msra.mxu0 %v3149_v35 }
  0x76   :  { %732 = vmatpush.bf16.msra.mxu1 %v3151_v36 }
  0xb3   :  { %v228_v43 = vpop.f32.mrf.mxu0 }
  0xb4   :  { %v229_v47 = vadd.f32 %v228_v43, %v3189_v41 }
  0xb6   :  { %v257_v44 = vpop.f32.mrf.mxu1 }
  0xb7   :  { %v258_v48 = vadd.f32 %v257_v44, %v3191_v42 }
  0xba   :  { %v420_v49 = vpop.f32.mrf.mxu2 }
  0xbb   :  { %v433_v50 = vpop.f32.mrf.mxu3  ;;  %v437_v51 = vadd.f32 %v420_v49, %v229_v47  ;;  %v2644_v47 = vld [vmem:[#allocation4 + $0x10] sm:$0xff] }
  0xbc   :  { %v438_v52 = vadd.f32 %v433_v50, %v258_v48  ;;  %237 = vmatmul.bf16.gmra.mxu0 %v2644_v47  ;;  %266 = vmatmul.bf16.gmra.mxu1 %v2644_v47  ;;  %v2432_v47 = vld [vmem:[#allocation7 + $0x118] sm:$0xf0] }
  0xbd   :  { %v2418_v53 = vmul.f32 -1.442695, %v437_v51 }
  0xbe   :  { %v2419_v54 = vmul.f32 -1.442695, %v438_v52 }
  0xbf   :  { %2736 = vpow2.f32 %v2418_v53 }
  0xc0   :  { %2738 = vpow2.f32 %v2419_v54  ;;  %v2722_v54 = vld [vmem:[#allocation9 + $0x60] sm:$0xff] }
  0xc2   :  { %v422_v55 = vpop.f32.mrf.mxu2 }
  0xc3   :  { %v435_v56 = vpop.f32.mrf.mxu3 }
  0xc5   :  { %v2737_v9 = vpop.eup %2736 }
  0xc6   :  { %v2739_v11 = vpop.eup %2738  ;;  %v443_v12 = vadd.f32 1.0, %v2737_v9 }
  0xc7   :  { %v463_v18 = vadd.f32 1.0, %v2739_v11 }
  0xc8   :  { %2740 = vrcp.f32 %v443_v12  ;;  %v455_v49 = vand.u32 2147483648, %v443_v12  ;;  %v453_v53 = vand.u32 2147483647, %v443_v12  ;;  %vm449_vm4 = vweird.f32 %v443_v12 }
  0xc9   :  { %2742 = vrcp.f32 %v463_v18  ;;  %vm469_vm7 = vweird.f32 %v463_v18  ;;  %v475_v63 = vand.u32 2147483648, %v463_v18  ;;  %v473_v3 = vand.u32 2147483647, %v463_v18 }
  0xca   :  { %2744 = vtanh.f32 %v437_v51  ;;  %v456_v51 = vor.u32 1.1754944e-38, %v455_v49  ;;  %vm454_vm6 = vcmp.eq.f32.partialorder %v453_v53, 8.507059e+37  ;;  %v2422_v49 = vld [vmem:[#allocation7 + $0x100] sm:$0xf] }
  0xcb   :  { %v476_v4 = vor.u32 1.1754944e-38, %v475_v63  ;;  %vm474_vm10 = vcmp.eq.f32.partialorder %v473_v3, 8.507059e+37 }
  0xcc   :  { %242 = vmatmul.bf16.gmra.mxu0 %v2645_v10  ;;  %271 = vmatmul.bf16.gmra.mxu1 %v2645_v10 }
  0xce   :  { %v2741_v32 = vpop.eup %2740 }
  0xcf   :  { %v2743_v40 = vpop.eup %2742  ;;  %v445_v43 = vmul.f32 %v2741_v32, %v443_v12  ;;  %vm450_vm2 = vweird.f32 %v2741_v32  ;;  %v2446_v12 = vld [vmem:[#allocation7 + $0x130] sm:$0xf] }
  0xd0   :  { %v465_v44 = vmul.f32 %v2743_v40, %v463_v18  ;;  %vm451_vm5 = vmor %vm449_vm4, %vm450_vm2  ;;  %v2745_v60 = vpop.eup %2744  ;;  %vm470_vm8 = vweird.f32 %v2743_v40  ;;  %v3227_v19 = vor.u32 %v2685_v15, %v2446_v12  ;;  %v2438_v18 = vld [vmem:[#allocation7 + $0x120] sm:$0xf] }
  0xd1   :  { %v446_v48 = vsub.f32 1.0, %v445_v43  ;;  %vm471_vm9 = vmor %vm469_vm7, %vm470_vm8  ;;  %v3233_v29 = vor.u32 %v2683_v27, %v2438_v18  ;;  %v2680_v43 = vld [vmem:[#allocation7 + $0x114] sm:$0xf] }
  0xd2   :  { %v466_v50 = vsub.f32 1.0, %v465_v44  ;;  %578 = vmatpush.bf16.msrb.mxu2 %v3227_v19 }
  0xd3   :  { %v447_v52 = vmul.f32 %v2741_v32, %v446_v48  ;;  %v3241_v48 = vor.u32 %v2680_v43, %v2432_v47 }
  0xd4   :  { %v467_v56 = vmul.f32 %v2743_v40, %v466_v50  ;;  %v2679_v50 = vld [vmem:[#allocation7 + $0x104] sm:$0xf0] }
  0xd5   :  { %v448_v55 = vadd.f32 %v2741_v32, %v447_v52  ;;  %593 = vmatpush.bf16.msrb.mxu3 %v3241_v48  ;;  %v2678_v52 = vld [vmem:[#allocation7 + $0x104] sm:$0xf]  ;;  %v3245_v53 = vor.u32 %v2679_v50, %v2422_v49 }
  0xd6   :  { %v468_v2 = vadd.f32 %v2743_v40, %v467_v56  ;;  %579 = vmatpush.bf16.msrb.mxu2 %v3233_v29 }
  0xd7   :  { %v452_v59 = vsel %vm451_vm5, %v2741_v32, %v448_v55  ;;  %v2430_v32 = vld [vmem:[#allocation7 + $0x110] sm:$0xf]  ;;  %v2424_v55 = vld [vmem:[#allocation7 + $0x108] sm:$0xf0] }
  0xd8   :  { %v457_v61 = vsel %vm454_vm6, %v456_v51, %v452_v59  ;;  %v472_v9 = vsel %vm471_vm9, %v2743_v40, %v468_v2  ;;  %v2681_v40 = vld [vmem:[#allocation7 + $0x114] sm:$0xf0]  ;;  %v3247_v51 = vor.u32 %v2678_v52, %v2424_v55 }
  0xd9   :  { %v459_v62 = vsel %vm3219_vm3, %v2745_v60, %v457_v61  ;;  %v477_v11 = vsel %vm474_vm10, %v476_v4, %v472_v9  ;;  %v3239_v44 = vor.u32 %v2681_v40, %v2430_v32  ;;  %v259_v4 = vpop.f32.mrf.mxu1  ;;  %v230_v9 = vpop.f32.mrf.mxu0 }
  0xda   :  { %479 = vrot.lane.b32.xlu0 %v459_v62, %s3060_s27  ;;  %594 = vmatpush.bf16.msrb.mxu3 %v3247_v51  ;;  %v482_v59 = vmul.f32 0.0, %v477_v11  ;;  %v231_v43 = vadd.f32 %v230_v9, %v3189_v41  ;;  %v260_v47 = vadd.f32 %v259_v4, %v3191_v42 }
  0xdb   :  { %580 = vmatpush.bf16.msrb.mxu2 %v3239_v44 }
  0xde   :  { %695 = vmatpush.bf16.msra.mxu3 %v3197_v1 }
  0xdf   :  { %581 = vmatpush.bf16.msrb.mxu2 %v3245_v53 }
  0xe1   :  { %v3302_v10 = vpop.f32.mrf.mxu1 }
  0xe2   :  { %484 = vrot.lane.b32.xlu0 %v477_v11, %s3060_s27  ;;  %696 = vmatpush.bf16.msra.mxu3 %v3203_v14  ;;  %v3304_v11 = vpop.f32.mrf.mxu0 }
  0xe3   :  { %682 = vmatpush.bf16.msra.mxu2 %v3195_v0 }
  0xe6   :  { %697 = vmatpush.bf16.msra.mxu3 %v3209_v26 }
  0xe7   :  { %683 = vmatpush.bf16.msra.mxu2 %v3201_v13 }
  0xe9   :  { %v3306_v12 = vpop.f32.mrf.mxu1 }
  0xea   :  { %698 = vmatpush.bf16.msra.mxu3 %v3215_v38  ;;  %v3308_v15 = vpop.f32.mrf.mxu0 }
  0xeb   :  { %684 = vmatpush.bf16.msra.mxu2 %v3207_v25 }
  0xee   :  { %699 = vmatpush.bf16.msra.mxu3 %v3229_v24 }
  0xef   :  { %685 = vmatpush.bf16.msra.mxu2 %v3213_v37 }
  0xf2   :  { %700 = vmatpush.bf16.msra.mxu3 %v3235_v31 }
  0xf3   :  { %686 = vmatpush.bf16.msra.mxu2 %v3227_v19 }
  0xf6   :  { %701 = vmatpush.bf16.msra.mxu3 %v3241_v48 }
  0xf7   :  { %687 = vmatpush.bf16.msra.mxu2 %v3233_v29 }
  0xfa   :  { %702 = vmatpush.bf16.msra.mxu3 %v3247_v51 }
  0xfb   :  { %688 = vmatpush.bf16.msra.mxu2 %v3239_v44 }
  0xff   :  { %689 = vmatpush.bf16.msra.mxu2 %v3245_v53 }
 0x139   :  { %v3310_v16 = vpop.f32.mrf.mxu1  ;;  %v3312_v23 = vpop.f32.mrf.mxu0 }
 0x141   :  { %v3314_v18 = vpop.f32.mrf.mxu1  ;;  %v3316_v27 = vpop.f32.mrf.mxu0 }
 0x149   :  { %v3318_v28 = vpop.f32.mrf.mxu1  ;;  %v3320_v30 = vpop.f32.mrf.mxu0 }
 0x14a   :  { %3847 = vst [vmem:[#allocation17_spill] sm:$0xff] %v3318_v28 }
 0x14c   :  { %v480_v56 = vpop.permute.xlu0 %479 }
 0x14d   :  { %v481_v60 = vmul.f32 %v480_v56, %v459_v62 }
 0x14f   :  { %v3261_v61 = vadd.f32 %v482_v59, %v481_v60 }
 0x151   :  { %2746 = vtanh.f32 %v3261_v61  ;;  %v3322_v32 = vpop.f32.mrf.mxu1  ;;  %v3324_v40 = vpop.f32.mrf.mxu0 }
 0x152   :  { %3848 = vst [vmem:[#allocation18_spill] sm:$0xff] %v3322_v32 }
 0x153   :  { %3849 = vst [vmem:[#allocation19_spill] sm:$0xff] %v3324_v40 }
 0x154   :  { %v485_v2 = vpop.permute.xlu0 %484 }
 0x157   :  { %v2747_v63 = vpop.eup %2746 }
 0x158   :  { %v487_v3 = vmul.f32 %v2747_v63, %v485_v2 }
 0x15a   :  { %v488_v62 = vpack.c.bf16 %v487_v3, %v487_v3 }
 0x15c   :  { %582 = vmatmul.bf16.vlgmr.msrb.gmra.mxu2 %v488_v62  ;;  %595 = vmatmul.bf16.vlgmr.msrb.gmra.mxu3 %v488_v62 }
 0x15d   :  { %612 = vmatmul.bf16.vlgmr.msrb.gmra.mxu0 %v488_v62  ;;  %625 = vmatmul.bf16.vlgmr.msrb.gmra.mxu1 %v488_v62 }
 0x15e   :  { %790 = vmatpush.bf16.msrb.mxu2 %v3195_v0  ;;  %803 = vmatpush.bf16.msrb.mxu3 %v3197_v1 }
 0x15f   :  { %820 = vmatpush.bf16.msrb.mxu0 %v3107_v7  ;;  %833 = vmatpush.bf16.msrb.mxu1 %v3109_v8 }
 0x162   :  { %791 = vmatpush.bf16.msrb.mxu2 %v3201_v13  ;;  %804 = vmatpush.bf16.msrb.mxu3 %v3203_v14 }
 0x163   :  { %821 = vmatpush.bf16.msrb.mxu0 %v3113_v17  ;;  %834 = vmatpush.bf16.msrb.mxu1 %v3115_v21 }
 0x166   :  { %792 = vmatpush.bf16.msrb.mxu2 %v3207_v25  ;;  %805 = vmatpush.bf16.msrb.mxu3 %v3209_v26 }
 0x167   :  { %822 = vmatpush.bf16.msrb.mxu0 %v3119_v33  ;;  %835 = vmatpush.bf16.msrb.mxu1 %v3121_v34 }
 0x16a   :  { %793 = vmatpush.bf16.msrb.mxu2 %v3213_v37  ;;  %806 = vmatpush.bf16.msrb.mxu3 %v3215_v38 }
 0x16b   :  { %823 = vmatpush.bf16.msrb.mxu0 %v3125_v45  ;;  %836 = vmatpush.bf16.msrb.mxu1 %v3127_v46 }
 0x16e   :  { %794 = vmatpush.bf16.msrb.mxu2 %v3227_v19  ;;  %807 = vmatpush.bf16.msrb.mxu3 %v3229_v24 }
 0x16f   :  { %824 = vmatpush.bf16.msrb.mxu0 %v3131_v57  ;;  %837 = vmatpush.bf16.msrb.mxu1 %v3133_v58 }
 0x172   :  { %795 = vmatpush.bf16.msrb.mxu2 %v3233_v29  ;;  %808 = vmatpush.bf16.msrb.mxu3 %v3235_v31 }
 0x173   :  { %825 = vmatpush.bf16.msrb.mxu0 %v3137_v5  ;;  %838 = vmatpush.bf16.msrb.mxu1 %v3139_v6 }
 0x176   :  { %796 = vmatpush.bf16.msrb.mxu2 %v3239_v44  ;;  %809 = vmatpush.bf16.msrb.mxu3 %v3241_v48 }
 0x177   :  { %826 = vmatpush.bf16.msrb.mxu0 %v3143_v20  ;;  %839 = vmatpush.bf16.msrb.mxu1 %v3145_v22 }
 0x17a   :  { %797 = vmatpush.bf16.msrb.mxu2 %v3245_v53  ;;  %810 = vmatpush.bf16.msrb.mxu3 %v3247_v51 }
 0x17b   :  { %827 = vmatpush.bf16.msrb.mxu0 %v3149_v35  ;;  %840 = vmatpush.bf16.msrb.mxu1 %v3151_v36 }
 0x1da   :  { %v613_v49 = vpop.f32.mrf.mxu0  ;;  %v626_v50 = vpop.f32.mrf.mxu1 }
 0x1db   :  { %v630_v52 = vadd.f32 %v613_v49, %v231_v43  ;;  %v631_v55 = vadd.f32 %v626_v50, %v260_v47 }
 0x1dd   :  { %v2484_v56 = vmul.f32 -1.442695, %v630_v52  ;;  %v2485_v59 = vmul.f32 -1.442695, %v631_v55 }
 0x1df   :  { %2748 = vpow2.f32 %v2484_v56  ;;  %v3328_v60 = vpop.f32.mrf.mxu2  ;;  %v3330_v63 = vpop.f32.mrf.mxu3 }
 0x1e0   :  { %3850 = vst [vmem:[#allocation20_spill] sm:$0xff] %v3328_v60  ;;  %2750 = vpow2.f32 %v2485_v59 }
 0x1e1   :  { %3851 = vst [vmem:[#allocation21_spill] sm:$0xff] %v3330_v63 }
 0x1e2   :  { %v615_v2 = vpop.f32.mrf.mxu0  ;;  %v628_v3 = vpop.f32.mrf.mxu1 }
 0x1e5   :  { %v2749_v62 = vpop.eup %2748 }
 0x1e6   :  { %v2751_v39 = vpop.eup %2750  ;;  %v636_v32 = vadd.f32 1.0, %v2749_v62 }
 0x1e7   :  { %v656_v9 = vadd.f32 1.0, %v2751_v39  ;;  %v585_v40 = vpop.f32.mrf.mxu2  ;;  %v598_v4 = vpop.f32.mrf.mxu3 }
 0x1e8   :  { %2752 = vrcp.f32 %v636_v32  ;;  %v648_v56 = vand.u32 2147483648, %v636_v32  ;;  %v646_v59 = vand.u32 2147483647, %v636_v32  ;;  %vm642_vm12 = vweird.f32 %v636_v32 }
 0x1e9   :  { %2754 = vrcp.f32 %v656_v9  ;;  %vm662_vm0 = vweird.f32 %v656_v9 }
 0x1ea   :  { %2756 = vtanh.f32 %v630_v52  ;;  %v649_v3 = vor.u32 1.1754944e-38, %v648_v56  ;;  %vm647_vm14 = vcmp.eq.f32.partialorder %v646_v59, 8.507059e+37 }
 0x1ee   :  { %v2753_v43 = vpop.eup %2752 }
 0x1ef   :  { %v2755_v47 = vpop.eup %2754  ;;  %v638_v49 = vmul.f32 %v2753_v43, %v636_v32  ;;  %vm643_vm11 = vweird.f32 %v2753_v43 }
 0x1f0   :  { %v658_v50 = vmul.f32 %v2755_v47, %v656_v9  ;;  %vm644_vm13 = vmor %vm642_vm12, %vm643_vm11  ;;  %v2757_v62 = vpop.eup %2756  ;;  %vm663_vm15 = vweird.f32 %v2755_v47 }
 0x1f1   :  { %v639_v55 = vsub.f32 1.0, %v638_v49  ;;  %v668_v49 = vand.u32 2147483648, %v656_v9  ;;  %vm664_vm1 = vmor %vm662_vm0, %vm663_vm15 }
 0x1f2   :  { %v659_v60 = vsub.f32 1.0, %v658_v50  ;;  %v666_v50 = vand.u32 2147483647, %v656_v9 }
 0x1f3   :  { %v640_v63 = vmul.f32 %v2753_v43, %v639_v55  ;;  %v669_v32 = vor.u32 1.1754944e-38, %v668_v49 }
 0x1f4   :  { %v660_v39 = vmul.f32 %v2755_v47, %v659_v60  ;;  %vm667_vm2 = vcmp.eq.f32.partialorder %v666_v50, 8.507059e+37 }
 0x1f5   :  { %v641_v2 = vadd.f32 %v2753_v43, %v640_v63 }
 0x1f6   :  { %v661_v52 = vadd.f32 %v2755_v47, %v660_v39 }
 0x1f7   :  { %v645_v40 = vsel %vm644_vm13, %v2753_v43, %v641_v2 }
 0x1f8   :  { %v650_v4 = vsel %vm647_vm14, %v649_v3, %v645_v40  ;;  %v665_v63 = vsel %vm664_vm1, %v2755_v47, %v661_v52 }
 0x1f9   :  { %v652_v28 = vsel %vm3219_vm3, %v2757_v62, %v650_v4  ;;  %v670_v55 = vsel %vm667_vm2, %v669_v32, %v665_v63 }
 0x1fa   :  { %672 = vrot.lane.b32.xlu1 %v652_v28, %s3060_s27  ;;  %v675_v43 = vmul.f32 %v670_v55, %v3261_v61  ;;  %v234_v61 = vadd.f32 %v3304_v11, %v3189_v41 }
 0x202   :  { %677 = vrot.lane.b32.xlu1 %v670_v55, %s3060_s27 }
 0x26c   :  { %v673_v60 = vpop.permute.xlu1 %672 }
 0x26d   :  { %v674_v56 = vmul.f32 %v673_v60, %v652_v28  ;;  %v263_v28 = vadd.f32 %v3302_v10, %v3191_v42 }
 0x26f   :  { %v3337_v59 = vadd.f32 %v675_v43, %v674_v56 }
 0x271   :  { %2758 = vtanh.f32 %v3337_v59 }
 0x274   :  { %v678_v3 = vpop.permute.xlu1 %677 }
 0x277   :  { %v2759_v2 = vpop.eup %2758 }
 0x278   :  { %v680_v39 = vmul.f32 %v2759_v2, %v678_v3 }
 0x27a   :  { %v681_v40 = vpack.c.bf16 %v680_v39, %v680_v39 }
 0x27c   :  { %690 = vmatmul.bf16.vlgmr.msra.gmra.mxu2 %v681_v40  ;;  %703 = vmatmul.bf16.vlgmr.msra.gmra.mxu3 %v681_v40 }
 0x27d   :  { %720 = vmatmul.bf16.vlgmr.msra.gmra.mxu0 %v681_v40  ;;  %733 = vmatmul.bf16.vlgmr.msra.gmra.mxu1 %v681_v40 }
 0x27e   :  { %898 = vmatpush.bf16.msra.mxu2 %v3195_v0  ;;  %911 = vmatpush.bf16.msra.mxu3 %v3197_v1 }
 0x27f   :  { %928 = vmatpush.bf16.msra.mxu0 %v3107_v7  ;;  %941 = vmatpush.bf16.msra.mxu1 %v3109_v8 }
 0x282   :  { %899 = vmatpush.bf16.msra.mxu2 %v3201_v13  ;;  %912 = vmatpush.bf16.msra.mxu3 %v3203_v14 }
 0x283   :  { %929 = vmatpush.bf16.msra.mxu0 %v3113_v17  ;;  %942 = vmatpush.bf16.msra.mxu1 %v3115_v21 }
 0x286   :  { %900 = vmatpush.bf16.msra.mxu2 %v3207_v25  ;;  %913 = vmatpush.bf16.msra.mxu3 %v3209_v26 }
 0x287   :  { %930 = vmatpush.bf16.msra.mxu0 %v3119_v33  ;;  %943 = vmatpush.bf16.msra.mxu1 %v3121_v34 }
 0x28a   :  { %901 = vmatpush.bf16.msra.mxu2 %v3213_v37  ;;  %914 = vmatpush.bf16.msra.mxu3 %v3215_v38 }
 0x28b   :  { %931 = vmatpush.bf16.msra.mxu0 %v3125_v45  ;;  %944 = vmatpush.bf16.msra.mxu1 %v3127_v46 }
 0x28e   :  { %902 = vmatpush.bf16.msra.mxu2 %v3227_v19  ;;  %915 = vmatpush.bf16.msra.mxu3 %v3229_v24 }
 0x28f   :  { %932 = vmatpush.bf16.msra.mxu0 %v3131_v57  ;;  %945 = vmatpush.bf16.msra.mxu1 %v3133_v58 }
 0x292   :  { %903 = vmatpush.bf16.msra.mxu2 %v3233_v29  ;;  %916 = vmatpush.bf16.msra.mxu3 %v3235_v31 }
 0x293   :  { %933 = vmatpush.bf16.msra.mxu0 %v3137_v5  ;;  %946 = vmatpush.bf16.msra.mxu1 %v3139_v6 }
 0x296   :  { %904 = vmatpush.bf16.msra.mxu2 %v3239_v44  ;;  %917 = vmatpush.bf16.msra.mxu3 %v3241_v48 }
 0x297   :  { %934 = vmatpush.bf16.msra.mxu0 %v3143_v20  ;;  %947 = vmatpush.bf16.msra.mxu1 %v3145_v22 }
 0x29a   :  { %905 = vmatpush.bf16.msra.mxu2 %v3245_v53  ;;  %918 = vmatpush.bf16.msra.mxu3 %v3247_v51 }
 0x29b   :  { %935 = vmatpush.bf16.msra.mxu0 %v3149_v35  ;;  %948 = vmatpush.bf16.msra.mxu1 %v3151_v36 }
 0x2fa   :  { %v721_v9 = vpop.f32.mrf.mxu0  ;;  %v734_v47 = vpop.f32.mrf.mxu1 }
 0x2fb   :  { %v738_v62 = vadd.f32 %v721_v9, %v234_v61  ;;  %v739_v4 = vadd.f32 %v734_v47, %v263_v28 }
 0x2fd   :  { %v2486_v52 = vmul.f32 -1.442695, %v738_v62  ;;  %v2487_v49 = vmul.f32 -1.442695, %v739_v4 }
 0x2ff   :  { %2760 = vpow2.f32 %v2486_v52  ;;  %v3376_v50 = vpop.f32.mrf.mxu2  ;;  %v3378_v63 = vpop.f32.mrf.mxu3 }
 0x300   :  { %2762 = vpow2.f32 %v2487_v49 }
 0x302   :  { %v723_v32 = vpop.f32.mrf.mxu0  ;;  %v736_v55 = vpop.f32.mrf.mxu1 }
 0x305   :  { %v2761_v60 = vpop.eup %2760 }
 0x306   :  { %v2763_v43 = vpop.eup %2762  ;;  %v744_v11 = vadd.f32 1.0, %v2761_v60 }
 0x307   :  { %v764_v56 = vadd.f32 1.0, %v2763_v43  ;;  %v693_v2 = vpop.f32.mrf.mxu2  ;;  %v706_v10 = vpop.f32.mrf.mxu3 }
 0x308   :  { %2764 = vrcp.f32 %v744_v11  ;;  %v756_v9 = vand.u32 2147483648, %v744_v11  ;;  %v754_v52 = vand.u32 2147483647, %v744_v11  ;;  %vm750_vm5 = vweird.f32 %v744_v11 }
 0x309   :  { %2766 = vrcp.f32 %v764_v56  ;;  %vm770_vm9 = vweird.f32 %v764_v56 }
 0x30a   :  { %2768 = vtanh.f32 %v738_v62  ;;  %v757_v32 = vor.u32 1.1754944e-38, %v756_v9  ;;  %vm755_vm7 = vcmp.eq.f32.partialorder %v754_v52, 8.507059e+37 }
 0x30e   :  { %v2765_v3 = vpop.eup %2764 }
 0x30f   :  { %v2767_v39 = vpop.eup %2766  ;;  %v746_v40 = vmul.f32 %v2765_v3, %v744_v11  ;;  %vm751_vm4 = vweird.f32 %v2765_v3 }
 0x310   :  { %v766_v61 = vmul.f32 %v2767_v39, %v764_v56  ;;  %vm752_vm6 = vmor %vm750_vm5, %vm751_vm4  ;;  %v2769_v43 = vpop.eup %2768  ;;  %vm771_vm8 = vweird.f32 %v2767_v39 }
 0x311   :  { %v747_v28 = vsub.f32 1.0, %v746_v40  ;;  %v776_v40 = vand.u32 2147483648, %v764_v56  ;;  %vm772_vm10 = vmor %vm770_vm9, %vm771_vm8 }
 0x312   :  { %v767_v47 = vsub.f32 1.0, %v766_v61  ;;  %v774_v61 = vand.u32 2147483647, %v764_v56  ;;  %v265_v56 = vadd.f32 %v3306_v12, %v3191_v42 }
 0x313   :  { %v748_v4 = vmul.f32 %v2765_v3, %v747_v28  ;;  %v777_v11 = vor.u32 1.1754944e-38, %v776_v40 }
 0x314   :  { %v768_v55 = vmul.f32 %v2767_v39, %v767_v47  ;;  %vm775_vm11 = vcmp.eq.f32.partialorder %v774_v61, 8.507059e+37 }
 0x315   :  { %v749_v49 = vadd.f32 %v2765_v3, %v748_v4 }
 0x316   :  { %v769_v62 = vadd.f32 %v2767_v39, %v768_v55 }
 0x317   :  { %v753_v60 = vsel %vm752_vm6, %v2765_v3, %v749_v49 }
 0x318   :  { %v758_v2 = vsel %vm755_vm7, %v757_v32, %v753_v60  ;;  %v773_v28 = vsel %vm772_vm10, %v2767_v39, %v769_v62 }
 0x319   :  { %v760_v10 = vsel %vm3219_vm3, %v2769_v43, %v758_v2  ;;  %v778_v9 = vsel %vm775_vm11, %v777_v11, %v773_v28 }
 0x31a   :  { %780 = vrot.lane.b32.xlu2 %v760_v10, %s3060_s27  ;;  %v783_v47 = vmul.f32 %v778_v9, %v3337_v59  ;;  %v236_v59 = vadd.f32 %v3308_v15, %v3189_v41 }
 0x322   :  { %785 = vrot.lane.b32.xlu2 %v778_v9, %s3060_s27 }
 0x374   :  { %v781_v3 = vpop.permute.xlu2 %780 }
 0x375   :  { %v782_v4 = vmul.f32 %v781_v3, %v760_v10 }
 0x377   :  { %v3385_v52 = vadd.f32 %v783_v47, %v782_v4 }
 0x379   :  { %2770 = vtanh.f32 %v3385_v52 }
 0x37c   :  { %v786_v32 = vpop.permute.xlu2 %785 }
 0x37f   :  { %v2771_v49 = vpop.eup %2770 }
 0x380   :  { %v788_v55 = vmul.f32 %v2771_v49, %v786_v32 }
 0x382   :  { %v789_v60 = vpack.c.bf16 %v788_v55, %v788_v55 }
 0x384   :  { %798 = vmatmul.bf16.vlgmr.msrb.gmra.mxu2 %v789_v60  ;;  %811 = vmatmul.bf16.vlgmr.msrb.gmra.mxu3 %v789_v60 }
 0x385   :  { %828 = vmatmul.bf16.vlgmr.msrb.gmra.mxu0 %v789_v60  ;;  %841 = vmatmul.bf16.vlgmr.msrb.gmra.mxu1 %v789_v60 }
 0x386   :  { %1006 = vmatpush.bf16.msrb.mxu2 %v3195_v0  ;;  %1019 = vmatpush.bf16.msrb.mxu3 %v3197_v1 }
 0x387   :  { %1036 = vmatpush.bf16.msrb.mxu0 %v3107_v7  ;;  %1049 = vmatpush.bf16.msrb.mxu1 %v3109_v8 }
 0x38a   :  { %1007 = vmatpush.bf16.msrb.mxu2 %v3201_v13  ;;  %1020 = vmatpush.bf16.msrb.mxu3 %v3203_v14 }
 0x38b   :  { %1037 = vmatpush.bf16.msrb.mxu0 %v3113_v17  ;;  %1050 = vmatpush.bf16.msrb.mxu1 %v3115_v21 }
 0x38e   :  { %1008 = vmatpush.bf16.msrb.mxu2 %v3207_v25  ;;  %1021 = vmatpush.bf16.msrb.mxu3 %v3209_v26 }
 0x38f   :  { %1038 = vmatpush.bf16.msrb.mxu0 %v3119_v33  ;;  %1051 = vmatpush.bf16.msrb.mxu1 %v3121_v34 }
 0x392   :  { %1009 = vmatpush.bf16.msrb.mxu2 %v3213_v37  ;;  %1022 = vmatpush.bf16.msrb.mxu3 %v3215_v38 }
 0x393   :  { %1039 = vmatpush.bf16.msrb.mxu0 %v3125_v45  ;;  %1052 = vmatpush.bf16.msrb.mxu1 %v3127_v46 }
 0x396   :  { %1010 = vmatpush.bf16.msrb.mxu2 %v3227_v19  ;;  %1023 = vmatpush.bf16.msrb.mxu3 %v3229_v24 }
 0x397   :  { %1040 = vmatpush.bf16.msrb.mxu0 %v3131_v57  ;;  %1053 = vmatpush.bf16.msrb.mxu1 %v3133_v58 }
 0x39a   :  { %1011 = vmatpush.bf16.msrb.mxu2 %v3233_v29  ;;  %1024 = vmatpush.bf16.msrb.mxu3 %v3235_v31 }
 0x39b   :  { %1041 = vmatpush.bf16.msrb.mxu0 %v3137_v5  ;;  %1054 = vmatpush.bf16.msrb.mxu1 %v3139_v6 }
 0x39e   :  { %1012 = vmatpush.bf16.msrb.mxu2 %v3239_v44  ;;  %1025 = vmatpush.bf16.msrb.mxu3 %v3241_v48 }
 0x39f   :  { %1042 = vmatpush.bf16.msrb.mxu0 %v3143_v20  ;;  %1055 = vmatpush.bf16.msrb.mxu1 %v3145_v22 }
 0x3a2   :  { %1013 = vmatpush.bf16.msrb.mxu2 %v3245_v53  ;;  %1026 = vmatpush.bf16.msrb.mxu3 %v3247_v51 }
 0x3a3   :  { %1043 = vmatpush.bf16.msrb.mxu0 %v3149_v35  ;;  %1056 = vmatpush.bf16.msrb.mxu1 %v3151_v36 }
 0x402   :  { %v829_v39 = vpop.f32.mrf.mxu0  ;;  %v842_v43 = vpop.f32.mrf.mxu1 }
 0x403   :  { %v846_v2 = vadd.f32 %v829_v39, %v236_v59  ;;  %v847_v10 = vadd.f32 %v842_v43, %v265_v56 }
 0x405   :  { %v2488_v62 = vmul.f32 -1.442695, %v846_v2  ;;  %v2489_v40 = vmul.f32 -1.442695, %v847_v10 }
 0x407   :  { %2772 = vpow2.f32 %v2488_v62  ;;  %v3424_v61 = vpop.f32.mrf.mxu2  ;;  %v3426_v28 = vpop.f32.mrf.mxu3 }
 0x408   :  { %3852 = vst [vmem:[#allocation22_spill] sm:$0xff] %v3426_v28  ;;  %2774 = vpow2.f32 %v2489_v40 }
 0x40a   :  { %v831_v11 = vpop.f32.mrf.mxu0  ;;  %v844_v9 = vpop.f32.mrf.mxu1 }
 0x40d   :  { %v2773_v3 = vpop.eup %2772 }
 0x40e   :  { %v2775_v47 = vpop.eup %2774  ;;  %v852_v15 = vadd.f32 1.0, %v2773_v3 }
 0x40f   :  { %v872_v4 = vadd.f32 1.0, %v2775_v47  ;;  %v801_v49 = vpop.f32.mrf.mxu2  ;;  %v814_v12 = vpop.f32.mrf.mxu3 }
 0x410   :  { %2776 = vrcp.f32 %v852_v15  ;;  %v864_v43 = vand.u32 2147483648, %v852_v15  ;;  %v862_v40 = vand.u32 2147483647, %v852_v15  ;;  %vm858_vm14 = vweird.f32 %v852_v15 }
 0x411   :  { %2778 = vrcp.f32 %v872_v4  ;;  %v884_v10 = vand.u32 2147483648, %v872_v4  ;;  %v882_v9 = vand.u32 2147483647, %v872_v4  ;;  %vm878_vm15 = vweird.f32 %v872_v4 }
 0x412   :  { %2780 = vtanh.f32 %v846_v2  ;;  %v865_v49 = vor.u32 1.1754944e-38, %v864_v43  ;;  %vm863_vm2 = vcmp.eq.f32.partialorder %v862_v40, 8.507059e+37  ;;  %v268_v40 = vadd.f32 %v3310_v16, %v3191_v42 }
 0x413   :  { %v885_v12 = vor.u32 1.1754944e-38, %v884_v10  ;;  %vm883_vm4 = vcmp.eq.f32.partialorder %v882_v9, 8.507059e+37 }
 0x416   :  { %v2777_v32 = vpop.eup %2776 }
 0x417   :  { %v2779_v55 = vpop.eup %2778  ;;  %v854_v60 = vmul.f32 %v2777_v32, %v852_v15  ;;  %vm859_vm12 = vweird.f32 %v2777_v32 }
 0x418   :  { %v874_v59 = vmul.f32 %v2779_v55, %v872_v4  ;;  %vm879_vm13 = vweird.f32 %v2779_v55  ;;  %vm860_vm0 = vmor %vm858_vm14, %vm859_vm12  ;;  %v2781_v2 = vpop.eup %2780 }
 0x419   :  { %v855_v56 = vsub.f32 1.0, %v854_v60  ;;  %vm880_vm1 = vmor %vm878_vm15, %vm879_vm13 }
 0x41a   :  { %v875_v39 = vsub.f32 1.0, %v874_v59 }
 0x41b   :  { %v856_v62 = vmul.f32 %v2777_v32, %v855_v56 }
 0x41c   :  { %v876_v11 = vmul.f32 %v2779_v55, %v875_v39 }
 0x41d   :  { %v857_v3 = vadd.f32 %v2777_v32, %v856_v62 }
 0x41e   :  { %v877_v47 = vadd.f32 %v2779_v55, %v876_v11 }
 0x41f   :  { %v861_v28 = vsel %vm860_vm0, %v2777_v32, %v857_v3 }
 0x420   :  { %v881_v60 = vsel %vm880_vm1, %v2779_v55, %v877_v47  ;;  %v866_v59 = vsel %vm863_vm2, %v865_v49, %v861_v28 }
 0x421   :  { %v886_v56 = vsel %vm883_vm4, %v885_v12, %v881_v60  ;;  %v868_v39 = vsel %vm3219_vm3, %v2781_v2, %v866_v59 }
 0x422   :  { %893 = vrot.lane.b32.xlu1 %v886_v56, %s3060_s27  ;;  %888 = vrot.lane.b32.xlu0 %v868_v39, %s3060_s27  ;;  %v891_v4 = vmul.f32 %v886_v56, %v3385_v52  ;;  %v239_v52 = vadd.f32 %v3312_v23, %v3189_v41 }
 0x494   :  { %v889_v15 = vpop.permute.xlu0 %888  ;;  %v894_v55 = vpop.permute.xlu1 %893 }
 0x495   :  { %v890_v43 = vmul.f32 %v889_v15, %v868_v39 }
 0x497   :  { %v3433_v62 = vadd.f32 %v891_v4, %v890_v43 }
 0x499   :  { %2782 = vtanh.f32 %v3433_v62 }
 0x49f   :  { %v2783_v32 = vpop.eup %2782 }
 0x4a0   :  { %v896_v10 = vmul.f32 %v2783_v32, %v894_v55 }
 0x4a2   :  { %v897_v28 = vpack.c.bf16 %v896_v10, %v896_v10 }
 0x4a4   :  { %906 = vmatmul.bf16.vlgmr.msra.gmra.mxu2 %v897_v28  ;;  %919 = vmatmul.bf16.vlgmr.msra.gmra.mxu3 %v897_v28 }
 0x4a5   :  { %936 = vmatmul.bf16.vlgmr.msra.gmra.mxu0 %v897_v28  ;;  %949 = vmatmul.bf16.vlgmr.msra.gmra.mxu1 %v897_v28 }
 0x4a6   :  { %1114 = vmatpush.bf16.msra.mxu2 %v3195_v0  ;;  %1127 = vmatpush.bf16.msra.mxu3 %v3197_v1 }
 0x4a7   :  { %1144 = vmatpush.bf16.msra.mxu0 %v3107_v7  ;;  %1157 = vmatpush.bf16.msra.mxu1 %v3109_v8 }
 0x4aa   :  { %1115 = vmatpush.bf16.msra.mxu2 %v3201_v13  ;;  %1128 = vmatpush.bf16.msra.mxu3 %v3203_v14 }
 0x4ab   :  { %1145 = vmatpush.bf16.msra.mxu0 %v3113_v17  ;;  %1158 = vmatpush.bf16.msra.mxu1 %v3115_v21 }
 0x4ae   :  { %1116 = vmatpush.bf16.msra.mxu2 %v3207_v25  ;;  %1129 = vmatpush.bf16.msra.mxu3 %v3209_v26 }
 0x4af   :  { %1146 = vmatpush.bf16.msra.mxu0 %v3119_v33  ;;  %1159 = vmatpush.bf16.msra.mxu1 %v3121_v34 }
 0x4b2   :  { %1117 = vmatpush.bf16.msra.mxu2 %v3213_v37  ;;  %1130 = vmatpush.bf16.msra.mxu3 %v3215_v38 }
 0x4b3   :  { %1147 = vmatpush.bf16.msra.mxu0 %v3125_v45  ;;  %1160 = vmatpush.bf16.msra.mxu1 %v3127_v46 }
 0x4b6   :  { %1118 = vmatpush.bf16.msra.mxu2 %v3227_v19  ;;  %1131 = vmatpush.bf16.msra.mxu3 %v3229_v24 }
 0x4b7   :  { %1148 = vmatpush.bf16.msra.mxu0 %v3131_v57  ;;  %1161 = vmatpush.bf16.msra.mxu1 %v3133_v58 }
 0x4ba   :  { %1119 = vmatpush.bf16.msra.mxu2 %v3233_v29  ;;  %1132 = vmatpush.bf16.msra.mxu3 %v3235_v31 }
 0x4bb   :  { %1149 = vmatpush.bf16.msra.mxu0 %v3137_v5  ;;  %1162 = vmatpush.bf16.msra.mxu1 %v3139_v6 }
 0x4be   :  { %1120 = vmatpush.bf16.msra.mxu2 %v3239_v44  ;;  %1133 = vmatpush.bf16.msra.mxu3 %v3241_v48 }
 0x4bf   :  { %1150 = vmatpush.bf16.msra.mxu0 %v3143_v20  ;;  %1163 = vmatpush.bf16.msra.mxu1 %v3145_v22 }
 0x4c2   :  { %1121 = vmatpush.bf16.msra.mxu2 %v3245_v53  ;;  %1134 = vmatpush.bf16.msra.mxu3 %v3247_v51 }
 0x4c3   :  { %1151 = vmatpush.bf16.msra.mxu0 %v3149_v35  ;;  %1164 = vmatpush.bf16.msra.mxu1 %v3151_v36 }
 0x522   :  { %v937_v11 = vpop.f32.mrf.mxu0  ;;  %v950_v9 = vpop.f32.mrf.mxu1 }
 0x523   :  { %v954_v3 = vadd.f32 %v937_v11, %v239_v52  ;;  %v955_v47 = vadd.f32 %v950_v9, %v268_v40 }
 0x525   :  { %v2490_v49 = vmul.f32 -1.442695, %v954_v3  ;;  %v2491_v12 = vmul.f32 -1.442695, %v955_v47 }
 0x527   :  { %2784 = vpow2.f32 %v2490_v49  ;;  %v3472_v2 = vpop.f32.mrf.mxu2  ;;  %v3474_v60 = vpop.f32.mrf.mxu3 }
 0x528   :  { %2786 = vpow2.f32 %v2491_v12 }
 0x52a   :  { %v939_v59 = vpop.f32.mrf.mxu0  ;;  %v952_v56 = vpop.f32.mrf.mxu1 }
 0x52d   :  { %v2785_v39 = vpop.eup %2784 }
 0x52e   :  { %v2787_v15 = vpop.eup %2786  ;;  %v960_v23 = vadd.f32 1.0, %v2785_v39 }
 0x52f   :  { %v980_v4 = vadd.f32 1.0, %v2787_v15  ;;  %v909_v43 = vpop.f32.mrf.mxu2  ;;  %v922_v16 = vpop.f32.mrf.mxu3 }
 0x530   :  { %2788 = vrcp.f32 %v960_v23  ;;  %v972_v11 = vand.u32 2147483648, %v960_v23  ;;  %v970_v49 = vand.u32 2147483647, %v960_v23  ;;  %vm966_vm7 = vweird.f32 %v960_v23 }
 0x531   :  { %2790 = vrcp.f32 %v980_v4  ;;  %v992_v9 = vand.u32 2147483648, %v980_v4  ;;  %v990_v59 = vand.u32 2147483647, %v980_v4  ;;  %vm986_vm8 = vweird.f32 %v980_v4 }
 0x532   :  { %2792 = vtanh.f32 %v954_v3  ;;  %v973_v15 = vor.u32 1.1754944e-38, %v972_v11  ;;  %vm971_vm11 = vcmp.eq.f32.partialorder %v970_v49, 8.507059e+37 }
 0x533   :  { %v993_v43 = vor.u32 1.1754944e-38, %v992_v9  ;;  %vm991_vm12 = vcmp.eq.f32.partialorder %v990_v59, 8.507059e+37 }
 0x536   :  { %v2789_v32 = vpop.eup %2788 }
 0x537   :  { %v2791_v55 = vpop.eup %2790  ;;  %v962_v10 = vmul.f32 %v2789_v32, %v960_v23  ;;  %vm967_vm5 = vweird.f32 %v2789_v32 }
 0x538   :  { %v982_v28 = vmul.f32 %v2791_v55, %v980_v4  ;;  %vm987_vm6 = vweird.f32 %v2791_v55  ;;  %vm968_vm9 = vmor %vm966_vm7, %vm967_vm5  ;;  %v2793_v3 = vpop.eup %2792 }
 0x539   :  { %v963_v52 = vsub.f32 1.0, %v962_v10  ;;  %vm988_vm10 = vmor %vm986_vm8, %vm987_vm6 }
 0x53a   :  { %v983_v40 = vsub.f32 1.0, %v982_v28 }
 0x53b   :  { %v964_v47 = vmul.f32 %v2789_v32, %v963_v52 }
 0x53c   :  { %v984_v12 = vmul.f32 %v2791_v55, %v983_v40 }
 0x53d   :  { %v965_v56 = vadd.f32 %v2789_v32, %v964_v47 }
 0x53e   :  { %v985_v39 = vadd.f32 %v2791_v55, %v984_v12 }
 0x53f   :  { %v969_v16 = vsel %vm968_vm9, %v2789_v32, %v965_v56 }
 0x540   :  { %v989_v10 = vsel %vm988_vm10, %v2791_v55, %v985_v39  ;;  %v974_v28 = vsel %vm971_vm11, %v973_v15, %v969_v16 }
 0x541   :  { %v994_v52 = vsel %vm991_vm12, %v993_v43, %v989_v10  ;;  %v976_v40 = vsel %vm3219_vm3, %v2793_v3, %v974_v28 }
 0x542   :  { %1001 = vrot.lane.b32.xlu0 %v994_v52, %s3060_s27  ;;  %996 = vrot.lane.b32.xlu2 %v976_v40, %s3060_s27  ;;  %v999_v11 = vmul.f32 %v994_v52, %v3433_v62 }
 0x59c   :  { %v997_v23 = vpop.permute.xlu2 %996 }
 0x59d   :  { %v998_v4 = vmul.f32 %v997_v23, %v976_v40 }
 0x59f   :  { %v3481_v47 = vadd.f32 %v999_v11, %v998_v4 }
 0x5a1   :  { %2794 = vtanh.f32 %v3481_v47 }
 0x5a7   :  { %v2795_v32 = vpop.eup %2794 }
 0x5b4   :  { %v1002_v55 = vpop.permute.xlu0 %1001 }
 0x5b5   :  { %v1004_v9 = vmul.f32 %v2795_v32, %v1002_v55 }
 0x5b7   :  { %v1005_v49 = vpack.c.bf16 %v1004_v9, %v1004_v9 }
 0x5b9   :  { %1014 = vmatmul.bf16.vlgmr.msrb.gmra.mxu2 %v1005_v49  ;;  %1027 = vmatmul.bf16.vlgmr.msrb.gmra.mxu3 %v1005_v49 }
 0x5ba   :  { %1044 = vmatmul.bf16.vlgmr.msrb.gmra.mxu0 %v1005_v49  ;;  %1057 = vmatmul.bf16.vlgmr.msrb.gmra.mxu1 %v1005_v49 }
 0x5bb   :  { %1252 = vmatpush.bf16.msrb.mxu0 %v3107_v7  ;;  %1265 = vmatpush.bf16.msrb.mxu1 %v3109_v8  ;;  %v241_v7 = vadd.f32 %v3316_v27, %v3189_v41  ;;  %v270_v8 = vadd.f32 %v3314_v18, %v3191_v42 }
 0x5bc   :  { %1222 = vmatpush.bf16.msrb.mxu2 %v3195_v0  ;;  %1235 = vmatpush.bf16.msrb.mxu3 %v3197_v1 }
 0x5bf   :  { %1253 = vmatpush.bf16.msrb.mxu0 %v3113_v17  ;;  %1266 = vmatpush.bf16.msrb.mxu1 %v3115_v21 }
 0x5c0   :  { %1223 = vmatpush.bf16.msrb.mxu2 %v3201_v13  ;;  %1236 = vmatpush.bf16.msrb.mxu3 %v3203_v14 }
 0x5c3   :  { %1254 = vmatpush.bf16.msrb.mxu0 %v3119_v33  ;;  %1267 = vmatpush.bf16.msrb.mxu1 %v3121_v34 }
 0x5c4   :  { %1224 = vmatpush.bf16.msrb.mxu2 %v3207_v25  ;;  %1237 = vmatpush.bf16.msrb.mxu3 %v3209_v26 }
 0x5c7   :  { %1255 = vmatpush.bf16.msrb.mxu0 %v3125_v45  ;;  %1268 = vmatpush.bf16.msrb.mxu1 %v3127_v46 }
 0x5c8   :  { %1225 = vmatpush.bf16.msrb.mxu2 %v3213_v37  ;;  %1238 = vmatpush.bf16.msrb.mxu3 %v3215_v38 }
 0x5cb   :  { %1256 = vmatpush.bf16.msrb.mxu0 %v3131_v57  ;;  %1269 = vmatpush.bf16.msrb.mxu1 %v3133_v58 }
 0x5cc   :  { %1226 = vmatpush.bf16.msrb.mxu2 %v3227_v19  ;;  %1239 = vmatpush.bf16.msrb.mxu3 %v3229_v24 }
 0x5cf   :  { %1257 = vmatpush.bf16.msrb.mxu0 %v3137_v5  ;;  %1270 = vmatpush.bf16.msrb.mxu1 %v3139_v6 }
 0x5d0   :  { %1227 = vmatpush.bf16.msrb.mxu2 %v3233_v29  ;;  %1240 = vmatpush.bf16.msrb.mxu3 %v3235_v31 }
 0x5d3   :  { %1258 = vmatpush.bf16.msrb.mxu0 %v3143_v20  ;;  %1271 = vmatpush.bf16.msrb.mxu1 %v3145_v22 }
 0x5d4   :  { %1228 = vmatpush.bf16.msrb.mxu2 %v3239_v44  ;;  %1241 = vmatpush.bf16.msrb.mxu3 %v3241_v48 }
 0x5d7   :  { %1259 = vmatpush.bf16.msrb.mxu0 %v3149_v35  ;;  %1272 = vmatpush.bf16.msrb.mxu1 %v3151_v36 }
 0x5d8   :  { %1229 = vmatpush.bf16.msrb.mxu2 %v3245_v53  ;;  %1242 = vmatpush.bf16.msrb.mxu3 %v3247_v51 }
 0x637   :  { %v1045_v17 = vpop.f32.mrf.mxu0  ;;  %v1058_v21 = vpop.f32.mrf.mxu1 }
 0x638   :  { %v1062_v33 = vadd.f32 %v1045_v17, %v241_v7  ;;  %v1063_v34 = vadd.f32 %v1058_v21, %v270_v8 }
 0x63a   :  { %v2492_v45 = vmul.f32 -1.442695, %v1062_v33  ;;  %v2493_v46 = vmul.f32 -1.442695, %v1063_v34 }
 0x63c   :  { %2796 = vpow2.f32 %v2492_v45  ;;  %v3520_v57 = vpop.f32.mrf.mxu2  ;;  %v3522_v58 = vpop.f32.mrf.mxu3 }
 0x63d   :  { %2798 = vpow2.f32 %v2493_v46 }
 0x63f   :  { %v1047_v5 = vpop.f32.mrf.mxu0  ;;  %v1060_v6 = vpop.f32.mrf.mxu1 }
 0x642   :  { %v2797_v20 = vpop.eup %2796 }
 0x643   :  { %v2799_v22 = vpop.eup %2798  ;;  %v1068_v35 = vadd.f32 1.0, %v2797_v20 }
 0x644   :  { %v1088_v36 = vadd.f32 1.0, %v2799_v22  ;;  %v1017_v27 = vpop.f32.mrf.mxu2  ;;  %v1030_v18 = vpop.f32.mrf.mxu3 }
 0x645   :  { %2800 = vrcp.f32 %v1068_v35  ;;  %v1080_v43 = vand.u32 2147483648, %v1068_v35  ;;  %v1078_v10 = vand.u32 2147483647, %v1068_v35  ;;  %vm1074_vm15 = vweird.f32 %v1068_v35 }
 0x646   :  { %2802 = vrcp.f32 %v1088_v36  ;;  %v1100_v16 = vand.u32 2147483648, %v1088_v36  ;;  %v1098_v52 = vand.u32 2147483647, %v1088_v36  ;;  %vm1094_vm0 = vweird.f32 %v1088_v36 }
 0x647   :  { %2804 = vtanh.f32 %v1062_v33  ;;  %v1081_v4 = vor.u32 1.1754944e-38, %v1080_v43  ;;  %vm1079_vm4 = vcmp.eq.f32.partialorder %v1078_v10, 8.507059e+37 }
 0x648   :  { %v1101_v11 = vor.u32 1.1754944e-38, %v1100_v16  ;;  %vm1099_vm5 = vcmp.eq.f32.partialorder %v1098_v52, 8.507059e+37 }
 0x64b   :  { %v2801_v62 = vpop.eup %2800 }
 0x64c   :  { %v2803_v12 = vpop.eup %2802  ;;  %v1070_v59 = vmul.f32 %v2801_v62, %v1068_v35  ;;  %vm1075_vm13 = vweird.f32 %v2801_v62 }
 0x64d   :  { %v1090_v56 = vmul.f32 %v2803_v12, %v1088_v36  ;;  %vm1095_vm14 = vweird.f32 %v2803_v12  ;;  %vm1076_vm1 = vmor %vm1074_vm15, %vm1075_vm13  ;;  %v2805_v55 = vpop.eup %2804 }
 0x64e   :  { %v1071_v39 = vsub.f32 1.0, %v1070_v59  ;;  %vm1096_vm2 = vmor %vm1094_vm0, %vm1095_vm14 }
 0x64f   :  { %v1091_v15 = vsub.f32 1.0, %v1090_v56 }
 0x650   :  { %v1072_v3 = vmul.f32 %v2801_v62, %v1071_v39 }
 0x651   :  { %v1092_v28 = vmul.f32 %v2803_v12, %v1091_v15 }
 0x652   :  { %v1073_v40 = vadd.f32 %v2801_v62, %v1072_v3 }
 0x653   :  { %v1093_v23 = vadd.f32 %v2803_v12, %v1092_v28 }
 0x654   :  { %v1077_v32 = vsel %vm1076_vm1, %v2801_v62, %v1073_v40 }
 0x655   :  { %v1097_v9 = vsel %vm1096_vm2, %v2803_v12, %v1093_v23  ;;  %v1082_v49 = vsel %vm1079_vm4, %v1081_v4, %v1077_v32 }
 0x656   :  { %v1102_v7 = vsel %vm1099_vm5, %v1101_v11, %v1097_v9  ;;  %v1084_v8 = vsel %vm3219_vm3, %v2805_v55, %v1082_v49  ;;  %v2556_v55 = vld [vmem:[#allocation7 + $0x1f0] sm:$0xf]  ;;  %v2709_v9 = vld [vmem:[#allocation7 + $0x1f4] sm:$0xf0]  ;;  %v2708_v49 = vld [vmem:[#allocation7 + $0x1f4] sm:$0xf] }
 0x657   :  { %1109 = vrot.lane.b32.xlu2 %v1102_v7, %s3060_s27  ;;  %1104 = vrot.lane.b32.xlu1 %v1084_v8, %s3060_s27  ;;  %v1107_v21 = vmul.f32 %v1102_v7, %v3481_v47  ;;  %v3566_v7 = vor.u32 %v2709_v9, %v2556_v55 }
 0x6b1   :  { %v1110_v46 = vpop.permute.xlu2 %1109 }
 0x6c9   :  { %v1105_v17 = vpop.permute.xlu1 %1104 }
 0x6ca   :  { %v1106_v33 = vmul.f32 %v1105_v17, %v1084_v8  ;;  %v2558_v8 = vld [vmem:[#allocation7 + $0x1f8] sm:$0xf0] }
 0x6cb   :  { %v3568_v17 = vor.u32 %v2708_v49, %v2558_v8 }
 0x6cc   :  { %v3529_v34 = vadd.f32 %v1107_v21, %v1106_v33  ;;  %v2548_v21 = vld [vmem:[#allocation7 + $0x1e0] sm:$0xf]  ;;  %v2707_v33 = vld [vmem:[#allocation7 + $0x1e4] sm:$0xf0] }
 0x6ce   :  { %2806 = vtanh.f32 %v3529_v34 }
 0x6d4   :  { %v2807_v45 = vpop.eup %2806 }
 0x6d5   :  { %v1112_v5 = vmul.f32 %v2807_v45, %v1110_v46  ;;  %v2706_v45 = vld [vmem:[#allocation7 + $0x1e4] sm:$0xf]  ;;  %v3572_v46 = vor.u32 %v2707_v33, %v2548_v21 }
 0x6d7   :  { %v1113_v6 = vpack.c.bf16 %v1112_v5, %v1112_v5  ;;  %v2550_v5 = vld [vmem:[#allocation7 + $0x1e8] sm:$0xf0] }
 0x6d9   :  { %1122 = vmatmul.bf16.vlgmr.msra.gmra.mxu2 %v1113_v6  ;;  %1135 = vmatmul.bf16.vlgmr.msra.gmra.mxu3 %v1113_v6 }
 0x6da   :  { %1152 = vmatmul.bf16.vlgmr.msra.gmra.mxu0 %v1113_v6  ;;  %1165 = vmatmul.bf16.vlgmr.msra.gmra.mxu1 %v1113_v6  ;;  %v3574_v6 = vor.u32 %v2706_v45, %v2550_v5  ;;  %v3856_v5 = vld [vmem:[#allocation18_spill] sm:$0xff] }
 0x6db   :  { %1330 = vmatpush.bf16.msra.mxu2 %v3195_v0  ;;  %1343 = vmatpush.bf16.msra.mxu3 %v3197_v1  ;;  %v244_v0 = vadd.f32 %v3320_v30, %v3189_v41  ;;  %v3853_v1 = vld [vmem:[#allocation17_spill] sm:$0xff] }
 0x6dc   :  { %1457 = vmatpush.bf16.msra.mxu0 %v3566_v7  ;;  %1470 = vmatpush.bf16.msra.mxu1 %v3568_v17 }
 0x6df   :  { %1331 = vmatpush.bf16.msra.mxu2 %v3201_v13  ;;  %1344 = vmatpush.bf16.msra.mxu3 %v3203_v14  ;;  %v273_v13 = vadd.f32 %v3853_v1, %v3191_v42  ;;  %v2705_v1 = vld [vmem:[#allocation7 + $0x1d4] sm:$0xf0] }
 0x6e0   :  { %1458 = vmatpush.bf16.msra.mxu0 %v3572_v46  ;;  %1471 = vmatpush.bf16.msra.mxu1 %v3574_v6 }
 0x6e3   :  { %1332 = vmatpush.bf16.msra.mxu2 %v3207_v25  ;;  %1345 = vmatpush.bf16.msra.mxu3 %v3209_v26 }
 0x6e7   :  { %1333 = vmatpush.bf16.msra.mxu2 %v3213_v37  ;;  %1346 = vmatpush.bf16.msra.mxu3 %v3215_v38 }
 0x6eb   :  { %1334 = vmatpush.bf16.msra.mxu2 %v3227_v19  ;;  %1347 = vmatpush.bf16.msra.mxu3 %v3229_v24 }
 0x6ef   :  { %1335 = vmatpush.bf16.msra.mxu2 %v3233_v29  ;;  %1348 = vmatpush.bf16.msra.mxu3 %v3235_v31 }
 0x6f3   :  { %1336 = vmatpush.bf16.msra.mxu2 %v3239_v44  ;;  %1349 = vmatpush.bf16.msra.mxu3 %v3241_v48 }
 0x6f7   :  { %1337 = vmatpush.bf16.msra.mxu2 %v3245_v53  ;;  %1350 = vmatpush.bf16.msra.mxu3 %v3247_v51 }
 0x757   :  { %v1153_v14 = vpop.f32.mrf.mxu0  ;;  %v1166_v25 = vpop.f32.mrf.mxu1 }
 0x758   :  { %v1170_v26 = vadd.f32 %v1153_v14, %v244_v0  ;;  %v1171_v37 = vadd.f32 %v1166_v25, %v273_v13  ;;  %v2540_v0 = vld [vmem:[#allocation7 + $0x1d0] sm:$0xf]  ;;  %v2704_v13 = vld [vmem:[#allocation7 + $0x1d4] sm:$0xf]  ;;  %v2542_v25 = vld [vmem:[#allocation7 + $0x1d8] sm:$0xf0] }
 0x759   :  { %v3577_v14 = vor.u32 %v2705_v1, %v2540_v0  ;;  %v275_v0 = vadd.f32 %v3856_v5, %v3191_v42 }
 0x75a   :  { %v2494_v38 = vmul.f32 -1.442695, %v1170_v26  ;;  %v2495_v19 = vmul.f32 -1.442695, %v1171_v37  ;;  %v2532_v37 = vld [vmem:[#allocation7 + $0x1c0] sm:$0xf] }
 0x75b   :  { %1459 = vmatpush.bf16.msra.mxu0 %v3577_v14 }
 0x75c   :  { %2808 = vpow2.f32 %v2494_v38  ;;  %v3552_v24 = vpop.f32.mrf.mxu2  ;;  %v3554_v29 = vpop.f32.mrf.mxu3  ;;  %v2703_v38 = vld [vmem:[#allocation7 + $0x1c4] sm:$0xf0] }
 0x75d   :  { %2810 = vpow2.f32 %v2495_v19  ;;  %v2702_v19 = vld [vmem:[#allocation7 + $0x1c4] sm:$0xf] }
 0x75f   :  { %v1155_v31 = vpop.f32.mrf.mxu0  ;;  %v1168_v44 = vpop.f32.mrf.mxu1 }
 0x760   :  { %v2534_v31 = vld [vmem:[#allocation7 + $0x1c8] sm:$0xf0]  ;;  %v3583_v44 = vor.u32 %v2703_v38, %v2532_v37 }
 0x762   :  { %v2809_v48 = vpop.eup %2808  ;;  %1460 = vmatpush.bf16.msra.mxu0 %v3583_v44 }
 0x763   :  { %v2811_v53 = vpop.eup %2810  ;;  %v1176_v51 = vadd.f32 1.0, %v2809_v48  ;;  %v3586_v48 = vor.u32 %v2702_v19, %v2534_v31 }
 0x764   :  { %v1196_v30 = vadd.f32 1.0, %v2811_v53  ;;  %v1125_v47 = vpop.f32.mrf.mxu2  ;;  %v1138_v20 = vpop.f32.mrf.mxu3  ;;  %v2524_v53 = vld [vmem:[#allocation7 + $0x1b0] sm:$0xf] }
 0x765   :  { %2812 = vrcp.f32 %v1176_v51  ;;  %v1188_v12 = vand.u32 2147483648, %v1176_v51  ;;  %v1186_v39 = vand.u32 2147483647, %v1176_v51  ;;  %vm1182_vm8 = vweird.f32 %v1176_v51  ;;  %v2526_v20 = vld [vmem:[#allocation7 + $0x1b8] sm:$0xf0] }
 0x766   :  { %2814 = vrcp.f32 %v1196_v30  ;;  %v1208_v59 = vand.u32 2147483648, %v1196_v30  ;;  %v1206_v43 = vand.u32 2147483647, %v1196_v30  ;;  %vm1202_vm9 = vweird.f32 %v1196_v30 }
 0x767   :  { %2816 = vtanh.f32 %v1170_v26  ;;  %v1189_v10 = vor.u32 1.1754944e-38, %v1188_v12  ;;  %vm1187_vm12 = vcmp.eq.f32.partialorder %v1186_v39, 8.507059e+37  ;;  %v3580_v26 = vor.u32 %v2704_v13, %v2542_v25  ;;  %v2696_v39 = vld [vmem:[#allocation7 + $0x194] sm:$0xf] }
 0x768   :  { %v1209_v28 = vor.u32 1.1754944e-38, %v1208_v59  ;;  %vm1207_vm13 = vcmp.eq.f32.partialorder %v1206_v43, 8.507059e+37  ;;  %v2508_v59 = vld [vmem:[#allocation7 + $0x190] sm:$0xf] }
 0x769   :  { %1472 = vmatpush.bf16.msra.mxu1 %v3580_v26 }
 0x76b   :  { %v2813_v22 = vpop.eup %2812 }
 0x76c   :  { %v2815_v35 = vpop.eup %2814  ;;  %v1178_v36 = vmul.f32 %v2813_v22, %v1176_v51  ;;  %vm1183_vm6 = vweird.f32 %v2813_v22  ;;  %v2701_v51 = vld [vmem:[#allocation7 + $0x1b4] sm:$0xf0] }
 0x76d   :  { %v1198_v27 = vmul.f32 %v2815_v35, %v1196_v30  ;;  %vm1203_vm7 = vweird.f32 %v2815_v35  ;;  %vm1184_vm10 = vmor %vm1182_vm8, %vm1183_vm6  ;;  %v2817_v40 = vpop.eup %2816  ;;  %1473 = vmatpush.bf16.msra.mxu1 %v3586_v48  ;;  %v2700_v30 = vld [vmem:[#allocation7 + $0x1b4] sm:$0xf]  ;;  %v3590_v47 = vor.u32 %v2701_v51, %v2524_v53  ;;  %v328_v51 = vld [vmem:[#allocation10 + $0x1] ss:$8 sm:$0x3] }
 0x76e   :  { %v1179_v18 = vsub.f32 1.0, %v1178_v36  ;;  %vm1204_vm11 = vmor %vm1202_vm9, %vm1203_vm7  ;;  %v2699_v36 = vld [vmem:[#allocation7 + $0x1a4] sm:$0xf0] }
 0x76f   :  { %v1199_v62 = vsub.f32 1.0, %v1198_v27  ;;  %v2698_v27 = vld [vmem:[#allocation7 + $0x1a4] sm:$0xf]  ;;  %1461 = vmatpush.bf16.msra.mxu0 %v3590_v47 }
 0x770   :  { %v1180_v56 = vmul.f32 %v2813_v22, %v1179_v18 }
 0x771   :  { %v1200_v15 = vmul.f32 %v2815_v35, %v1199_v62  ;;  %v2518_v62 = vld [vmem:[#allocation7 + $0x1a8] sm:$0xf0] }
 0x772   :  { %v1181_v16 = vadd.f32 %v2813_v22, %v1180_v56  ;;  %v3598_v12 = vor.u32 %v2698_v27, %v2518_v62  ;;  %v2697_v56 = vld [vmem:[#allocation7 + $0x194] sm:$0xf0] }
 0x773   :  { %v1201_v3 = vadd.f32 %v2815_v35, %v1200_v15  ;;  %v2510_v15 = vld [vmem:[#allocation7 + $0x198] sm:$0xf0]  ;;  %v3601_v43 = vor.u32 %v2697_v56, %v2508_v59 }
 0x774   :  { %v1185_v52 = vsel %vm1184_vm10, %v2813_v22, %v1181_v16  ;;  %v3592_v22 = vor.u32 %v2700_v30, %v2526_v20  ;;  %v3604_v16 = vor.u32 %v2696_v39, %v2510_v15  ;;  %v3857_v39 = vld [vmem:[#allocation20_spill] sm:$0xff] }
 0x775   :  { %v1205_v23 = vsel %vm1204_vm11, %v2815_v35, %v1201_v3  ;;  %v1190_v4 = vsel %vm1187_vm12, %v1189_v10, %v1185_v52  ;;  %v2516_v35 = vld [vmem:[#allocation7 + $0x1a0] sm:$0xf]  ;;  %v2695_v10 = vld [vmem:[#allocation7 + $0x184] sm:$0xf0]  ;;  %v2502_v52 = vld [vmem:[#allocation7 + $0x188] sm:$0xf0] }
 0x776   :  { %v3556_v11 = vsel %vm1207_vm13, %v1209_v28, %v1205_v23  ;;  %v3560_v32 = vsel %vm3219_vm3, %v2817_v40, %v1190_v4  ;;  %v3595_v18 = vor.u32 %v2699_v36, %v2516_v35  ;;  %1474 = vmatpush.bf16.msra.mxu1 %v3592_v22  ;;  %v2500_v3 = vld [vmem:[#allocation7 + $0x180] sm:$0xf]  ;;  %v2694_v28 = vld [vmem:[#allocation7 + $0x184] sm:$0xf]  ;;  %v3680_v36 = vperm.slane %v328_v51, 1 }
 0x777   :  { %1217 = vrot.lane.b32.xlu1 %v3556_v11, %s3060_s27  ;;  %1212 = vrot.lane.b32.xlu0 %v3560_v32, %s3060_s27  ;;  %v3607_v40 = vor.u32 %v2695_v10, %v2500_v3  ;;  %v3610_v23 = vor.u32 %v2694_v28, %v2502_v52  ;;  %v1215_v55 = vmul.f32 %v3556_v11, %v3529_v34  ;;  %v3854_v34 = vmov 0   ;;  %v3855_v11 = vld [vmem:[#allocation19_spill] sm:$0xff]  ;;  %v3858_v3 = vld [vmem:[#allocation21_spill] sm:$0xff] }
 0x778   :  { %1462 = vmatpush.bf16.msra.mxu0 %v3595_v18  ;;  %v597_v10 = vadd.f32 %v3858_v3, %v3680_v36 }
 0x77a   :  { %1475 = vmatpush.bf16.msra.mxu1 %v3598_v12 }
 0x77c   :  { %1463 = vmatpush.bf16.msra.mxu0 %v3601_v43 }
 0x77e   :  { %1476 = vmatpush.bf16.msra.mxu1 %v3604_v16 }
 0x780   :  { %1464 = vmatpush.bf16.msra.mxu0 %v3607_v40 }
 0x782   :  { %1477 = vmatpush.bf16.msra.mxu1 %v3610_v23 }
 0x7e9   :  { %v1213_v4 = vpop.permute.xlu0 %1212  ;;  %v1218_v21 = vpop.permute.xlu1 %1217 }
 0x7ea   :  { %v1214_v9 = vmul.f32 %v1213_v4, %v3560_v32  ;;  %v246_v32 = vadd.f32 %v3855_v11, %v3189_v41  ;;  %v3678_v41 = vperm.slane %v328_v51, 0 }
 0x7ec   :  { %v3617_v49 = vadd.f32 %v1215_v55, %v1214_v9  ;;  %v584_v15 = vadd.f32 %v3857_v39, %v3678_v41 }
 0x7ee   :  { %2818 = vtanh.f32 %v3617_v49 }
 0x7f4   :  { %v2819_v8 = vpop.eup %2818 }
 0x7f5   :  { %v1220_v33 = vmul.f32 %v2819_v8, %v1218_v21 }
 0x7f7   :  { %v1221_v45 = vpack.c.bf16 %v1220_v33, %v1220_v33 }
 0x7f9   :  { %1230 = vmatmul.bf16.vlgmr.msrb.gmra.mxu2 %v1221_v45  ;;  %1243 = vmatmul.bf16.vlgmr.msrb.gmra.mxu3 %v1221_v45 }
 0x7fa   :  { %1260 = vmatmul.bf16.vlgmr.msrb.gmra.mxu0 %v1221_v45  ;;  %1273 = vmatmul.bf16.vlgmr.msrb.gmra.mxu1 %v1221_v45 }
 0x7fb   :  { %1537 = vmatpush.bf16.msrb.mxu2 %v3566_v7  ;;  %1550 = vmatpush.bf16.msrb.mxu3 %v3568_v17 }
 0x7fc   :  { %1617 = vmatpush.bf16.msrb.mxu0 %v3566_v7  ;;  %1630 = vmatpush.bf16.msrb.mxu1 %v3568_v17 }
 0x7ff   :  { %1538 = vmatpush.bf16.msrb.mxu2 %v3572_v46  ;;  %1551 = vmatpush.bf16.msrb.mxu3 %v3574_v6 }
 0x800   :  { %1618 = vmatpush.bf16.msrb.mxu0 %v3572_v46  ;;  %1631 = vmatpush.bf16.msrb.mxu1 %v3574_v6 }
 0x803   :  { %1539 = vmatpush.bf16.msrb.mxu2 %v3577_v14  ;;  %1552 = vmatpush.bf16.msrb.mxu3 %v3580_v26 }
 0x804   :  { %1619 = vmatpush.bf16.msrb.mxu0 %v3577_v14  ;;  %1632 = vmatpush.bf16.msrb.mxu1 %v3580_v26 }
 0x807   :  { %1540 = vmatpush.bf16.msrb.mxu2 %v3583_v44  ;;  %1553 = vmatpush.bf16.msrb.mxu3 %v3586_v48 }
 0x808   :  { %1620 = vmatpush.bf16.msrb.mxu0 %v3583_v44  ;;  %1633 = vmatpush.bf16.msrb.mxu1 %v3586_v48 }
 0x80a   :  { %1465 = vmatmul.bf16.vlgmr.msra.gmra.mxu0 %v3854_v34  ;;  %1478 = vmatmul.bf16.vlgmr.msra.gmra.mxu1 %v3854_v34 }
 0x80b   :  { %1541 = vmatpush.bf16.msrb.mxu2 %v3590_v47  ;;  %1554 = vmatpush.bf16.msrb.mxu3 %v3592_v22 }
 0x80c   :  { %1621 = vmatpush.bf16.msrb.mxu0 %v3590_v47  ;;  %1634 = vmatpush.bf16.msrb.mxu1 %v3592_v22 }
 0x80f   :  { %1542 = vmatpush.bf16.msrb.mxu2 %v3595_v18  ;;  %1555 = vmatpush.bf16.msrb.mxu3 %v3598_v12 }
 0x810   :  { %1622 = vmatpush.bf16.msrb.mxu0 %v3595_v18  ;;  %1635 = vmatpush.bf16.msrb.mxu1 %v3598_v12 }
 0x813   :  { %1543 = vmatpush.bf16.msrb.mxu2 %v3601_v43  ;;  %1556 = vmatpush.bf16.msrb.mxu3 %v3604_v16 }
 0x814   :  { %1623 = vmatpush.bf16.msrb.mxu0 %v3601_v43  ;;  %1636 = vmatpush.bf16.msrb.mxu1 %v3604_v16 }
 0x817   :  { %1544 = vmatpush.bf16.msrb.mxu2 %v3607_v40  ;;  %1557 = vmatpush.bf16.msrb.mxu3 %v3610_v23 }
 0x818   :  { %1624 = vmatpush.bf16.msrb.mxu0 %v3607_v40  ;;  %1637 = vmatpush.bf16.msrb.mxu1 %v3610_v23 }
 0x81c   :  { %1777 = vmatpush.bf16.msra.mxu0 %v3566_v7  ;;  %1790 = vmatpush.bf16.msra.mxu1 %v3568_v17 }
 0x820   :  { %1778 = vmatpush.bf16.msra.mxu0 %v3572_v46  ;;  %1791 = vmatpush.bf16.msra.mxu1 %v3574_v6 }
 0x824   :  { %1779 = vmatpush.bf16.msra.mxu0 %v3577_v14  ;;  %1792 = vmatpush.bf16.msra.mxu1 %v3580_v26 }
 0x828   :  { %1780 = vmatpush.bf16.msra.mxu0 %v3583_v44  ;;  %1793 = vmatpush.bf16.msra.mxu1 %v3586_v48 }
 0x82c   :  { %1781 = vmatpush.bf16.msra.mxu0 %v3590_v47  ;;  %1794 = vmatpush.bf16.msra.mxu1 %v3592_v22 }
 0x830   :  { %1782 = vmatpush.bf16.msra.mxu0 %v3595_v18  ;;  %1795 = vmatpush.bf16.msra.mxu1 %v3598_v12 }
 0x834   :  { %1783 = vmatpush.bf16.msra.mxu0 %v3601_v43  ;;  %1796 = vmatpush.bf16.msra.mxu1 %v3604_v16 }
 0x838   :  { %1784 = vmatpush.bf16.msra.mxu0 %v3607_v40  ;;  %1797 = vmatpush.bf16.msra.mxu1 %v3610_v23 }
 0x877   :  { %v1261_v1 = vpop.f32.mrf.mxu0  ;;  %v1274_v13 = vpop.f32.mrf.mxu1 }
 0x878   :  { %v1278_v25 = vadd.f32 %v1261_v1, %v246_v32  ;;  %v1279_v37 = vadd.f32 %v1274_v13, %v275_v0 }
 0x87a   :  { %v2496_v38 = vmul.f32 -1.442695, %v1278_v25  ;;  %v2497_v19 = vmul.f32 -1.442695, %v1279_v37 }
 0x87c   :  { %2820 = vpow2.f32 %v2496_v38  ;;  %v3674_v31 = vpop.f32.mrf.mxu2  ;;  %v3676_v53 = vpop.f32.mrf.mxu3 }
 0x87d   :  { %2822 = vpow2.f32 %v2497_v19 }
 0x87f   :  { %v1263_v30 = vpop.f32.mrf.mxu0  ;;  %v1276_v20 = vpop.f32.mrf.mxu1 }
 0x882   :  { %v2821_v35 = vpop.eup %2820 }
 0x883   :  { %v2823_v42 = vpop.eup %2822  ;;  %v1284_v27 = vadd.f32 1.0, %v2821_v35 }
 0x884   :  { %v1304_v62 = vadd.f32 1.0, %v2823_v42  ;;  %v1233_v59 = vpop.f32.mrf.mxu2  ;;  %v1246_v56 = vpop.f32.mrf.mxu3 }
 0x885   :  { %2824 = vrcp.f32 %v1284_v27  ;;  %v1296_v0 = vand.u32 2147483648, %v1284_v27  ;;  %v1294_v38 = vand.u32 2147483647, %v1284_v27  ;;  %vm1290_vm0 = vweird.f32 %v1284_v27 }
 0x886   :  { %2826 = vrcp.f32 %v1304_v62  ;;  %v1316_v13 = vand.u32 2147483648, %v1304_v62  ;;  %v1314_v51 = vand.u32 2147483647, %v1304_v62  ;;  %vm1310_vm1 = vweird.f32 %v1304_v62 }
 0x887   :  { %v1466_v28 = vpop.f32.mrf.mxu0  ;;  %v1479_v52 = vpop.f32.mrf.mxu1  ;;  %vm1295_vm5 = vcmp.eq.f32.partialorder %v1294_v38, 8.507059e+37 }
 0x888   :  { %v1483_v4 = vadd.f32 %v1466_v28, %v584_v15  ;;  %v1484_v55 = vadd.f32 %v1479_v52, %v597_v10  ;;  %v1317_v39 = vor.u32 1.1754944e-38, %v1316_v13  ;;  %vm1315_vm6 = vcmp.eq.f32.partialorder %v1314_v51, 8.507059e+37 }
 0x88a   :  { %v2562_v9 = vmul.f32 -1.442695, %v1483_v4  ;;  %v2563_v8 = vmul.f32 -1.442695, %v1484_v55 }
 0x88b   :  { %v2825_v21 = vpop.eup %2824 }
 0x88c   :  { %v2827_v33 = vpop.eup %2826  ;;  %2828 = vpow2.f32 %v2562_v9  ;;  %v1286_v45 = vmul.f32 %v2825_v21, %v1284_v27  ;;  %vm1291_vm14 = vweird.f32 %v2825_v21 }
 0x88d   :  { %2830 = vpow2.f32 %v2563_v8  ;;  %v1306_v34 = vmul.f32 %v2827_v33, %v1304_v62  ;;  %vm1311_vm15 = vweird.f32 %v2827_v33  ;;  %vm1292_vm2 = vmor %vm1290_vm0, %vm1291_vm14 }
 0x88e   :  { %v1287_v11 = vsub.f32 1.0, %v1286_v45  ;;  %2832 = vtanh.f32 %v1278_v25  ;;  %v1297_v25 = vor.u32 1.1754944e-38, %v1296_v0  ;;  %vm1312_vm4 = vmor %vm1310_vm1, %vm1311_vm15 }
 0x88f   :  { %v1468_v32 = vpop.f32.mrf.mxu0  ;;  %v1307_v5 = vsub.f32 1.0, %v1306_v34  ;;  %v1481_v1 = vpop.f32.mrf.mxu1 }
 0x890   :  { %v1288_v37 = vmul.f32 %v2825_v21, %v1287_v11 }
 0x891   :  { %v1308_v19 = vmul.f32 %v2827_v33, %v1307_v5 }
 0x892   :  { %v2829_v30 = vpop.eup %2828  ;;  %v1289_v20 = vadd.f32 %v2825_v21, %v1288_v37 }
 0x893   :  { %v2831_v35 = vpop.eup %2830  ;;  %v1489_v42 = vadd.f32 1.0, %v2829_v30  ;;  %v1309_v59 = vadd.f32 %v2827_v33, %v1308_v19 }
 0x894   :  { %v1509_v56 = vadd.f32 1.0, %v2831_v35  ;;  %v1293_v15 = vsel %vm1292_vm2, %v2825_v21, %v1289_v20  ;;  %v2833_v3 = vpop.eup %2832 }
 0x895   :  { %2834 = vrcp.f32 %v1489_v42  ;;  %v1313_v10 = vsel %vm1312_vm4, %v2827_v33, %v1309_v59  ;;  %v1298_v28 = vsel %vm1295_vm5, %v1297_v25, %v1293_v15  ;;  %v1501_v34 = vand.u32 2147483648, %v1489_v42 }
 0x896   :  { %2836 = vrcp.f32 %v1509_v56  ;;  %v1318_v52 = vsel %vm1315_vm6, %v1317_v39, %v1313_v10  ;;  %v1300_v27 = vsel %vm3219_vm3, %v2833_v3, %v1298_v28  ;;  %v1521_v33 = vand.u32 2147483648, %v1509_v56 }
 0x897   :  { %1325 = vrot.lane.b32.xlu0 %v1318_v52, %s3060_s27  ;;  %1320 = vrot.lane.b32.xlu2 %v1300_v27, %s3060_s27  ;;  %2838 = vtanh.f32 %v1483_v4  ;;  %v1499_v32 = vand.u32 2147483647, %v1489_v42  ;;  %v1519_v0 = vand.u32 2147483647, %v1509_v56  ;;  %vm1495_vm9 = vweird.f32 %v1489_v42 }
 0x898   :  { %vm1515_vm10 = vweird.f32 %v1509_v56  ;;  %v1502_v37 = vor.u32 1.1754944e-38, %v1501_v34  ;;  %v1522_v38 = vor.u32 1.1754944e-38, %v1521_v33  ;;  %v1323_v25 = vmul.f32 %v1318_v52, %v3617_v49 }
 0x899   :  { %vm1500_vm13 = vcmp.eq.f32.partialorder %v1499_v32, 8.507059e+37  ;;  %vm1520_vm14 = vcmp.eq.f32.partialorder %v1519_v0, 8.507059e+37  ;;  %v705_v32 = vadd.f32 %v3378_v63, %v3680_v36 }
 0x89b   :  { %v2835_v62 = vpop.eup %2834 }
 0x89c   :  { %v2837_v55 = vpop.eup %2836  ;;  %v1491_v9 = vmul.f32 %v2835_v62, %v1489_v42  ;;  %vm1496_vm7 = vweird.f32 %v2835_v62 }
 0x89d   :  { %v1511_v8 = vmul.f32 %v2837_v55, %v1509_v56  ;;  %vm1516_vm8 = vweird.f32 %v2837_v55  ;;  %vm1497_vm11 = vmor %vm1495_vm9, %vm1496_vm7  ;;  %v2839_v4 = vpop.eup %2838 }
 0x89e   :  { %v1492_v21 = vsub.f32 1.0, %v1491_v9  ;;  %vm1517_vm12 = vmor %vm1515_vm10, %vm1516_vm8 }
 0x89f   :  { %v1512_v45 = vsub.f32 1.0, %v1511_v8 }
 0x8a0   :  { %v1493_v11 = vmul.f32 %v2835_v62, %v1492_v21 }
 0x8a1   :  { %v1513_v5 = vmul.f32 %v2837_v55, %v1512_v45 }
 0x8a2   :  { %v1494_v1 = vadd.f32 %v2835_v62, %v1493_v11  ;;  %v692_v11 = vadd.f32 %v3376_v50, %v3678_v41 }
 0x8a3   :  { %v1514_v13 = vadd.f32 %v2837_v55, %v1513_v5 }
 0x8a4   :  { %v1498_v19 = vsel %vm1497_vm11, %v2835_v62, %v1494_v1 }
 0x8a5   :  { %v1518_v51 = vsel %vm1517_vm12, %v2837_v55, %v1514_v13  ;;  %v1503_v30 = vsel %vm1500_vm13, %v1502_v37, %v1498_v19 }
 0x8a6   :  { %v1523_v20 = vsel %vm1520_vm14, %v1522_v38, %v1518_v51  ;;  %v1505_v35 = vsel %vm3219_vm3, %v2839_v4, %v1503_v30 }
 0x8a7   :  { %1530 = vrot.lane.b32.xlu2 %v1523_v20, %s3060_s27  ;;  %1525 = vrot.lane.b32.xlu1 %v1505_v35, %s3060_s27  ;;  %v1528_v28 = vmul.f32 0.0, %v1523_v20 }
 0x8f1   :  { %v1321_v42 = vpop.permute.xlu2 %1320 }
 0x8f2   :  { %v1322_v59 = vmul.f32 %v1321_v42, %v1300_v27 }
 0x8f4   :  { %v1324_v56 = vadd.f32 %v1323_v25, %v1322_v59 }
 0x8f6   :  { %2840 = vtanh.f32 %v1324_v56 }
 0x8fc   :  { %v2841_v39 = vpop.eup %2840 }
 0x901   :  { %v1531_v55 = vpop.permute.xlu2 %1530 }
 0x909   :  { %v1326_v15 = vpop.permute.xlu0 %1325 }
 0x90a   :  { %v1328_v3 = vmul.f32 %v2841_v39, %v1326_v15 }
 0x90c   :  { %v1329_v10 = vpack.c.bf16 %v1328_v3, %v1328_v3 }
 0x90e   :  { %1338 = vmatmul.bf16.vlgmr.msra.gmra.mxu2 %v1329_v10  ;;  %1351 = vmatmul.bf16.vlgmr.msra.gmra.mxu3 %v1329_v10 }
 0x90f   :  { %1697 = vmatpush.bf16.msra.mxu2 %v3566_v7  ;;  %1710 = vmatpush.bf16.msra.mxu3 %v3568_v17 }
 0x913   :  { %1698 = vmatpush.bf16.msra.mxu2 %v3572_v46  ;;  %1711 = vmatpush.bf16.msra.mxu3 %v3574_v6 }
 0x917   :  { %1699 = vmatpush.bf16.msra.mxu2 %v3577_v14  ;;  %1712 = vmatpush.bf16.msra.mxu3 %v3580_v26 }
 0x919   :  { %v1526_v49 = vpop.permute.xlu1 %1525 }
 0x91a   :  { %v1527_v52 = vmul.f32 %v1526_v49, %v1505_v35 }
 0x91b   :  { %1700 = vmatpush.bf16.msra.mxu2 %v3583_v44  ;;  %1713 = vmatpush.bf16.msra.mxu3 %v3586_v48 }
 0x91c   :  { %v3703_v27 = vadd.f32 %v1528_v28, %v1527_v52 }
 0x91e   :  { %2842 = vtanh.f32 %v3703_v27 }
 0x91f   :  { %1701 = vmatpush.bf16.msra.mxu2 %v3590_v47  ;;  %1714 = vmatpush.bf16.msra.mxu3 %v3592_v22 }
 0x923   :  { %1702 = vmatpush.bf16.msra.mxu2 %v3595_v18  ;;  %1715 = vmatpush.bf16.msra.mxu3 %v3598_v12 }
 0x924   :  { %v2843_v62 = vpop.eup %2842 }
 0x925   :  { %v1533_v9 = vmul.f32 %v2843_v62, %v1531_v55 }
 0x927   :  { %v1536_v8 = vpack.c.bf16 %v1533_v9, %v1533_v9  ;;  %1703 = vmatpush.bf16.msra.mxu2 %v3601_v43  ;;  %1716 = vmatpush.bf16.msra.mxu3 %v3604_v16 }
 0x929   :  { %1545 = vmatmul.bf16.vlgmr.msrb.gmra.mxu2 %v1536_v8  ;;  %1558 = vmatmul.bf16.vlgmr.msrb.gmra.mxu3 %v1536_v8 }
 0x92b   :  { %1704 = vmatpush.bf16.msra.mxu2 %v3607_v40  ;;  %1717 = vmatpush.bf16.msra.mxu3 %v3610_v23 }
 0x92f   :  { %1857 = vmatpush.bf16.msrb.mxu2 %v3566_v7  ;;  %1870 = vmatpush.bf16.msrb.mxu3 %v3568_v17 }
 0x933   :  { %1858 = vmatpush.bf16.msrb.mxu2 %v3572_v46  ;;  %1871 = vmatpush.bf16.msrb.mxu3 %v3574_v6 }
 0x937   :  { %1859 = vmatpush.bf16.msrb.mxu2 %v3577_v14  ;;  %1872 = vmatpush.bf16.msrb.mxu3 %v3580_v26 }
 0x93b   :  { %1860 = vmatpush.bf16.msrb.mxu2 %v3583_v44  ;;  %1873 = vmatpush.bf16.msrb.mxu3 %v3586_v48 }
 0x93f   :  { %1861 = vmatpush.bf16.msrb.mxu2 %v3590_v47  ;;  %1874 = vmatpush.bf16.msrb.mxu3 %v3592_v22 }
 0x943   :  { %1862 = vmatpush.bf16.msrb.mxu2 %v3595_v18  ;;  %1875 = vmatpush.bf16.msrb.mxu3 %v3598_v12 }
 0x947   :  { %1863 = vmatpush.bf16.msrb.mxu2 %v3601_v43  ;;  %1876 = vmatpush.bf16.msrb.mxu3 %v3604_v16 }
 0x94b   :  { %1864 = vmatpush.bf16.msrb.mxu2 %v3607_v40  ;;  %1877 = vmatpush.bf16.msrb.mxu3 %v3610_v23 }
 0x991   :  { %v3730_v21 = vpop.f32.mrf.mxu2  ;;  %v3732_v45 = vpop.f32.mrf.mxu3 }
 0x999   :  { %v1341_v34 = vpop.f32.mrf.mxu2  ;;  %v1354_v33 = vpop.f32.mrf.mxu3 }
 0x9ac   :  { %v1546_v5 = vpop.f32.mrf.mxu2  ;;  %v1559_v0 = vpop.f32.mrf.mxu3 }
 0x9ad   :  { %v1563_v1 = vadd.f32 %v1546_v5, %v692_v11  ;;  %v1564_v13 = vadd.f32 %v1559_v0, %v705_v32 }
 0x9af   :  { %v2564_v37 = vmul.f32 -1.442695, %v1563_v1  ;;  %v2565_v38 = vmul.f32 -1.442695, %v1564_v13 }
 0x9b1   :  { %2844 = vpow2.f32 %v2564_v37 }
 0x9b2   :  { %2846 = vpow2.f32 %v2565_v38 }
 0x9b4   :  { %v1548_v19 = vpop.f32.mrf.mxu2  ;;  %v1561_v4 = vpop.f32.mrf.mxu3 }
 0x9b7   :  { %v2845_v51 = vpop.eup %2844 }
 0x9b8   :  { %v2847_v30 = vpop.eup %2846  ;;  %v1569_v20 = vadd.f32 1.0, %v2845_v51 }
 0x9b9   :  { %v1589_v35 = vadd.f32 1.0, %v2847_v30  ;;  %v3859_v30 = vld [vmem:[#allocation22_spill] sm:$0xff] }
 0x9ba   :  { %2848 = vrcp.f32 %v1569_v20  ;;  %v1581_v39 = vand.u32 2147483648, %v1569_v20  ;;  %v1579_v10 = vand.u32 2147483647, %v1569_v20  ;;  %vm1575_vm1 = vweird.f32 %v1569_v20 }
 0x9bb   :  { %2850 = vrcp.f32 %v1589_v35  ;;  %v1601_v15 = vand.u32 2147483648, %v1589_v35  ;;  %v1599_v28 = vand.u32 2147483647, %v1589_v35  ;;  %vm1595_vm2 = vweird.f32 %v1589_v35 }
 0x9bc   :  { %2852 = vtanh.f32 %v1563_v1  ;;  %v1582_v55 = vor.u32 1.1754944e-38, %v1581_v39  ;;  %vm1580_vm6 = vcmp.eq.f32.partialorder %v1579_v10, 8.507059e+37 }
 0x9bd   :  { %v1602_v9 = vor.u32 1.1754944e-38, %v1601_v15  ;;  %vm1600_vm7 = vcmp.eq.f32.partialorder %v1599_v28, 8.507059e+37 }
 0x9c0   :  { %v2849_v50 = vpop.eup %2848 }
 0x9c1   :  { %v2851_v42 = vpop.eup %2850  ;;  %v1571_v59 = vmul.f32 %v2849_v50, %v1569_v20  ;;  %vm1576_vm15 = vweird.f32 %v2849_v50  ;;  %v813_v20 = vadd.f32 %v3859_v30, %v3680_v36 }
 0x9c2   :  { %v1591_v63 = vmul.f32 %v2851_v42, %v1589_v35  ;;  %vm1596_vm0 = vweird.f32 %v2851_v42  ;;  %vm1577_vm4 = vmor %vm1575_vm1, %vm1576_vm15  ;;  %v2853_v34 = vpop.eup %2852 }
 0x9c3   :  { %v1572_v25 = vsub.f32 1.0, %v1571_v59  ;;  %vm1597_vm5 = vmor %vm1595_vm2, %vm1596_vm0 }
 0x9c4   :  { %v1592_v56 = vsub.f32 1.0, %v1591_v63 }
 0x9c5   :  { %v1573_v3 = vmul.f32 %v2849_v50, %v1572_v25 }
 0x9c6   :  { %v1593_v49 = vmul.f32 %v2851_v42, %v1592_v56 }
 0x9c7   :  { %v1574_v52 = vadd.f32 %v2849_v50, %v1573_v3 }
 0x9c8   :  { %v1594_v62 = vadd.f32 %v2851_v42, %v1593_v49 }
 0x9c9   :  { %v1578_v8 = vsel %vm1577_vm4, %v2849_v50, %v1574_v52 }
 0x9ca   :  { %v1598_v33 = vsel %vm1597_vm5, %v2851_v42, %v1594_v62  ;;  %v1583_v11 = vsel %vm1580_vm6, %v1582_v55, %v1578_v8 }
 0x9cb   :  { %v1603_v32 = vsel %vm1600_vm7, %v1602_v9, %v1598_v33  ;;  %v1585_v5 = vsel %vm3219_vm3, %v2853_v34, %v1583_v11 }
 0x9cc   :  { %1610 = vrot.lane.b32.xlu1 %v1603_v32, %s3060_s27  ;;  %1605 = vrot.lane.b32.xlu0 %v1585_v5, %s3060_s27  ;;  %v1608_v1 = vmul.f32 %v1603_v32, %v3703_v27  ;;  %v800_v27 = vadd.f32 %v3424_v61, %v3678_v41 }
 0xa3e   :  { %v1606_v0 = vpop.permute.xlu0 %1605  ;;  %v1611_v19 = vpop.permute.xlu1 %1610 }
 0xa3f   :  { %v1607_v13 = vmul.f32 %v1606_v0, %v1585_v5 }
 0xa41   :  { %v3743_v37 = vadd.f32 %v1608_v1, %v1607_v13 }
 0xa43   :  { %2854 = vtanh.f32 %v3743_v37 }
 0xa49   :  { %v2855_v38 = vpop.eup %2854 }
 0xa4a   :  { %v1613_v4 = vmul.f32 %v2855_v38, %v1611_v19 }
 0xa4c   :  { %v1616_v51 = vpack.c.bf16 %v1613_v4, %v1613_v4 }
 0xa4e   :  { %1625 = vmatmul.bf16.vlgmr.msrb.gmra.mxu0 %v1616_v51  ;;  %1638 = vmatmul.bf16.vlgmr.msrb.gmra.mxu1 %v1616_v51 }
 0xa4f   :  { %1937 = vmatpush.bf16.msrb.mxu0 %v3566_v7  ;;  %1950 = vmatpush.bf16.msrb.mxu1 %v3568_v17 }
 0xa53   :  { %1938 = vmatpush.bf16.msrb.mxu0 %v3572_v46  ;;  %1951 = vmatpush.bf16.msrb.mxu1 %v3574_v6 }
 0xa57   :  { %1939 = vmatpush.bf16.msrb.mxu0 %v3577_v14  ;;  %1952 = vmatpush.bf16.msrb.mxu1 %v3580_v26 }
 0xa5b   :  { %1940 = vmatpush.bf16.msrb.mxu0 %v3583_v44  ;;  %1953 = vmatpush.bf16.msrb.mxu1 %v3586_v48 }
 0xa5f   :  { %1941 = vmatpush.bf16.msrb.mxu0 %v3590_v47  ;;  %1954 = vmatpush.bf16.msrb.mxu1 %v3592_v22 }
 0xa63   :  { %1942 = vmatpush.bf16.msrb.mxu0 %v3595_v18  ;;  %1955 = vmatpush.bf16.msrb.mxu1 %v3598_v12 }
 0xa67   :  { %1943 = vmatpush.bf16.msrb.mxu0 %v3601_v43  ;;  %1956 = vmatpush.bf16.msrb.mxu1 %v3604_v16 }
 0xa6b   :  { %1944 = vmatpush.bf16.msrb.mxu0 %v3607_v40  ;;  %1957 = vmatpush.bf16.msrb.mxu1 %v3610_v23 }
 0xacb   :  { %v1626_v35 = vpop.f32.mrf.mxu0  ;;  %v1639_v50 = vpop.f32.mrf.mxu1 }
 0xacc   :  { %v1643_v42 = vadd.f32 %v1626_v35, %v800_v27  ;;  %v1644_v59 = vadd.f32 %v1639_v50, %v813_v20 }
 0xace   :  { %v2566_v63 = vmul.f32 -1.442695, %v1643_v42  ;;  %v2567_v25 = vmul.f32 -1.442695, %v1644_v59 }
 0xad0   :  { %2856 = vpow2.f32 %v2566_v63 }
 0xad1   :  { %2858 = vpow2.f32 %v2567_v25 }
 0xad3   :  { %v1628_v56 = vpop.f32.mrf.mxu0  ;;  %v1641_v39 = vpop.f32.mrf.mxu1 }
 0xad6   :  { %v2857_v15 = vpop.eup %2856 }
 0xad7   :  { %v2859_v3 = vpop.eup %2858  ;;  %v1649_v10 = vadd.f32 1.0, %v2857_v15 }
 0xad8   :  { %v1669_v49 = vadd.f32 1.0, %v2859_v3 }
 0xad9   :  { %2860 = vrcp.f32 %v1649_v10  ;;  %v1661_v8 = vand.u32 2147483648, %v1649_v10  ;;  %v1659_v11 = vand.u32 2147483647, %v1649_v10  ;;  %vm1655_vm10 = vweird.f32 %v1649_v10 }
 0xada   :  { %2862 = vrcp.f32 %v1669_v49  ;;  %v1681_v34 = vand.u32 2147483648, %v1669_v49  ;;  %v1679_v5 = vand.u32 2147483647, %v1669_v49  ;;  %vm1675_vm11 = vweird.f32 %v1669_v49 }
 0xadb   :  { %2864 = vtanh.f32 %v1643_v42  ;;  %v1662_v13 = vor.u32 1.1754944e-38, %v1661_v8  ;;  %vm1660_vm14 = vcmp.eq.f32.partialorder %v1659_v11, 8.507059e+37 }
 0xadc   :  { %v1682_v38 = vor.u32 1.1754944e-38, %v1681_v34  ;;  %vm1680_vm15 = vcmp.eq.f32.partialorder %v1679_v5, 8.507059e+37 }
 0xadf   :  { %v2861_v61 = vpop.eup %2860 }
 0xae0   :  { %v2863_v28 = vpop.eup %2862  ;;  %v1651_v52 = vmul.f32 %v2861_v61, %v1649_v10  ;;  %vm1656_vm8 = vweird.f32 %v2861_v61 }
 0xae1   :  { %v1671_v62 = vmul.f32 %v2863_v28, %v1669_v49  ;;  %vm1676_vm9 = vweird.f32 %v2863_v28  ;;  %vm1657_vm12 = vmor %vm1655_vm10, %vm1656_vm8  ;;  %v2865_v4 = vpop.eup %2864 }
 0xae2   :  { %v1652_v55 = vsub.f32 1.0, %v1651_v52  ;;  %vm1677_vm13 = vmor %vm1675_vm11, %vm1676_vm9 }
 0xae3   :  { %v1672_v9 = vsub.f32 1.0, %v1671_v62 }
 0xae4   :  { %v1653_v33 = vmul.f32 %v2861_v61, %v1652_v55 }
 0xae5   :  { %v1673_v32 = vmul.f32 %v2863_v28, %v1672_v9 }
 0xae6   :  { %v1654_v0 = vadd.f32 %v2861_v61, %v1653_v33 }
 0xae7   :  { %v1674_v1 = vadd.f32 %v2863_v28, %v1673_v32 }
 0xae8   :  { %v1658_v19 = vsel %vm1657_vm12, %v2861_v61, %v1654_v0 }
 0xae9   :  { %v1678_v51 = vsel %vm1677_vm13, %v2863_v28, %v1674_v1  ;;  %v1663_v27 = vsel %vm1660_vm14, %v1662_v13, %v1658_v19 }
 0xaea   :  { %v1683_v30 = vsel %vm1680_vm15, %v1682_v38, %v1678_v51  ;;  %v1665_v20 = vsel %vm3219_vm3, %v2865_v4, %v1663_v27 }
 0xaeb   :  { %1690 = vrot.lane.b32.xlu0 %v1683_v30, %s3060_s27  ;;  %1685 = vrot.lane.b32.xlu2 %v1665_v20, %s3060_s27  ;;  %v1688_v42 = vmul.f32 %v1683_v30, %v3743_v37 }
 0xb45   :  { %v1686_v35 = vpop.permute.xlu2 %1685 }
 0xb46   :  { %v1687_v50 = vmul.f32 %v1686_v35, %v1665_v20  ;;  %v1016_v20 = vadd.f32 %v3520_v57, %v3678_v41  ;;  %v1029_v35 = vadd.f32 %v3522_v58, %v3680_v36 }
 0xb48   :  { %v3771_v59 = vadd.f32 %v1688_v42, %v1687_v50 }
 0xb4a   :  { %2866 = vtanh.f32 %v3771_v59 }
 0xb50   :  { %v2867_v63 = vpop.eup %2866 }
 0xb5d   :  { %v1691_v25 = vpop.permute.xlu0 %1690 }
 0xb5e   :  { %v1693_v56 = vmul.f32 %v2867_v63, %v1691_v25 }
 0xb60   :  { %v1696_v39 = vpack.c.bf16 %v1693_v56, %v1693_v56 }
 0xb62   :  { %1705 = vmatmul.bf16.vlgmr.msra.gmra.mxu2 %v1696_v39  ;;  %1718 = vmatmul.bf16.vlgmr.msra.gmra.mxu3 %v1696_v39 }
 0xb63   :  { %2017 = vmatpush.bf16.msra.mxu2 %v3566_v7  ;;  %2030 = vmatpush.bf16.msra.mxu3 %v3568_v17  ;;  %v908_v7 = vadd.f32 %v3472_v2, %v3678_v41  ;;  %v921_v17 = vadd.f32 %v3474_v60, %v3680_v36 }
 0xb67   :  { %2018 = vmatpush.bf16.msra.mxu2 %v3572_v46  ;;  %2031 = vmatpush.bf16.msra.mxu3 %v3574_v6 }
 0xb6b   :  { %2019 = vmatpush.bf16.msra.mxu2 %v3577_v14  ;;  %2032 = vmatpush.bf16.msra.mxu3 %v3580_v26 }
 0xb6f   :  { %2020 = vmatpush.bf16.msra.mxu2 %v3583_v44  ;;  %2033 = vmatpush.bf16.msra.mxu3 %v3586_v48 }
 0xb73   :  { %2021 = vmatpush.bf16.msra.mxu2 %v3590_v47  ;;  %2034 = vmatpush.bf16.msra.mxu3 %v3592_v22 }
 0xb77   :  { %2022 = vmatpush.bf16.msra.mxu2 %v3595_v18  ;;  %2035 = vmatpush.bf16.msra.mxu3 %v3598_v12 }
 0xb7b   :  { %2023 = vmatpush.bf16.msra.mxu2 %v3601_v43  ;;  %2036 = vmatpush.bf16.msra.mxu3 %v3604_v16 }
 0xb7f   :  { %2024 = vmatpush.bf16.msra.mxu2 %v3607_v40  ;;  %2037 = vmatpush.bf16.msra.mxu3 %v3610_v23 }
 0xbe5   :  { %v1706_v46 = vpop.f32.mrf.mxu2  ;;  %v1719_v6 = vpop.f32.mrf.mxu3 }
 0xbe6   :  { %v1723_v14 = vadd.f32 %v1706_v46, %v908_v7  ;;  %v1724_v26 = vadd.f32 %v1719_v6, %v921_v17 }
 0xbe8   :  { %v2568_v44 = vmul.f32 -1.442695, %v1723_v14  ;;  %v2569_v48 = vmul.f32 -1.442695, %v1724_v26 }
 0xbea   :  { %2868 = vpow2.f32 %v2568_v44 }
 0xbeb   :  { %2870 = vpow2.f32 %v2569_v48 }
 0xbed   :  { %v1708_v47 = vpop.f32.mrf.mxu2  ;;  %v1721_v22 = vpop.f32.mrf.mxu3 }
 0xbf0   :  { %v2869_v18 = vpop.eup %2868 }
 0xbf1   :  { %v2871_v12 = vpop.eup %2870  ;;  %v1729_v43 = vadd.f32 1.0, %v2869_v18 }
 0xbf2   :  { %v1749_v16 = vadd.f32 1.0, %v2871_v12 }
 0xbf3   :  { %2872 = vrcp.f32 %v1729_v43  ;;  %v1741_v3 = vand.u32 2147483648, %v1729_v43  ;;  %v1739_v61 = vand.u32 2147483647, %v1729_v43  ;;  %vm1735_vm2 = vweird.f32 %v1729_v43 }
 0xbf4   :  { %2874 = vrcp.f32 %v1749_v16  ;;  %v1761_v10 = vand.u32 2147483648, %v1749_v16  ;;  %v1759_v52 = vand.u32 2147483647, %v1749_v16  ;;  %vm1755_vm4 = vweird.f32 %v1749_v16 }
 0xbf5   :  { %2876 = vtanh.f32 %v1723_v14  ;;  %v1742_v9 = vor.u32 1.1754944e-38, %v1741_v3  ;;  %vm1740_vm7 = vcmp.eq.f32.partialorder %v1739_v61, 8.507059e+37 }
 0xbf6   :  { %v1762_v8 = vor.u32 1.1754944e-38, %v1761_v10  ;;  %vm1760_vm8 = vcmp.eq.f32.partialorder %v1759_v52, 8.507059e+37 }
 0xbf9   :  { %v2873_v2 = vpop.eup %2872 }
 0xbfa   :  { %v2875_v40 = vpop.eup %2874  ;;  %v1731_v23 = vmul.f32 %v2873_v2, %v1729_v43  ;;  %vm1736_vm0 = vweird.f32 %v2873_v2 }
 0xbfb   :  { %v1751_v60 = vmul.f32 %v2875_v40, %v1749_v16  ;;  %vm1756_vm1 = vweird.f32 %v2875_v40  ;;  %vm1737_vm5 = vmor %vm1735_vm2, %vm1736_vm0  ;;  %v2877_v33 = vpop.eup %2876 }
 0xbfc   :  { %v1732_v37 = vsub.f32 1.0, %v1731_v23  ;;  %vm1757_vm6 = vmor %vm1755_vm4, %vm1756_vm1 }
 0xbfd   :  { %v1752_v15 = vsub.f32 1.0, %v1751_v60 }
 0xbfe   :  { %v1733_v49 = vmul.f32 %v2873_v2, %v1732_v37 }
 0xbff   :  { %v1753_v28 = vmul.f32 %v2875_v40, %v1752_v15 }
 0xc00   :  { %v1734_v62 = vadd.f32 %v2873_v2, %v1733_v49 }
 0xc01   :  { %v1754_v55 = vadd.f32 %v2875_v40, %v1753_v28 }
 0xc02   :  { %v1738_v34 = vsel %vm1737_vm5, %v2873_v2, %v1734_v62 }
 0xc03   :  { %v1758_v11 = vsel %vm1757_vm6, %v2875_v40, %v1754_v55  ;;  %v1743_v32 = vsel %vm1740_vm7, %v1742_v9, %v1738_v34 }
 0xc04   :  { %v1763_v5 = vsel %vm1760_vm8, %v1762_v8, %v1758_v11  ;;  %v1745_v0 = vsel %vm3219_vm3, %v2877_v33, %v1743_v32  ;;  %v1124_v32 = vadd.f32 %v3552_v24, %v3678_v41 }
 0xc05   :  { %1770 = vrot.lane.b32.xlu2 %v1763_v5, %s3060_s27  ;;  %1765 = vrot.lane.b32.xlu1 %v1745_v0, %s3060_s27  ;;  %v1768_v13 = vmul.f32 %v1763_v5, %v3771_v59  ;;  %v1137_v5 = vadd.f32 %v3554_v29, %v3680_v36 }
 0xc5f   :  { %v1771_v51 = vpop.permute.xlu2 %1770 }
 0xc77   :  { %v1766_v1 = vpop.permute.xlu1 %1765 }
 0xc78   :  { %v1767_v38 = vmul.f32 %v1766_v1, %v1745_v0 }
 0xc7a   :  { %v1769_v19 = vadd.f32 %v1768_v13, %v1767_v38 }
 0xc7c   :  { %2878 = vtanh.f32 %v1769_v19 }
 0xc82   :  { %v2879_v4 = vpop.eup %2878 }
 0xc83   :  { %v1773_v27 = vmul.f32 %v2879_v4, %v1771_v51 }
 0xc85   :  { %v1776_v30 = vpack.c.bf16 %v1773_v27, %v1773_v27 }
 0xc87   :  { %1785 = vmatmul.bf16.vlgmr.msra.gmra.mxu0 %v1776_v30  ;;  %1798 = vmatmul.bf16.vlgmr.msra.gmra.mxu1 %v1776_v30 }
 0xd04   :  { %v1786_v50 = vpop.f32.mrf.mxu0  ;;  %v1799_v42 = vpop.f32.mrf.mxu1 }
 0xd05   :  { %v1803_v63 = vadd.f32 %v1786_v50, %v1016_v20  ;;  %v1804_v25 = vadd.f32 %v1799_v42, %v1029_v35 }
 0xd07   :  { %v2570_v59 = vmul.f32 -1.442695, %v1803_v63  ;;  %v2571_v56 = vmul.f32 -1.442695, %v1804_v25 }
 0xd09   :  { %2880 = vpow2.f32 %v2570_v59 }
 0xd0a   :  { %2882 = vpow2.f32 %v2571_v56 }
 0xd0c   :  { %v1788_v39 = vpop.f32.mrf.mxu0  ;;  %v1801_v7 = vpop.f32.mrf.mxu1 }
 0xd0f   :  { %v2881_v17 = vpop.eup %2880 }
 0xd10   :  { %v2883_v46 = vpop.eup %2882  ;;  %v1809_v6 = vadd.f32 1.0, %v2881_v17 }
 0xd11   :  { %v1829_v14 = vadd.f32 1.0, %v2883_v46 }
 0xd12   :  { %2884 = vrcp.f32 %v1809_v6  ;;  %v1821_v22 = vand.u32 2147483648, %v1809_v6  ;;  %v1819_v43 = vand.u32 2147483647, %v1809_v6  ;;  %vm1815_vm11 = vweird.f32 %v1809_v6 }
 0xd13   :  { %2886 = vrcp.f32 %v1829_v14  ;;  %v1841_v18 = vand.u32 2147483648, %v1829_v14  ;;  %v1839_v2 = vand.u32 2147483647, %v1829_v14  ;;  %vm1835_vm12 = vweird.f32 %v1829_v14 }
 0xd14   :  { %2888 = vtanh.f32 %v1803_v63  ;;  %v1822_v60 = vor.u32 1.1754944e-38, %v1821_v22  ;;  %vm1820_vm15 = vcmp.eq.f32.partialorder %v1819_v43, 8.507059e+37 }
 0xd15   :  { %v1842_v37 = vor.u32 1.1754944e-38, %v1841_v18  ;;  %vm1840_vm0 = vcmp.eq.f32.partialorder %v1839_v2, 8.507059e+37 }
 0xd18   :  { %v2885_v57 = vpop.eup %2884 }
 0xd19   :  { %v2887_v26 = vpop.eup %2886  ;;  %v1811_v44 = vmul.f32 %v2885_v57, %v1809_v6  ;;  %vm1816_vm9 = vweird.f32 %v2885_v57 }
 0xd1a   :  { %v1831_v58 = vmul.f32 %v2887_v26, %v1829_v14  ;;  %vm1836_vm10 = vweird.f32 %v2887_v26  ;;  %vm1817_vm13 = vmor %vm1815_vm11, %vm1816_vm9  ;;  %v2889_v3 = vpop.eup %2888 }
 0xd1b   :  { %v1812_v48 = vsub.f32 1.0, %v1811_v44  ;;  %vm1837_vm14 = vmor %vm1835_vm12, %vm1836_vm10 }
 0xd1c   :  { %v1832_v47 = vsub.f32 1.0, %v1831_v58 }
 0xd1d   :  { %v1813_v12 = vmul.f32 %v2885_v57, %v1812_v48 }
 0xd1e   :  { %v1833_v16 = vmul.f32 %v2887_v26, %v1832_v47 }
 0xd1f   :  { %v1814_v40 = vadd.f32 %v2885_v57, %v1813_v12 }
 0xd20   :  { %v1834_v23 = vadd.f32 %v2887_v26, %v1833_v16 }
 0xd21   :  { %v1818_v15 = vsel %vm1817_vm13, %v2885_v57, %v1814_v40 }
 0xd22   :  { %v1838_v10 = vsel %vm1837_vm14, %v2887_v26, %v1834_v23  ;;  %v1823_v49 = vsel %vm1820_vm15, %v1822_v60, %v1818_v15 }
 0xd23   :  { %v1843_v61 = vsel %vm1840_vm0, %v1842_v37, %v1838_v10  ;;  %v1825_v28 = vsel %vm3219_vm3, %v2889_v3, %v1823_v49  ;;  %v1232_v3 = vadd.f32 %v3674_v31, %v3678_v41  ;;  %v1245_v10 = vadd.f32 %v3676_v53, %v3680_v36 }
 0xd24   :  { %1850 = vrot.lane.b32.xlu1 %v1843_v61, %s3060_s27  ;;  %1845 = vrot.lane.b32.xlu0 %v1825_v28, %s3060_s27  ;;  %v1848_v62 = vmul.f32 %v1843_v61, %v1769_v19 }
 0xd96   :  { %v1846_v52 = vpop.permute.xlu0 %1845  ;;  %v1851_v34 = vpop.permute.xlu1 %1850 }
 0xd97   :  { %v1847_v55 = vmul.f32 %v1846_v52, %v1825_v28 }
 0xd99   :  { %v1849_v9 = vadd.f32 %v1848_v62, %v1847_v55 }
 0xd9b   :  { %2890 = vtanh.f32 %v1849_v9 }
 0xda1   :  { %v2891_v8 = vpop.eup %2890 }
 0xda2   :  { %v1853_v33 = vmul.f32 %v2891_v8, %v1851_v34 }
 0xda4   :  { %v1856_v11 = vpack.c.bf16 %v1853_v33, %v1853_v33 }
 0xda6   :  { %1865 = vmatmul.bf16.vlgmr.msrb.gmra.mxu2 %v1856_v11  ;;  %1878 = vmatmul.bf16.vlgmr.msrb.gmra.mxu3 %v1856_v11 }
 0xe29   :  { %v1866_v0 = vpop.f32.mrf.mxu2  ;;  %v1879_v1 = vpop.f32.mrf.mxu3 }
 0xe2a   :  { %v1883_v13 = vadd.f32 %v1866_v0, %v1124_v32  ;;  %v1884_v38 = vadd.f32 %v1879_v1, %v1137_v5 }
 0xe2c   :  { %v2572_v19 = vmul.f32 -1.442695, %v1883_v13  ;;  %v2573_v4 = vmul.f32 -1.442695, %v1884_v38 }
 0xe2e   :  { %2892 = vpow2.f32 %v2572_v19 }
 0xe2f   :  { %2894 = vpow2.f32 %v2573_v4 }
 0xe31   :  { %v1868_v51 = vpop.f32.mrf.mxu2  ;;  %v1881_v27 = vpop.f32.mrf.mxu3 }
 0xe34   :  { %v2893_v30 = vpop.eup %2892 }
 0xe35   :  { %v2895_v20 = vpop.eup %2894  ;;  %v1889_v35 = vadd.f32 1.0, %v2893_v30 }
 0xe36   :  { %v1909_v50 = vadd.f32 1.0, %v2895_v20 }
 0xe37   :  { %2896 = vrcp.f32 %v1889_v35  ;;  %v1901_v56 = vand.u32 2147483648, %v1889_v35  ;;  %v1899_v17 = vand.u32 2147483647, %v1889_v35  ;;  %vm1895_vm4 = vweird.f32 %v1889_v35 }
 0xe38   :  { %2898 = vrcp.f32 %v1909_v50  ;;  %v1921_v39 = vand.u32 2147483648, %v1909_v50  ;;  %v1919_v6 = vand.u32 2147483647, %v1909_v50  ;;  %vm1915_vm5 = vweird.f32 %v1909_v50 }
 0xe39   :  { %2900 = vtanh.f32 %v1883_v13  ;;  %v1902_v26 = vor.u32 1.1754944e-38, %v1901_v56  ;;  %vm1900_vm8 = vcmp.eq.f32.partialorder %v1899_v17, 8.507059e+37 }
 0xe3a   :  { %v1922_v44 = vor.u32 1.1754944e-38, %v1921_v39  ;;  %vm1920_vm9 = vcmp.eq.f32.partialorder %v1919_v6, 8.507059e+37 }
 0xe3d   :  { %v2897_v24 = vpop.eup %2896 }
 0xe3e   :  { %v2899_v42 = vpop.eup %2898  ;;  %v1891_v63 = vmul.f32 %v2897_v24, %v1889_v35  ;;  %vm1896_vm1 = vweird.f32 %v2897_v24 }
 0xe3f   :  { %v1911_v29 = vmul.f32 %v2899_v42, %v1909_v50  ;;  %vm1916_vm2 = vweird.f32 %v2899_v42  ;;  %vm1897_vm6 = vmor %vm1895_vm4, %vm1896_vm1  ;;  %v2901_v48 = vpop.eup %2900 }
 0xe40   :  { %v1892_v25 = vsub.f32 1.0, %v1891_v63  ;;  %vm1917_vm7 = vmor %vm1915_vm5, %vm1916_vm2 }
 0xe41   :  { %v1912_v59 = vsub.f32 1.0, %v1911_v29 }
 0xe42   :  { %v1893_v7 = vmul.f32 %v2897_v24, %v1892_v25 }
 0xe43   :  { %v1913_v46 = vmul.f32 %v2899_v42, %v1912_v59 }
 0xe44   :  { %v1894_v14 = vadd.f32 %v2897_v24, %v1893_v7 }
 0xe45   :  { %v1914_v57 = vadd.f32 %v2899_v42, %v1913_v46 }
 0xe46   :  { %v1898_v58 = vsel %vm1897_vm6, %v2897_v24, %v1894_v14 }
 0xe47   :  { %v1918_v47 = vsel %vm1917_vm7, %v2899_v42, %v1914_v57  ;;  %v1903_v22 = vsel %vm1900_vm8, %v1902_v26, %v1898_v58  ;;  %v1353_v58 = vadd.f32 %v3732_v45, %v3680_v36 }
 0xe48   :  { %v1923_v18 = vsel %vm1920_vm9, %v1922_v44, %v1918_v47  ;;  %v1905_v12 = vsel %vm3219_vm3, %v2901_v48, %v1903_v22  ;;  %v1340_v44 = vadd.f32 %v3730_v21, %v3678_v41  ;;  %v2717_v22 = vld [vmem:[#allocation9 + $0x38] sm:$0xff]  ;;  %v2714_v41 = vld [vmem:[#allocation9 + $0x20] sm:$0xff] }
 0xe49   :  { %1930 = vrot.lane.b32.xlu0 %v1923_v18, %s3060_s27  ;;  %1925 = vrot.lane.b32.xlu2 %v1905_v12, %s3060_s27  ;;  %v1928_v2 = vmul.f32 %v1923_v18, %v1849_v9 }
 0xe4a   :  { %2160 = vmatpush.bf16.msra.mxu0 %v2717_v22 }
 0xea3   :  { %v1926_v43 = vpop.permute.xlu2 %1925 }
 0xea4   :  { %v1927_v16 = vmul.f32 %v1926_v43, %v1905_v12  ;;  %v2716_v43 = vld [vmem:[#allocation9 + $0x30] sm:$0xff] }
 0xea5   :  { %2161 = vmatpush.bf16.msra.mxu0 %v2716_v43 }
 0xea6   :  { %v1929_v40 = vadd.f32 %v1928_v2, %v1927_v16 }
 0xea8   :  { %2902 = vtanh.f32 %v1929_v40 }
 0xeae   :  { %v2903_v23 = vpop.eup %2902 }
 0xebb   :  { %v1931_v60 = vpop.permute.xlu0 %1930 }
 0xebc   :  { %v1933_v37 = vmul.f32 %v2903_v23, %v1931_v60 }
 0xebe   :  { %v1936_v15 = vpack.c.bf16 %v1933_v37, %v1933_v37 }
 0xec0   :  { %1945 = vmatmul.bf16.vlgmr.msrb.gmra.mxu0 %v1936_v15  ;;  %1958 = vmatmul.bf16.vlgmr.msrb.gmra.mxu1 %v1936_v15 }
 0xf3d   :  { %v1946_v49 = vpop.f32.mrf.mxu0  ;;  %v1959_v61 = vpop.f32.mrf.mxu1 }
 0xf3e   :  { %v1963_v28 = vadd.f32 %v1946_v49, %v1232_v3  ;;  %v1964_v52 = vadd.f32 %v1959_v61, %v1245_v10 }
 0xf40   :  { %v2574_v62 = vmul.f32 -1.442695, %v1963_v28  ;;  %v2575_v55 = vmul.f32 -1.442695, %v1964_v52 }
 0xf42   :  { %2904 = vpow2.f32 %v2574_v62 }
 0xf43   :  { %2906 = vpow2.f32 %v2575_v55 }
 0xf45   :  { %v1948_v9 = vpop.f32.mrf.mxu0  ;;  %v1961_v8 = vpop.f32.mrf.mxu1 }
 0xf48   :  { %v2905_v34 = vpop.eup %2904 }
 0xf49   :  { %v2907_v33 = vpop.eup %2906  ;;  %v1969_v11 = vadd.f32 1.0, %v2905_v34 }
 0xf4a   :  { %v1989_v32 = vadd.f32 1.0, %v2907_v33 }
 0xf4b   :  { %2908 = vrcp.f32 %v1969_v11  ;;  %v1981_v38 = vand.u32 2147483648, %v1969_v11  ;;  %v1979_v51 = vand.u32 2147483647, %v1969_v11  ;;  %vm1975_vm12 = vweird.f32 %v1969_v11 }
 0xf4c   :  { %2910 = vrcp.f32 %v1989_v32  ;;  %v2001_v19 = vand.u32 2147483648, %v1989_v32  ;;  %v1999_v30 = vand.u32 2147483647, %v1989_v32  ;;  %vm1995_vm13 = vweird.f32 %v1989_v32 }
 0xf4d   :  { %2912 = vtanh.f32 %v1963_v28  ;;  %v1982_v50 = vor.u32 1.1754944e-38, %v1981_v38  ;;  %vm1980_vm0 = vcmp.eq.f32.partialorder %v1979_v51, 8.507059e+37  ;;  %v2711_v51 = vld [vmem:[#allocation9 + $0x8] sm:$0xff] }
 0xf4e   :  { %v2002_v24 = vor.u32 1.1754944e-38, %v2001_v19  ;;  %vm2000_vm1 = vcmp.eq.f32.partialorder %v1999_v30, 8.507059e+37  ;;  %v2713_v19 = vld [vmem:[#allocation9 + $0x18] sm:$0xff] }
 0xf4f   :  { %v2725_v30 = vld [vmem:[#allocation9 + $0x78] sm:$0xff] }
 0xf50   :  { %2241 = vmatpush.bf16.msra.mxu1 %v2725_v30 }
 0xf51   :  { %v2909_v31 = vpop.eup %2908 }
 0xf52   :  { %v2911_v5 = vpop.eup %2910  ;;  %v1971_v0 = vmul.f32 %v2909_v31, %v1969_v11  ;;  %vm1976_vm10 = vweird.f32 %v2909_v31 }
 0xf53   :  { %v1991_v53 = vmul.f32 %v2911_v5, %v1989_v32  ;;  %vm1996_vm11 = vweird.f32 %v2911_v5  ;;  %vm1977_vm14 = vmor %vm1975_vm12, %vm1976_vm10  ;;  %v2913_v63 = vpop.eup %2912 }
 0xf54   :  { %v1972_v1 = vsub.f32 1.0, %v1971_v0  ;;  %vm1997_vm15 = vmor %vm1995_vm13, %vm1996_vm11 }
 0xf55   :  { %v1992_v13 = vsub.f32 1.0, %v1991_v53 }
 0xf56   :  { %v1973_v4 = vmul.f32 %v2909_v31, %v1972_v1 }
 0xf57   :  { %v1993_v27 = vmul.f32 %v2911_v5, %v1992_v13 }
 0xf58   :  { %v1974_v20 = vadd.f32 %v2909_v31, %v1973_v4  ;;  %v2712_v4 = vld [vmem:[#allocation9 + $0x10] sm:$0xff] }
 0xf59   :  { %v1994_v35 = vadd.f32 %v2911_v5, %v1993_v27  ;;  %v2710_v27 = vld [vmem:[#allocation9] sm:$0xff] }
 0xf5a   :  { %v1978_v42 = vsel %vm1977_vm14, %v2909_v31, %v1974_v20  ;;  %v2724_v20 = vld [vmem:[#allocation9 + $0x70] sm:$0xff] }
 0xf5b   :  { %v1998_v29 = vsel %vm1997_vm15, %v2911_v5, %v1994_v35  ;;  %v1983_v25 = vsel %vm1980_vm0, %v1982_v50, %v1978_v42  ;;  %2242 = vmatpush.bf16.msra.mxu1 %v2724_v20  ;;  %v2723_v35 = vld [vmem:[#allocation9 + $0x68] sm:$0xff]  ;;  %v2721_v50 = vld [vmem:[#allocation9 + $0x58] sm:$0xff] }
 0xf5c   :  { %v2003_v59 = vsel %vm2000_vm1, %v2002_v24, %v1998_v29  ;;  %v1985_v56 = vsel %vm3219_vm3, %v2913_v63, %v1983_v25  ;;  %v2720_v29 = vld [vmem:[#allocation9 + $0x50] sm:$0xff] }
 0xf5d   :  { %2010 = vrot.lane.b32.xlu2 %v2003_v59, %s3060_s27  ;;  %2005 = vrot.lane.b32.xlu1 %v1985_v56, %s3060_s27  ;;  %v2008_v7 = vmul.f32 %v2003_v59, %v1929_v40  ;;  %v2715_v40 = vld [vmem:[#allocation9 + $0x28] sm:$0xff] }
 0xf5e   :  { %2162 = vmatpush.bf16.msra.mxu0 %v2715_v40 }
 0xf5f   :  { %2243 = vmatpush.bf16.msra.mxu1 %v2723_v35 }
 0xf62   :  { %2163 = vmatpush.bf16.msra.mxu0 %v2714_v41 }
 0xf63   :  { %2244 = vmatpush.bf16.msra.mxu1 %v2722_v54 }
 0xf66   :  { %2164 = vmatpush.bf16.msra.mxu0 %v2713_v19 }
 0xf67   :  { %2245 = vmatpush.bf16.msra.mxu1 %v2721_v50 }
 0xf6a   :  { %2165 = vmatpush.bf16.msra.mxu0 %v2712_v4 }
 0xf6b   :  { %2246 = vmatpush.bf16.msra.mxu1 %v2720_v29 }
 0xf6e   :  { %2166 = vmatpush.bf16.msra.mxu0 %v2711_v51 }
 0xf72   :  { %2167 = vmatpush.bf16.msra.mxu0 %v2710_v27 }
 0xfb7   :  { %v2011_v14 = vpop.permute.xlu2 %2010 }
 0xfcf   :  { %v2006_v39 = vpop.permute.xlu1 %2005 }
 0xfd0   :  { %v2007_v17 = vmul.f32 %v2006_v39, %v1985_v56 }
 0xfd2   :  { %v3823_v46 = vadd.f32 %v2008_v7, %v2007_v17  ;;  %v2719_v17 = vld [vmem:[#allocation9 + $0x48] sm:$0xff] }
 0xfd3   :  { %2247 = vmatpush.bf16.msra.mxu1 %v2719_v17 }
 0xfd4   :  { %2914 = vtanh.f32 %v3823_v46 }
 0xfda   :  { %v2915_v6 = vpop.eup %2914 }
 0xfdb   :  { %v2013_v57 = vmul.f32 %v2915_v6, %v2011_v14  ;;  %v2718_v6 = vld [vmem:[#allocation9 + $0x40] sm:$0xff] }
 0xfdc   :  { %2248 = vmatpush.bf16.msra.mxu1 %v2718_v6  ;;  %v2111_v14 = vld [vmem:[#allocation10 + $0x2] ss:$0 sm:$0xff] }
 0xfdd   :  { %v2016_v26 = vpack.c.bf16 %v2013_v57, %v2013_v57 }
 0xfdf   :  { %2025 = vmatmul.bf16.vlgmr.msra.gmra.mxu2 %v2016_v26  ;;  %2038 = vmatmul.bf16.vlgmr.msra.gmra.mxu3 %v2016_v26 }
0x1062   :  { %v2026_v48 = vpop.f32.mrf.mxu2  ;;  %v2039_v47 = vpop.f32.mrf.mxu3 }
0x1063   :  { %v2043_v18 = vadd.f32 %v2026_v48, %v1340_v44  ;;  %v2044_v12 = vadd.f32 %v2039_v47, %v1353_v58  ;;  %v2192_v48 = vld [vmem:[#allocation10 + $0x3] ss:$0 sm:$0xff] }
0x1065   :  { %v2576_v16 = vmul.f32 -1.442695, %v2043_v18  ;;  %v2577_v2 = vmul.f32 -1.442695, %v2044_v12 }
0x1067   :  { %2916 = vpow2.f32 %v2576_v16 }
0x1068   :  { %2918 = vpow2.f32 %v2577_v2 }
0x106a   :  { %v2028_v23 = vpop.f32.mrf.mxu2  ;;  %v2041_v60 = vpop.f32.mrf.mxu3 }
0x106d   :  { %v2917_v21 = vpop.eup %2916 }
0x106e   :  { %v2919_v37 = vpop.eup %2918  ;;  %v2049_v36 = vadd.f32 1.0, %v2917_v21 }
0x106f   :  { %v2069_v45 = vadd.f32 1.0, %v2919_v37 }
0x1070   :  { %2920 = vrcp.f32 %v2049_v36  ;;  %v2061_v52 = vand.u32 2147483648, %v2049_v36  ;;  %v2059_v9 = vand.u32 2147483647, %v2049_v36  ;;  %vm2055_vm5 = vweird.f32 %v2049_v36 }
0x1071   :  { %2922 = vrcp.f32 %v2069_v45  ;;  %v2081_v62 = vand.u32 2147483648, %v2069_v45  ;;  %v2079_v34 = vand.u32 2147483647, %v2069_v45  ;;  %vm2075_vm6 = vweird.f32 %v2069_v45 }
0x1072   :  { %2924 = vtanh.f32 %v2043_v18  ;;  %v2062_v32 = vor.u32 1.1754944e-38, %v2061_v52  ;;  %vm2060_vm9 = vcmp.eq.f32.partialorder %v2059_v9, 8.507059e+37 }
0x1073   :  { %v2082_v31 = vor.u32 1.1754944e-38, %v2081_v62  ;;  %vm2080_vm10 = vcmp.eq.f32.partialorder %v2079_v34, 8.507059e+37 }
0x1076   :  { %v2921_v15 = vpop.eup %2920 }
0x1077   :  { %v2923_v3 = vpop.eup %2922  ;;  %v2051_v10 = vmul.f32 %v2921_v15, %v2049_v36  ;;  %vm2056_vm2 = vweird.f32 %v2921_v15 }
0x1078   :  { %v2071_v49 = vmul.f32 %v2923_v3, %v2069_v45  ;;  %vm2076_vm4 = vweird.f32 %v2923_v3  ;;  %vm2057_vm7 = vmor %vm2055_vm5, %vm2056_vm2  ;;  %v2925_v0 = vpop.eup %2924 }
0x1079   :  { %v2052_v61 = vsub.f32 1.0, %v2051_v10  ;;  %vm2077_vm8 = vmor %vm2075_vm6, %vm2076_vm4 }
0x107a   :  { %v2072_v28 = vsub.f32 1.0, %v2071_v49 }
0x107b   :  { %v2053_v55 = vmul.f32 %v2921_v15, %v2052_v61 }
0x107c   :  { %v2073_v8 = vmul.f32 %v2923_v3, %v2072_v28 }
0x107d   :  { %v2054_v33 = vadd.f32 %v2921_v15, %v2053_v55 }
0x107e   :  { %v2074_v11 = vadd.f32 %v2923_v3, %v2073_v8 }
0x107f   :  { %v2058_v5 = vsel %vm2057_vm7, %v2921_v15, %v2054_v33 }
0x1080   :  { %v2078_v53 = vsel %vm2077_vm8, %v2923_v3, %v2074_v11  ;;  %v2063_v1 = vsel %vm2060_vm9, %v2062_v32, %v2058_v5 }
0x1081   :  { %v2083_v13 = vsel %vm2080_vm10, %v2082_v31, %v2078_v53  ;;  %v2065_v38 = vsel %vm3219_vm3, %v2925_v0, %v2063_v1 }
0x1082   :  { %2090 = vrot.lane.b32.xlu1 %v2083_v13, %s3060_s27  ;;  %2085 = vrot.lane.b32.xlu0 %v2065_v38, %s3060_s27  ;;  %v2088_v42 = vmul.f32 %v2083_v13, %v3823_v46 }
0x10f4   :  { %v2086_v24 = vpop.permute.xlu0 %2085  ;;  %v2091_v56 = vpop.permute.xlu1 %2090 }
0x10f5   :  { %v2087_v63 = vmul.f32 %v2086_v24, %v2065_v38 }
0x10f7   :  { %v2089_v25 = vadd.f32 %v2088_v42, %v2087_v63 }
0x10f9   :  { %2926 = vtanh.f32 %v2089_v25 }
0x10ff   :  { %v2927_v59 = vpop.eup %2926 }
0x1100   :  { %v2093_v39 = vmul.f32 %v2927_v59, %v2091_v56 }
0x1102   :  { %v2094_v7 = vpack.c.bf16 %v2093_v39, %v2093_v39 }
0x1104   :  { %2168 = vmatmul.bf16.vlgmr.msra.gmra.mxu0 %v2094_v7 }
0x1181   :  { %v2169_v57 = vpop.f32.mrf.mxu0 }
0x1182   :  { %v2170_v26 = vadd.f32 %v2169_v57, %v2111_v14 }
0x1184   :  { %v2173_v44 = vmax.f32 %v2170_v26, 0.0 }
0x1186   :  { %v2174_v46 = vpack.c.bf16 %v2173_v44, %v2173_v44 }
0x1188   :  { %2249 = vmatmul.bf16.vlgmr.msra.gmra.mxu1 %v2174_v46 }
0x1189   :  { %v2171_v58 = vpop.f32.mrf.mxu0 }
0x1205   :  { %v2250_v47 = vpop.f32.mrf.mxu1 }
0x1206   :  { %v2251_v22 = vadd.f32 %v2250_v47, %v2192_v48 }
0x1208   :  { %2254 = vst [vmem:[#allocation12] sm:$0xff] %v2251_v22 }
0x1209   :  { %2265 = dma.vmem_to_hbm [thread:$0]  %s2261_s3, 128, %s2263_s13, [#allocation6]  }
0x120d   :  { %v2252_v18 = vpop.f32.mrf.mxu1 }
0x120e   :  { %3054 = dma.done.wait [#allocation6], 128  }
0x120f   :  { %3055 = vsyncadd [#allocation6], 4294967168 }
0x1210   :  { %2270 = vsyncpa [#allocation5], 1 }
0x1211   :  { %2271 = vsyncpa [#allocation8], 1 }
0x1212   :  { %2272 = vsyncpa [#allocation11], 1 }
0x1213   :  { %2273 = vsyncpa [#allocation6], 1 }

</bundles_post_ra>
